<compile_context>
chip_gen: v5e
topology: v5e:2x2
jax: 0.10.0
libtpu: 0.0.40
codegen_flags: <defaults>
</compile_context>

<pallas_src>
import jax
import jax.numpy as jnp
from jax.experimental import pallas as pl
from jax.experimental.pallas import tpu as pltpu


def gru_recurrence_kernel(gx_ref, whh_t_ref, bhh_n_ref, hs_ref, h_ref):
    """One grid step == T_BLK timesteps of the GRU recurrence.

    gx_ref   : (T_BLK, B, 3H)  precomputed input-side gate pre-activations
                               (r/z parts already include bhh_r / bhh_z)
    whh_t_ref: (H, 3H)         transposed hidden-hidden weight (constant across grid)
    bhh_n_ref: (1, H)          hidden-hidden bias, n-gate slice only
    hs_ref   : (T_BLK, B, H)   output hidden states (lane-dense, H multiple of 128)
    h_ref    : (B, H)          VMEM scratch carrying h across grid steps
    """
    blk = pl.program_id(0)

    @pl.when(blk == 0)
    def _():
        h_ref[...] = jnp.zeros_like(h_ref)

    hdim = h_ref.shape[-1]
    t_blk = gx_ref.shape[0]

    # Loaded once per block (not per timestep); already transposed -> no in-kernel .T
    whh_t = whh_t_ref[...]                       # (H, 3H)
    bhh_n = bhh_n_ref[...]                       # (1, H)

    def step(t, h):
        gx = gx_ref[t]                           # (B, 3H) dynamic leading-axis load
        # Only the h-dependent matmul remains on the serial critical path.
        gh = jnp.dot(h, whh_t, preferred_element_type=jnp.float32)         # (B, 3H)
        # PyTorch gate order: r, z, n.  H multiple of 128 -> lane-aligned slices.
        r = jax.nn.sigmoid(gx[:, :hdim] + gh[:, :hdim])
        z = jax.nn.sigmoid(gx[:, hdim:2 * hdim] + gh[:, hdim:2 * hdim])
        n = jnp.tanh(gx[:, 2 * hdim:] + r * (gh[:, 2 * hdim:] + bhh_n))    # bhh_n inside r*(.)
        h_new = (1.0 - z) * n + z * h
        hs_ref[t] = h_new.astype(hs_ref.dtype)   # lane-dense (B, H) store
        return h_new

    # h carried in vregs across the unrolled inner loop; one scratch store per block.
    h_ref[...] = jax.lax.fori_loop(0, t_blk, step, h_ref[...], unroll=True)


def gru_forward(x, params, *, t_block=8):
    """x: (B, T, input_size) float32 -> (B, T, input_size) float32 (eval mode)."""
    w1, b1, wih, whh, bih, bhh, w2, b2 = params
    B, T, I = x.shape
    H = w1.shape[0]
    assert H % 128 == 0, "hidden size must be lane-aligned (multiple of 128)"
    t_block = min(t_block, T)
    assert T % t_block == 0, "T must be divisible by t_block"

    x_tm = jnp.transpose(x, (1, 0, 2)).astype(jnp.float32)                 # (T, B, I)

    # Hoisted out of the serial recurrence: linear1 + ReLU + input-side gate projection
    # for all timesteps at once (parallel GEMMs, f32 accumulation).
    # TODO(synk): on v6e/v7x cast GEMM operands to bf16 (f32 accumulate) for 2x MXU /
    #             half the weight VMEM; kept f32 here for exact parity with the reference.
    x1 = jnp.maximum(jnp.einsum('tbi,hi->tbh', x_tm, w1) + b1, 0.0)        # (T, B, H)
    gx = jnp.einsum('tbh,gh->tbg', x1, wih) + bih                          # (T, B, 3H)

    # Fold the r/z slices of bhh into gx (only bhh_n must stay inside r*(.) in-kernel).
    bhh_rz_padded = jnp.concatenate(
        [bhh[:, :2 * H], jnp.zeros((1, H), jnp.float32)], axis=-1)         # (1, 3H)
    gx = gx + bhh_rz_padded
    bhh_n = bhh[:, 2 * H:]                                                 # (1, H)

    whh_t = jnp.transpose(whh)                                             # (H, 3H)

    # Constant-index weight blocks resident in VMEM for the whole grid.
    full_spec = lambda arr: pl.BlockSpec(arr.shape, lambda t: (0,) * arr.ndim)

    hs = pl.pallas_call(
        gru_recurrence_kernel,
        out_shape=jax.ShapeDtypeStruct((T, B, H), jnp.float32),
        grid_spec=pltpu.PrefetchScalarGridSpec(
            num_scalar_prefetch=0,
            grid=(T // t_block,),
            in_specs=[
                pl.BlockSpec((t_block, B, 3 * H), lambda t: (t, 0, 0)),    # gx time-slice
                full_spec(whh_t),
                full_spec(bhh_n),
            ],
            out_specs=pl.BlockSpec((t_block, B, H), lambda t: (t, 0, 0)),  # lane-dense h_t
            scratch_shapes=[pltpu.VMEM((B, H), jnp.float32)],
        ),
        compiler_params=pltpu.CompilerParams(
            dimension_semantics=("arbitrary",),         # serial recurrence over time blocks
            vmem_limit_bytes=32 * 1024 * 1024,          # explicit budget; fits v7x's 64 MiB
        ),
    )(gx, whh_t, bhh_n)

    # Dropout is identity in eval mode.
    # TODO(synk): training-mode dropout (p=0.1) via pltpu.prng_random_bits if needed.

    # Hoisted linear2 over all timesteps as one GEMM.
    y_tm = jnp.einsum('tbh,ih->tbi', hs, w2) + b2                          # (T, B, I)
    return jnp.transpose(y_tm, (1, 0, 2))                                  # (B, T, I)


def init_params(key, input_size, hidden_size):
    """Deterministic parameter init matching the module's __init__ shapes/rules."""
    k1, k2, k3, k4, k5, k6 = jax.random.split(key, 6)
    H, I = hidden_size, input_size

    # linear1: PyTorch default uniform(-1/sqrt(fan_in), 1/sqrt(fan_in))
    bound1 = 1.0 / jnp.sqrt(I)
    w1 = jax.random.uniform(k1, (H, I), jnp.float32, -bound1, bound1)
    b1 = jax.random.uniform(k2, (1, H), jnp.float32, -bound1, bound1)

    # GRU weight_ih_l0: kaiming normal (fan_in = H); weight_hh_l0: orthogonal; biases zero
    wih = jax.random.normal(k3, (3 * H, H), jnp.float32) * jnp.sqrt(2.0 / H)
    whh = jax.nn.initializers.orthogonal()(k4, (3 * H, H), jnp.float32)
    bih = jnp.zeros((1, 3 * H), jnp.float32)
    bhh = jnp.zeros((1, 3 * H), jnp.float32)

    # linear2: PyTorch default uniform with fan_in = H
    bound2 = 1.0 / jnp.sqrt(H)
    w2 = jax.random.uniform(k5, (I, H), jnp.float32, -bound2, bound2)
    b2 = jax.random.uniform(k6, (1, I), jnp.float32, -bound2, bound2)

    return (w1, b1, wih, whh, bih, bhh, w2, b2)


def gru_forward_ref(x, params):
    """Pure-JAX reference (lax.scan) for correctness checking."""
    w1, b1, wih, whh, bih, bhh, w2, b2 = params
    H = w1.shape[0]
    x_tm = jnp.transpose(x, (1, 0, 2))
    x1 = jnp.maximum(jnp.einsum('tbi,hi->tbh', x_tm, w1) + b1, 0.0)

    def step(h, xt):
        gx = xt @ wih.T + bih
        gh = h @ whh.T + bhh
        r = jax.nn.sigmoid(gx[:, :H] + gh[:, :H])
        z = jax.nn.sigmoid(gx[:, H:2 * H] + gh[:, H:2 * H])
        n = jnp.tanh(gx[:, 2 * H:] + r * gh[:, 2 * H:])
        h_new = (1.0 - z) * n + z * h
        return h_new, h_new

    h0 = jnp.zeros((x.shape[0], H), jnp.float32)
    _, hs = jax.lax.scan(step, h0, x1)
    y = jnp.einsum('tbh,ih->tbi', hs, w2) + b2
    return jnp.transpose(y, (1, 0, 2))


if __name__ == "__main__":
    # Module defaults: input_size=1, hidden_size=256 (lane-aligned). Small B/T.
    B, T, I, H = 2, 8, 1, 256

    key = jax.random.PRNGKey(0)
    kx, kp = jax.random.split(key)
    x = jax.random.normal(kx, (B, T, I), jnp.float32)
    params = init_params(kp, I, H)

    # t_block=4 -> grid=(2,) so the h carry across grid steps is exercised.
    y = jax.jit(lambda xx, pp: gru_forward(xx, pp, t_block=4))(x, params)
    y = jax.block_until_ready(y)

    y_ref = gru_forward_ref(x, params)
    assert y.shape == (B, T, I)
    assert jnp.allclose(y, y_ref, atol=1e-4, rtol=1e-4), "mismatch vs reference"

    print("KERNEL_OK")
</pallas_src>

<mosaic_0001>
module attributes {stable_mosaic.version = 11 : i64} {
  func.func @gru_recurrence_kernel(%arg0: i32, %arg1: memref<4x2x768xf32, #tpu.memory_space<vmem>>, %arg2: memref<256x768xf32, #tpu.memory_space<vmem>>, %arg3: memref<1x256xf32, #tpu.memory_space<vmem>>, %arg4: memref<4x2x256xf32, #tpu.memory_space<vmem>>, %arg5: memref<2x256xf32, #tpu.memory_space<vmem>>) attributes {dimension_semantics = [#tpu.dimension_semantics<arbitrary>], iteration_bounds = array<i64: 2>, scalar_prefetch = 0 : i64, scratch_operands = 1 : i64, tpu.core_type = #tpu.core_type<tc>, window_params = [{transform_indices = @transform_0, window_bounds = array<i64: 4, 2, 768>}, {pipeline_mode = #tpu.pipeline_mode<synchronous>, transform_indices = @transform_1, window_bounds = array<i64: 256, 768>}, {pipeline_mode = #tpu.pipeline_mode<synchronous>, transform_indices = @transform_2, window_bounds = array<i64: 1, 256>}, {transform_indices = @transform_3, window_bounds = array<i64: 4, 2, 256>}]} {
    %c0_i32 = arith.constant 0 : i32
    %0 = arith.cmpi eq, %arg0, %c0_i32 : i32
    %1 = arith.extui %0 : i1 to i32
    %c0_i32_0 = arith.constant 0 : i32
    %2 = arith.cmpi ne, %1, %c0_i32_0 : i32
    scf.if %2 {
      %cst_40 = arith.constant 0.000000e+00 : f32
      %151 = vector.broadcast %cst_40 : f32 to vector<2x256xf32>
      %c0_41 = arith.constant 0 : index
      %c0_42 = arith.constant 0 : index
      %152 = vector.load %arg5[%c0_41, %c0_42] : memref<2x256xf32, #tpu.memory_space<vmem>>, vector<2x256xf32>
      tpu.vector_store %arg5[%c0_41, %c0_42], %151 {strides = array<i32>} : memref<2x256xf32, #tpu.memory_space<vmem>>, vector<2x256xf32>,
    } else {
    }
    %c0 = arith.constant 0 : index
    %c0_1 = arith.constant 0 : index
    %3 = vector.load %arg2[%c0, %c0_1] : memref<256x768xf32, #tpu.memory_space<vmem>>, vector<256x768xf32>
    %c0_2 = arith.constant 0 : index
    %c0_3 = arith.constant 0 : index
    %4 = vector.load %arg3[%c0_2, %c0_3] : memref<1x256xf32, #tpu.memory_space<vmem>>, vector<1x256xf32>
    %c0_4 = arith.constant 0 : index
    %c0_5 = arith.constant 0 : index
    %5 = vector.load %arg5[%c0_4, %c0_5] : memref<2x256xf32, #tpu.memory_space<vmem>>, vector<2x256xf32>
    %c0_i32_6 = arith.constant 0 : i32
    %6 = arith.index_cast %c0_i32_6 : i32 to index
    %c0_7 = arith.constant 0 : index
    %c0_8 = arith.constant 0 : index
    %7 = vector.load %arg1[%6, %c0_7, %c0_8] : memref<4x2x768xf32, #tpu.memory_space<vmem>>, vector<1x2x768xf32>
    %8 = vector.shape_cast %7 : vector<1x2x768xf32> to vector<2x768xf32>
    %cst = arith.constant dense<0.000000e+00> : vector<2x768xf32>
    %9 = tpu.matmul %5, %3, %cst {dimension_numbers = #tpu.dot_dimension_numbers<[1], [0], [0], [1], [0, 0, 1, 1], [], []>} : vector<2x256xf32>, vector<256x768xf32>, vector<2x768xf32> -> vector<2x768xf32>
    %10 = vector.extract_strided_slice %8 {offsets = [0, 0], sizes = [2, 256], strides = [1, 1]} : vector<2x768xf32> to vector<2x256xf32>
    %11 = vector.extract_strided_slice %9 {offsets = [0, 0], sizes = [2, 256], strides = [1, 1]} : vector<2x768xf32> to vector<2x256xf32>
    %12 = arith.addf %10, %11 : vector<2x256xf32>
    %13 = arith.negf %12 : vector<2x256xf32>
    %14 = math.exp %13 : vector<2x256xf32>
    %cst_9 = arith.constant 1.000000e+00 : f32
    %15 = vector.broadcast %cst_9 : f32 to vector<2x256xf32>
    %16 = arith.addf %15, %14 : vector<2x256xf32>
    %17 = arith.divf %15, %16 : vector<2x256xf32>
    %18 = vector.extract_strided_slice %8 {offsets = [0, 256], sizes = [2, 256], strides = [1, 1]} : vector<2x768xf32> to vector<2x256xf32>
    %19 = vector.extract_strided_slice %9 {offsets = [0, 256], sizes = [2, 256], strides = [1, 1]} : vector<2x768xf32> to vector<2x256xf32>
    %20 = arith.addf %18, %19 : vector<2x256xf32>
    %21 = arith.negf %20 : vector<2x256xf32>
    %22 = math.exp %21 : vector<2x256xf32>
    %cst_10 = arith.constant 1.000000e+00 : f32
    %23 = vector.broadcast %cst_10 : f32 to vector<2x256xf32>
    %24 = arith.addf %23, %22 : vector<2x256xf32>
    %25 = arith.divf %23, %24 : vector<2x256xf32>
    %26 = vector.extract_strided_slice %8 {offsets = [0, 512], sizes = [2, 256], strides = [1, 1]} : vector<2x768xf32> to vector<2x256xf32>
    %27 = vector.extract_strided_slice %9 {offsets = [0, 512], sizes = [2, 256], strides = [1, 1]} : vector<2x768xf32> to vector<2x256xf32>
    %28 = vector.broadcast %4 : vector<1x256xf32> to vector<2x256xf32>
    %29 = arith.addf %27, %28 : vector<2x256xf32>
    %30 = arith.mulf %17, %29 : vector<2x256xf32>
    %31 = arith.addf %26, %30 : vector<2x256xf32>
    %32 = math.tanh %31 : vector<2x256xf32>
    %cst_11 = arith.constant 1.000000e+00 : f32
    %33 = vector.broadcast %cst_11 : f32 to vector<2x256xf32>
    %34 = arith.subf %33, %25 : vector<2x256xf32>
    %35 = arith.mulf %34, %32 : vector<2x256xf32>
    %36 = arith.mulf %25, %5 : vector<2x256xf32>
    %37 = arith.addf %35, %36 : vector<2x256xf32>
    %38 = arith.index_cast %c0_i32_6 : i32 to index
    %c0_12 = arith.constant 0 : index
    %c0_13 = arith.constant 0 : index
    %39 = vector.load %arg4[%38, %c0_12, %c0_13] : memref<4x2x256xf32, #tpu.memory_space<vmem>>, vector<1x2x256xf32>
    %40 = vector.shape_cast %39 : vector<1x2x256xf32> to vector<2x256xf32>
    %41 = vector.shape_cast %37 : vector<2x256xf32> to vector<1x2x256xf32>
    tpu.vector_store %arg4[%38, %c0_12, %c0_13], %41 {strides = array<i32>} : memref<4x2x256xf32, #tpu.memory_space<vmem>>, vector<1x2x256xf32>,
    %c1_i32 = arith.constant 1 : i32
    %42 = arith.index_cast %c1_i32 : i32 to index
    %c0_14 = arith.constant 0 : index
    %c0_15 = arith.constant 0 : index
    %43 = vector.load %arg1[%42, %c0_14, %c0_15] : memref<4x2x768xf32, #tpu.memory_space<vmem>>, vector<1x2x768xf32>
    %44 = vector.shape_cast %43 : vector<1x2x768xf32> to vector<2x768xf32>
    %cst_16 = arith.constant dense<0.000000e+00> : vector<2x768xf32>
    %45 = tpu.matmul %37, %3, %cst_16 {dimension_numbers = #tpu.dot_dimension_numbers<[1], [0], [0], [1], [0, 0, 1, 1], [], []>} : vector<2x256xf32>, vector<256x768xf32>, vector<2x768xf32> -> vector<2x768xf32>
    %46 = vector.extract_strided_slice %44 {offsets = [0, 0], sizes = [2, 256], strides = [1, 1]} : vector<2x768xf32> to vector<2x256xf32>
    %47 = vector.extract_strided_slice %45 {offsets = [0, 0], sizes = [2, 256], strides = [1, 1]} : vector<2x768xf32> to vector<2x256xf32>
    %48 = arith.addf %46, %47 : vector<2x256xf32>
    %49 = arith.negf %48 : vector<2x256xf32>
    %50 = math.exp %49 : vector<2x256xf32>
    %cst_17 = arith.constant 1.000000e+00 : f32
    %51 = vector.broadcast %cst_17 : f32 to vector<2x256xf32>
    %52 = arith.addf %51, %50 : vector<2x256xf32>
    %53 = arith.divf %51, %52 : vector<2x256xf32>
    %54 = vector.extract_strided_slice %44 {offsets = [0, 256], sizes = [2, 256], strides = [1, 1]} : vector<2x768xf32> to vector<2x256xf32>
    %55 = vector.extract_strided_slice %45 {offsets = [0, 256], sizes = [2, 256], strides = [1, 1]} : vector<2x768xf32> to vector<2x256xf32>
    %56 = arith.addf %54, %55 : vector<2x256xf32>
    %57 = arith.negf %56 : vector<2x256xf32>
    %58 = math.exp %57 : vector<2x256xf32>
    %cst_18 = arith.constant 1.000000e+00 : f32
    %59 = vector.broadcast %cst_18 : f32 to vector<2x256xf32>
    %60 = arith.addf %59, %58 : vector<2x256xf32>
    %61 = arith.divf %59, %60 : vector<2x256xf32>
    %62 = vector.extract_strided_slice %44 {offsets = [0, 512], sizes = [2, 256], strides = [1, 1]} : vector<2x768xf32> to vector<2x256xf32>
    %63 = vector.extract_strided_slice %45 {offsets = [0, 512], sizes = [2, 256], strides = [1, 1]} : vector<2x768xf32> to vector<2x256xf32>
    %64 = vector.broadcast %4 : vector<1x256xf32> to vector<2x256xf32>
    %65 = arith.addf %63, %64 : vector<2x256xf32>
    %66 = arith.mulf %53, %65 : vector<2x256xf32>
    %67 = arith.addf %62, %66 : vector<2x256xf32>
    %68 = math.tanh %67 : vector<2x256xf32>
    %cst_19 = arith.constant 1.000000e+00 : f32
    %69 = vector.broadcast %cst_19 : f32 to vector<2x256xf32>
    %70 = arith.subf %69, %61 : vector<2x256xf32>
    %71 = arith.mulf %70, %68 : vector<2x256xf32>
    %72 = arith.mulf %61, %37 : vector<2x256xf32>
    %73 = arith.addf %71, %72 : vector<2x256xf32>
    %74 = arith.index_cast %c1_i32 : i32 to index
    %c0_20 = arith.constant 0 : index
    %c0_21 = arith.constant 0 : index
    %75 = vector.load %arg4[%74, %c0_20, %c0_21] : memref<4x2x256xf32, #tpu.memory_space<vmem>>, vector<1x2x256xf32>
    %76 = vector.shape_cast %75 : vector<1x2x256xf32> to vector<2x256xf32>
    %77 = vector.shape_cast %73 : vector<2x256xf32> to vector<1x2x256xf32>
    tpu.vector_store %arg4[%74, %c0_20, %c0_21], %77 {strides = array<i32>} : memref<4x2x256xf32, #tpu.memory_space<vmem>>, vector<1x2x256xf32>,
    %c2_i32 = arith.constant 2 : i32
    %78 = arith.index_cast %c2_i32 : i32 to index
    %c0_22 = arith.constant 0 : index
    %c0_23 = arith.constant 0 : index
    %79 = vector.load %arg1[%78, %c0_22, %c0_23] : memref<4x2x768xf32, #tpu.memory_space<vmem>>, vector<1x2x768xf32>
    %80 = vector.shape_cast %79 : vector<1x2x768xf32> to vector<2x768xf32>
    %cst_24 = arith.constant dense<0.000000e+00> : vector<2x768xf32>
    %81 = tpu.matmul %73, %3, %cst_24 {dimension_numbers = #tpu.dot_dimension_numbers<[1], [0], [0], [1], [0, 0, 1, 1], [], []>} : vector<2x256xf32>, vector<256x768xf32>, vector<2x768xf32> -> vector<2x768xf32>
    %82 = vector.extract_strided_slice %80 {offsets = [0, 0], sizes = [2, 256], strides = [1, 1]} : vector<2x768xf32> to vector<2x256xf32>
    %83 = vector.extract_strided_slice %81 {offsets = [0, 0], sizes = [2, 256], strides = [1, 1]} : vector<2x768xf32> to vector<2x256xf32>
    %84 = arith.addf %82, %83 : vector<2x256xf32>
    %85 = arith.negf %84 : vector<2x256xf32>
    %86 = math.exp %85 : vector<2x256xf32>
    %cst_25 = arith.constant 1.000000e+00 : f32
    %87 = vector.broadcast %cst_25 : f32 to vector<2x256xf32>
    %88 = arith.addf %87, %86 : vector<2x256xf32>
    %89 = arith.divf %87, %88 : vector<2x256xf32>
    %90 = vector.extract_strided_slice %80 {offsets = [0, 256], sizes = [2, 256], strides = [1, 1]} : vector<2x768xf32> to vector<2x256xf32>
    %91 = vector.extract_strided_slice %81 {offsets = [0, 256], sizes = [2, 256], strides = [1, 1]} : vector<2x768xf32> to vector<2x256xf32>
    %92 = arith.addf %90, %91 : vector<2x256xf32>
    %93 = arith.negf %92 : vector<2x256xf32>
    %94 = math.exp %93 : vector<2x256xf32>
    %cst_26 = arith.constant 1.000000e+00 : f32
    %95 = vector.broadcast %cst_26 : f32 to vector<2x256xf32>
    %96 = arith.addf %95, %94 : vector<2x256xf32>
    %97 = arith.divf %95, %96 : vector<2x256xf32>
    %98 = vector.extract_strided_slice %80 {offsets = [0, 512], sizes = [2, 256], strides = [1, 1]} : vector<2x768xf32> to vector<2x256xf32>
    %99 = vector.extract_strided_slice %81 {offsets = [0, 512], sizes = [2, 256], strides = [1, 1]} : vector<2x768xf32> to vector<2x256xf32>
    %100 = vector.broadcast %4 : vector<1x256xf32> to vector<2x256xf32>
    %101 = arith.addf %99, %100 : vector<2x256xf32>
    %102 = arith.mulf %89, %101 : vector<2x256xf32>
    %103 = arith.addf %98, %102 : vector<2x256xf32>
    %104 = math.tanh %103 : vector<2x256xf32>
    %cst_27 = arith.constant 1.000000e+00 : f32
    %105 = vector.broadcast %cst_27 : f32 to vector<2x256xf32>
    %106 = arith.subf %105, %97 : vector<2x256xf32>
    %107 = arith.mulf %106, %104 : vector<2x256xf32>
    %108 = arith.mulf %97, %73 : vector<2x256xf32>
    %109 = arith.addf %107, %108 : vector<2x256xf32>
    %110 = arith.index_cast %c2_i32 : i32 to index
    %c0_28 = arith.constant 0 : index
    %c0_29 = arith.constant 0 : index
    %111 = vector.load %arg4[%110, %c0_28, %c0_29] : memref<4x2x256xf32, #tpu.memory_space<vmem>>, vector<1x2x256xf32>
    %112 = vector.shape_cast %111 : vector<1x2x256xf32> to vector<2x256xf32>
    %113 = vector.shape_cast %109 : vector<2x256xf32> to vector<1x2x256xf32>
    tpu.vector_store %arg4[%110, %c0_28, %c0_29], %113 {strides = array<i32>} : memref<4x2x256xf32, #tpu.memory_space<vmem>>, vector<1x2x256xf32>,
    %c3_i32 = arith.constant 3 : i32
    %114 = arith.index_cast %c3_i32 : i32 to index
    %c0_30 = arith.constant 0 : index
    %c0_31 = arith.constant 0 : index
    %115 = vector.load %arg1[%114, %c0_30, %c0_31] : memref<4x2x768xf32, #tpu.memory_space<vmem>>, vector<1x2x768xf32>
    %116 = vector.shape_cast %115 : vector<1x2x768xf32> to vector<2x768xf32>
    %cst_32 = arith.constant dense<0.000000e+00> : vector<2x768xf32>
    %117 = tpu.matmul %109, %3, %cst_32 {dimension_numbers = #tpu.dot_dimension_numbers<[1], [0], [0], [1], [0, 0, 1, 1], [], []>} : vector<2x256xf32>, vector<256x768xf32>, vector<2x768xf32> -> vector<2x768xf32>
    %118 = vector.extract_strided_slice %116 {offsets = [0, 0], sizes = [2, 256], strides = [1, 1]} : vector<2x768xf32> to vector<2x256xf32>
    %119 = vector.extract_strided_slice %117 {offsets = [0, 0], sizes = [2, 256], strides = [1, 1]} : vector<2x768xf32> to vector<2x256xf32>
    %120 = arith.addf %118, %119 : vector<2x256xf32>
    %121 = arith.negf %120 : vector<2x256xf32>
    %122 = math.exp %121 : vector<2x256xf32>
    %cst_33 = arith.constant 1.000000e+00 : f32
    %123 = vector.broadcast %cst_33 : f32 to vector<2x256xf32>
    %124 = arith.addf %123, %122 : vector<2x256xf32>
    %125 = arith.divf %123, %124 : vector<2x256xf32>
    %126 = vector.extract_strided_slice %116 {offsets = [0, 256], sizes = [2, 256], strides = [1, 1]} : vector<2x768xf32> to vector<2x256xf32>
    %127 = vector.extract_strided_slice %117 {offsets = [0, 256], sizes = [2, 256], strides = [1, 1]} : vector<2x768xf32> to vector<2x256xf32>
    %128 = arith.addf %126, %127 : vector<2x256xf32>
    %129 = arith.negf %128 : vector<2x256xf32>
    %130 = math.exp %129 : vector<2x256xf32>
    %cst_34 = arith.constant 1.000000e+00 : f32
    %131 = vector.broadcast %cst_34 : f32 to vector<2x256xf32>
    %132 = arith.addf %131, %130 : vector<2x256xf32>
    %133 = arith.divf %131, %132 : vector<2x256xf32>
    %134 = vector.extract_strided_slice %116 {offsets = [0, 512], sizes = [2, 256], strides = [1, 1]} : vector<2x768xf32> to vector<2x256xf32>
    %135 = vector.extract_strided_slice %117 {offsets = [0, 512], sizes = [2, 256], strides = [1, 1]} : vector<2x768xf32> to vector<2x256xf32>
    %136 = vector.broadcast %4 : vector<1x256xf32> to vector<2x256xf32>
    %137 = arith.addf %135, %136 : vector<2x256xf32>
    %138 = arith.mulf %125, %137 : vector<2x256xf32>
    %139 = arith.addf %134, %138 : vector<2x256xf32>
    %140 = math.tanh %139 : vector<2x256xf32>
    %cst_35 = arith.constant 1.000000e+00 : f32
    %141 = vector.broadcast %cst_35 : f32 to vector<2x256xf32>
    %142 = arith.subf %141, %133 : vector<2x256xf32>
    %143 = arith.mulf %142, %140 : vector<2x256xf32>
    %144 = arith.mulf %133, %109 : vector<2x256xf32>
    %145 = arith.addf %143, %144 : vector<2x256xf32>
    %146 = arith.index_cast %c3_i32 : i32 to index
    %c0_36 = arith.constant 0 : index
    %c0_37 = arith.constant 0 : index
    %147 = vector.load %arg4[%146, %c0_36, %c0_37] : memref<4x2x256xf32, #tpu.memory_space<vmem>>, vector<1x2x256xf32>
    %148 = vector.shape_cast %147 : vector<1x2x256xf32> to vector<2x256xf32>
    %149 = vector.shape_cast %145 : vector<2x256xf32> to vector<1x2x256xf32>
    tpu.vector_store %arg4[%146, %c0_36, %c0_37], %149 {strides = array<i32>} : memref<4x2x256xf32, #tpu.memory_space<vmem>>, vector<1x2x256xf32>,
    %c4_i32 = arith.constant 4 : i32
    %c0_38 = arith.constant 0 : index
    %c0_39 = arith.constant 0 : index
    %150 = vector.load %arg5[%c0_38, %c0_39] : memref<2x256xf32, #tpu.memory_space<vmem>>, vector<2x256xf32>
    tpu.vector_store %arg5[%c0_38, %c0_39], %145 {strides = array<i32>} : memref<2x256xf32, #tpu.memory_space<vmem>>, vector<2x256xf32>,
    return
  }
  func.func @transform_0(%arg0: i32) -> (i32, i32, i32) {
    %c0_i32 = arith.constant 0 : i32
    %c0_i32_0 = arith.constant 0 : i32
    %c0_i32_1 = arith.constant 0 : i32
    return %arg0, %c0_i32, %c0_i32_0 : i32, i32, i32
  }
  func.func @transform_1(%arg0: i32) -> (i32, i32) {
    %c0_i32 = arith.constant 0 : i32
    %c0_i32_0 = arith.constant 0 : i32
    %c0_i32_1 = arith.constant 0 : i32
    return %c0_i32, %c0_i32_0 : i32, i32
  }
  func.func @transform_2(%arg0: i32) -> (i32, i32) {
    %c0_i32 = arith.constant 0 : i32
    %c0_i32_0 = arith.constant 0 : i32
    %c0_i32_1 = arith.constant 0 : i32
    return %c0_i32, %c0_i32_0 : i32, i32
  }
  func.func @transform_3(%arg0: i32) -> (i32, i32, i32) {
    %c0_i32 = arith.constant 0 : i32
    %c0_i32_0 = arith.constant 0 : i32
    %c0_i32_1 = arith.constant 0 : i32
    return %arg0, %c0_i32, %c0_i32_0 : i32, i32, i32
  }
}

</mosaic_0001>

<bundles_post_ra>
// kernel: _lambda_.1
= control target key start
LH: loop header
LB: loop body
LE: loop exit
PB: predicated region body
PF: predicated region fallthrough
CT: control target
= control target key end

     0   :  { %s2015_s12 = smov 0   ;;  %s4852_s0 = inlined_call_operand.vmem [shape: f32[8,2,768], index: 0, kind: input, shape index: {}]   ;;  %s4853_s1 = inlined_call_operand.vmem [shape: f32[256,768], index: 1, kind: input, shape index: {}]   ;;  %s4854_s2 = inlined_call_operand.vmem [shape: f32[1,256], index: 2, kind: input, shape index: {}]   ;;  %s4855_s3 = inlined_call_operand.vmem [shape: f32[8,2,256], index: 3, kind: output, shape index: {}]  }
   0x1 LB: > { %s1713_s13 = sadd.s32 4294967295, %s1992_s12   ;;  %p1717_p0 = scmp.ge.s32.totalorder %s1992_s12, 1  ;;  %s1992_s12 = sphi %s2015_s12, %s13_s12  }
   0x2   : > { %p139_p1 = scmp.lt.s32.totalorder %s1992_s12, 3 }
   0x4   : > { %p140_p2 = pnand %p1717_p0, %p139_p1 }
   0x6   : > { %143 = sbr.rel (%p140_p2) target bundleno = 933 (0x3a5), region = 32 }
   0xb   : > { %s1718_s14 = sshll.u32 %s1713_s13, 2  ;;  %p1723_p4 = scmp.ne.s32.totalorder %s1713_s13, 0 }
   0xc   : > { %p166_p3 = scmp.lt.s32.totalorder %s1718_s14, 7 }
   0xd   : > { %182 = sbr.rel (%p1723_p4) target bundleno = 20 (0x14), region = 36 }
   0xe   : > { %s5651_s14 = smov (!%p166_p3, %s1718_s14), 7 }
   0xf   : > { %s1744_s15 = smul.u32 12, %s5651_s14  ;;  %s1743_s16 = sshll.u32 %s5651_s14, 2 }
  0x10   : > { %s2026_s19 = scalar_lea.vmem %s4855_s3, %s1743_s16 }
  0x11   : > { %s2031_s22 = scalar_lea.vmem %s4852_s0, %s1744_s15 }
  0x12   : > { %v1994_v0 = vmov 0.0  }
  0x13   : > { %183 = vst [vmem:[#allocation2] sm:$0xf] %v1994_v0 }
  0x14 PF: > { %v2036_v1 = vld [vmem:[%s4853_s1 + $0x2d8] sm:$0xff]  ;;  %v2046_v3 = vld [vmem:[%s4853_s1 + $0x2a8] sm:$0xff]  ;;  %v2068_v7 = vld [vmem:[%s4853_s1 + $0x2d0] sm:$0xff]  ;;  %vm629_vm0 = vcmask 1041408  }
  0x15   : > { %v2041_v2 = vld [vmem:[%s4853_s1 + $0x5d8] sm:$0xff]  ;;  %426 = vmatpush.msra.mxu2 %v2036_v1  ;;  %v2053_v4 = vld [vmem:[%s4853_s1 + $0x5a8] sm:$0xff]  ;;  %v2080_v9 = vld [vmem:[%s4853_s1 + $0x5d0] sm:$0xff]  ;;  %386 = vmatpush.msra.mxu0 %v2068_v7 }
  0x16   : > { %446 = vmatpush.msra.mxu3 %v2041_v2  ;;  %v2058_v5 = vld [vmem:[%s4853_s1 + $0x278] sm:$0xff]  ;;  %v2075_v8 = vld [vmem:[%s4853_s1 + $0x248] sm:$0xff]  ;;  %406 = vmatpush.msra.mxu1 %v2080_v9  ;;  %v2092_v11 = vld [vmem:[%s4853_s1 + $0x2a0] sm:$0xff] }
  0x17   : > { %v2063_v6 = vld [vmem:[%s4853_s1 + $0x578] sm:$0xff]  ;;  %427 = vmatpush.msra.mxu2 %v2046_v3  ;;  %v2085_v10 = vld [vmem:[%s4853_s1 + $0x548] sm:$0xff]  ;;  %v2097_v12 = vld [vmem:[%s4853_s1 + $0x5a0] sm:$0xff]  ;;  %387 = vmatpush.msra.mxu0 %v2092_v11 }
  0x18   : > { %447 = vmatpush.msra.mxu3 %v2053_v4  ;;  %v2104_v13 = vld [vmem:[%s4853_s1 + $0x270] sm:$0xff]  ;;  %v2114_v15 = vld [vmem:[%s4853_s1 + $0x218] sm:$0xff]  ;;  %407 = vmatpush.msra.mxu1 %v2097_v12  ;;  %v2128_v17 = vld [vmem:[%s4853_s1 + $0x240] sm:$0xff] }
  0x19   : > { %428 = vmatpush.msra.mxu2 %v2058_v5  ;;  %v2109_v14 = vld [vmem:[%s4853_s1 + $0x570] sm:$0xff]  ;;  %v2119_v16 = vld [vmem:[%s4853_s1 + $0x518] sm:$0xff]  ;;  %v2133_v18 = vld [vmem:[%s4853_s1 + $0x540] sm:$0xff]  ;;  %388 = vmatpush.msra.mxu0 %v2104_v13 }
  0x1a   : > { %448 = vmatpush.msra.mxu3 %v2063_v6  ;;  %v2138_v19 = vld [vmem:[%s4853_s1 + $0x1e8] sm:$0xff]  ;;  %408 = vmatpush.msra.mxu1 %v2109_v14  ;;  %v2152_v21 = vld [vmem:[%s4853_s1 + $0x210] sm:$0xff]  ;;  %v2162_v23 = vld [vmem:[%s4853_s1 + $0x1b8] sm:$0xff] }
  0x1b   : > { %429 = vmatpush.msra.mxu2 %v2075_v8  ;;  %v2143_v20 = vld [vmem:[%s4853_s1 + $0x4e8] sm:$0xff]  ;;  %v2157_v22 = vld [vmem:[%s4853_s1 + $0x510] sm:$0xff]  ;;  %v2167_v24 = vld [vmem:[%s4853_s1 + $0x4b8] sm:$0xff]  ;;  %389 = vmatpush.msra.mxu0 %v2128_v17 }
  0x1c   : > { %449 = vmatpush.msra.mxu3 %v2085_v10  ;;  %409 = vmatpush.msra.mxu1 %v2133_v18  ;;  %v2176_v25 = vld [vmem:[%s4853_s1 + $0x1e0] sm:$0xff]  ;;  %v2186_v27 = vld [vmem:[%s4853_s1 + $0x188] sm:$0xff]  ;;  %v2200_v29 = vld [vmem:[%s4853_s1 + $0x1b0] sm:$0xff] }
  0x1d   : > { %430 = vmatpush.msra.mxu2 %v2114_v15  ;;  %v2181_v26 = vld [vmem:[%s4853_s1 + $0x4e0] sm:$0xff]  ;;  %v2191_v28 = vld [vmem:[%s4853_s1 + $0x488] sm:$0xff]  ;;  %390 = vmatpush.msra.mxu0 %v2152_v21  ;;  %v2205_v30 = vld [vmem:[%s4853_s1 + $0x4b0] sm:$0xff] }
  0x1e   : > { %450 = vmatpush.msra.mxu3 %v2119_v16  ;;  %410 = vmatpush.msra.mxu1 %v2157_v22  ;;  %v2210_v31 = vld [vmem:[%s4853_s1 + $0x158] sm:$0xff]  ;;  %v2224_v33 = vld [vmem:[%s4853_s1 + $0x180] sm:$0xff]  ;;  %v2234_v35 = vld [vmem:[%s4853_s1 + $0x128] sm:$0xff] }
  0x1f   : > { %431 = vmatpush.msra.mxu2 %v2138_v19  ;;  %v2215_v32 = vld [vmem:[%s4853_s1 + $0x458] sm:$0xff]  ;;  %391 = vmatpush.msra.mxu0 %v2176_v25  ;;  %v2229_v34 = vld [vmem:[%s4853_s1 + $0x480] sm:$0xff]  ;;  %v2239_v36 = vld [vmem:[%s4853_s1 + $0x428] sm:$0xff] }
  0x20   : > { %451 = vmatpush.msra.mxu3 %v2143_v20  ;;  %411 = vmatpush.msra.mxu1 %v2181_v26  ;;  %v2248_v37 = vld [vmem:[%s4853_s1 + $0x150] sm:$0xff]  ;;  %v2258_v39 = vld [vmem:[%s4853_s1 + $0xf8] sm:$0xff]  ;;  %v2272_v41 = vld [vmem:[%s4853_s1 + $0x120] sm:$0xff] }
  0x21   : > { %432 = vmatpush.msra.mxu2 %v2162_v23  ;;  %392 = vmatpush.msra.mxu0 %v2200_v29  ;;  %v2253_v38 = vld [vmem:[%s4853_s1 + $0x450] sm:$0xff]  ;;  %v2263_v40 = vld [vmem:[%s4853_s1 + $0x3f8] sm:$0xff]  ;;  %v2277_v42 = vld [vmem:[%s4853_s1 + $0x420] sm:$0xff] }
  0x22   : > { %452 = vmatpush.msra.mxu3 %v2167_v24  ;;  %412 = vmatpush.msra.mxu1 %v2205_v30  ;;  %v2282_v43 = vld [vmem:[%s4853_s1 + $0xc8] sm:$0xff]  ;;  %v2296_v45 = vld [vmem:[%s4853_s1 + $0xf0] sm:$0xff]  ;;  %v2306_v47 = vld [vmem:[%s4853_s1 + $0x98] sm:$0xff] }
  0x23   : > { %433 = vmatpush.msra.mxu2 %v2186_v27  ;;  %393 = vmatpush.msra.mxu0 %v2224_v33  ;;  %v2287_v44 = vld [vmem:[%s4853_s1 + $0x3c8] sm:$0xff]  ;;  %v2301_v46 = vld [vmem:[%s4853_s1 + $0x3f0] sm:$0xff]  ;;  %v2311_v48 = vld [vmem:[%s4853_s1 + $0x398] sm:$0xff] }
  0x24   : > { %453 = vmatpush.msra.mxu3 %v2191_v28  ;;  %413 = vmatpush.msra.mxu1 %v2229_v34  ;;  %v2320_v49 = vld [vmem:[%s4853_s1 + $0xc0] sm:$0xff]  ;;  %v2330_v51 = vld [vmem:[%s4853_s1 + $0x68] sm:$0xff]  ;;  %v2344_v53 = vld [vmem:[%s4853_s1 + $0x90] sm:$0xff] }
  0x25   : > { %434 = vmatpush.msra.mxu2 %v2210_v31  ;;  %394 = vmatpush.msra.mxu0 %v2248_v37  ;;  %v2325_v50 = vld [vmem:[%s4853_s1 + $0x3c0] sm:$0xff]  ;;  %v2335_v52 = vld [vmem:[%s4853_s1 + $0x368] sm:$0xff]  ;;  %5120 = vst [vmem:[#allocation3_spill] sm:$0xff] %v2344_v53  ;;  %v2349_v54 = vld [vmem:[%s4853_s1 + $0x390] sm:$0xff] }
  0x26   : > { %454 = vmatpush.msra.mxu3 %v2215_v32  ;;  %414 = vmatpush.msra.mxu1 %v2253_v38  ;;  %5121 = vst [vmem:[#allocation4_spill] sm:$0xff] %v2349_v54  ;;  %v2354_v55 = vld [vmem:[%s4853_s1 + $0x38] sm:$0xff]  ;;  %v2368_v57 = vld [vmem:[%s4853_s1 + $0x60] sm:$0xff]  ;;  %v2378_v59 = vld [vmem:[%s4853_s1 + $0x8] sm:$0xff] }
  0x27   : > { %435 = vmatpush.msra.mxu2 %v2234_v35  ;;  %395 = vmatpush.msra.mxu0 %v2272_v41  ;;  %v2359_v56 = vld [vmem:[%s4853_s1 + $0x338] sm:$0xff]  ;;  %5122 = vst [vmem:[#allocation5_spill] sm:$0xff] %v2368_v57  ;;  %v2373_v58 = vld [vmem:[%s4853_s1 + $0x360] sm:$0xff]  ;;  %v2383_v60 = vld [vmem:[%s4853_s1 + $0x308] sm:$0xff] }
  0x28   : > { %455 = vmatpush.msra.mxu3 %v2239_v36  ;;  %415 = vmatpush.msra.mxu1 %v2277_v42  ;;  %5123 = vst [vmem:[#allocation6_spill] sm:$0xff] %v2373_v58  ;;  %v2392_v61 = vld [vmem:[%s4853_s1 + $0x2e8] sm:$0xff]  ;;  %v2404_v63 = vld [vmem:[%s4853_s1 + $0x30] sm:$0xff] }
  0x29   : > { %436 = vmatpush.msra.mxu2 %v2258_v39  ;;  %396 = vmatpush.msra.mxu0 %v2296_v45  ;;  %5124 = vst [vmem:[#allocation7_spill] sm:$0xff] %v2378_v59  ;;  %v2397_v62 = vld [vmem:[%s4853_s1 + $0x5e8] sm:$0xff]  ;;  %v2409_v0 = vld [vmem:[%s4853_s1 + $0x330] sm:$0xff] }
  0x2a   : > { %456 = vmatpush.msra.mxu3 %v2263_v40  ;;  %416 = vmatpush.msra.mxu1 %v2301_v46  ;;  %5125 = vst [vmem:[#allocation8_spill] sm:$0xff] %v2383_v60 }
  0x2b   : > { %437 = vmatpush.msra.mxu2 %v2282_v43  ;;  %397 = vmatpush.msra.mxu0 %v2320_v49  ;;  %5126 = vst [vmem:[#allocation9_spill] sm:$0xff] %v2392_v61 }
  0x2c   : > { %457 = vmatpush.msra.mxu3 %v2287_v44  ;;  %417 = vmatpush.msra.mxu1 %v2325_v50  ;;  %5127 = vst [vmem:[#allocation10_spill] sm:$0xff] %v2397_v62 }
  0x2d   : > { %438 = vmatpush.msra.mxu2 %v2306_v47  ;;  %398 = vmatpush.msra.mxu0 %v2344_v53  ;;  %5128 = vst [vmem:[#allocation11_spill] sm:$0xff] %v2404_v63  ;;  %v2441_v53 = vld [vmem:[%s4853_s1 + $0x288] sm:$0xff] }
  0x2e   : > { %458 = vmatpush.msra.mxu3 %v2311_v48  ;;  %418 = vmatpush.msra.mxu1 %v2349_v54  ;;  %5129 = vst [vmem:[#allocation12_spill] sm:$0xff] %v2409_v0  ;;  %v2411_v54 = vld [vmem:[#allocation2] sm:$0xf] }
  0x2f   : > { %439 = vmatpush.msra.mxu2 %v2330_v51  ;;  %399 = vmatpush.msra.mxu0 %v2368_v57  ;;  %5130 = vst [vmem:[#allocation13_spill] sm:$0xff] %v2411_v54  ;;  %v2423_v57 = vld [vmem:[%s4853_s1 + $0x5b8] sm:$0xff] }
  0x30   : > { %459 = vmatpush.msra.mxu3 %v2335_v52  ;;  %419 = vmatpush.msra.mxu1 %v2373_v58  ;;  %v2418_v58 = vld [vmem:[%s4853_s1 + $0x2b8] sm:$0xff]  ;;  %5132 = vst [vmem:[#allocation15_spill] sm:$0xff] %v2423_v57 }
  0x31   : > { %440 = vmatpush.msra.mxu2 %v2354_v55  ;;  %5131 = vst [vmem:[#allocation14_spill] sm:$0xff] %v2418_v58  ;;  %400 = vmatpush.msra.mxu0 %v2404_v63  ;;  %v2465_v63 = vld [vmem:[%s4853_s1 + $0x258] sm:$0xff] }
  0x32   : > { %460 = vmatpush.msra.mxu3 %v2359_v56  ;;  %381 = vst [vmem:[#allocation1] ss:$4 sm:$0xff] %v2411_v54  ;;  %v2446_v54 = vld [vmem:[%s4853_s1 + $0x588] sm:$0xff]  ;;  %420 = vmatpush.msra.mxu1 %v2409_v0  ;;  %v2484_v0 = vld [vmem:[%s4853_s1 + $0x5b0] sm:$0xff] }
  0x33   : > { %441 = vmatpush.msra.mxu2 %v2378_v59  ;;  %v2436_v59 = vld [vmem:[%s4853_s1 + $0x300] sm:$0xff]  ;;  %5135 = vst [vmem:[#allocation18_spill] sm:$0xff] %v2441_v53 }
  0x34   : > { %461 = vmatpush.msra.mxu3 %v2383_v60  ;;  %v2431_v60 = vld [vmem:[%s4853_s1] sm:$0xff]  ;;  %5134 = vst [vmem:[#allocation17_spill] sm:$0xff] %v2436_v59  ;;  %421 = vmatpush.msra.mxu1 %v2436_v59 }
  0x35   : > { %506 = vmatpush.msrb.mxu2 %v2392_v61  ;;  %5133 = vst [vmem:[#allocation16_spill] sm:$0xff] %v2431_v60  ;;  %v2460_v61 = vld [vmem:[%s4853_s1 + $0x5e0] sm:$0xff]  ;;  %401 = vmatpush.msra.mxu0 %v2431_v60 }
  0x36   : > { %526 = vmatpush.msrb.mxu3 %v2397_v62  ;;  %5136 = vst [vmem:[#allocation19_spill] sm:$0xff] %v2446_v54  ;;  %v2455_v62 = vld [vmem:[%s4853_s1 + $0x2e0] sm:$0xff]  ;;  %486 = vmatpush.msrb.mxu1 %v2460_v61 }
  0x37   : > { %507 = vmatpush.msrb.mxu2 %v2418_v58  ;;  %5137 = vst [vmem:[#allocation20_spill] sm:$0xff] %v2455_v62  ;;  %v2470_v58 = vld [vmem:[%s4853_s1 + $0x558] sm:$0xff]  ;;  %466 = vmatpush.msrb.mxu0 %v2455_v62  ;;  %v2503_v62 = vld [vmem:[%s4853_s1 + $0x280] sm:$0xff] }
  0x38   : > { %527 = vmatpush.msrb.mxu3 %v2423_v57  ;;  %5138 = vst [vmem:[#allocation21_spill] sm:$0xff] %v2460_v61  ;;  %v2479_v57 = vld [vmem:[%s4853_s1 + $0x2b0] sm:$0xff]  ;;  %v2508_v61 = vld [vmem:[%s4853_s1 + $0x580] sm:$0xff]  ;;  %487 = vmatpush.msrb.mxu1 %v2484_v0 }
  0x39   : > { %5139 = vst [vmem:[#allocation22_spill] sm:$0xff] %v2465_v63  ;;  %508 = vmatpush.msrb.mxu2 %v2441_v53  ;;  %v2491_v53 = vld [vmem:[%s4853_s1 + $0x228] sm:$0xff]  ;;  %467 = vmatpush.msrb.mxu0 %v2479_v57  ;;  %v2572_v59 = vld.sshfl [vmem:[#allocation1] sm:$0xff pattern:$0x73625140] }
  0x3a   : > { %5140 = vst [vmem:[#allocation23_spill] sm:$0xff] %v2470_v58  ;;  %528 = vmatpush.msrb.mxu3 %v2446_v54  ;;  %v2496_v54 = vld [vmem:[%s4853_s1 + $0x528] sm:$0xff]  ;;  %488 = vmatpush.msrb.mxu1 %v2508_v61 }
  0x3b   : > { %5141 = vst [vmem:[#allocation24_spill] sm:$0xff] %v2479_v57  ;;  %509 = vmatpush.msrb.mxu2 %v2465_v63  ;;  %v2515_v63 = vld [vmem:[%s4853_s1 + $0x1f8] sm:$0xff]  ;;  %v2527_v57 = vld [vmem:[%s4853_s1 + $0x250] sm:$0xff]  ;;  %468 = vmatpush.msrb.mxu0 %v2503_v62  ;;  %v2574_v60 = vld.sshfl [vmem:[#allocation1 + $0x8] sm:$0xff pattern:$0x73625140] }
  0x3c   : > { %5142 = vst [vmem:[#allocation25_spill] sm:$0xff] %v2484_v0  ;;  %529 = vmatpush.msrb.mxu3 %v2470_v58  ;;  %v2520_v58 = vld [vmem:[%s4853_s1 + $0x4f8] sm:$0xff]  ;;  %v2532_v0 = vld [vmem:[%s4853_s1 + $0x550] sm:$0xff]  ;;  %442 = vmatmul.f32.vlgmr.msra.gmra.mxu2 %v2572_v59 }
  0x3d   : > { %5143 = vst [vmem:[#allocation26_spill] sm:$0xff] %v2491_v53  ;;  %510 = vmatpush.msrb.mxu2 %v2491_v53  ;;  %v2539_v53 = vld [vmem:[%s4853_s1 + $0x1c8] sm:$0xff]  ;;  %469 = vmatpush.msrb.mxu0 %v2527_v57 }
  0x3e   : > { %5144 = vst [vmem:[#allocation27_spill] sm:$0xff] %v2496_v54  ;;  %530 = vmatpush.msrb.mxu3 %v2496_v54  ;;  %v2544_v54 = vld [vmem:[%s4853_s1 + $0x4c8] sm:$0xff]  ;;  %489 = vmatpush.msrb.mxu1 %v2532_v0 }
  0x3f   : > { %5145 = vst [vmem:[#allocation28_spill] sm:$0xff] %v2503_v62  ;;  %511 = vmatpush.msrb.mxu2 %v2515_v63  ;;  %v2551_v62 = vld [vmem:[%s4853_s1 + $0x220] sm:$0xff]  ;;  %462 = vmatmul.f32.vlgmr.msra.gmra.mxu3 %v2574_v60 }
  0x40   : > { %5146 = vst [vmem:[#allocation29_spill] sm:$0xff] %v2508_v61  ;;  %531 = vmatpush.msrb.mxu3 %v2520_v58  ;;  %v2556_v61 = vld [vmem:[%s4853_s1 + $0x520] sm:$0xff]  ;;  %470 = vmatpush.msrb.mxu0 %v2551_v62 }
  0x41   : > { %5147 = vst [vmem:[#allocation30_spill] sm:$0xff] %v2515_v63  ;;  %v2563_v63 = vld [vmem:[%s4853_s1 + $0x198] sm:$0xff]  ;;  %512 = vmatpush.msrb.mxu2 %v2539_v53  ;;  %490 = vmatpush.msrb.mxu1 %v2556_v61 }
  0x42   : > { %5148 = vst [vmem:[#allocation31_spill] sm:$0xff] %v2520_v58  ;;  %v2568_v58 = vld [vmem:[%s4853_s1 + $0x498] sm:$0xff]  ;;  %532 = vmatpush.msrb.mxu3 %v2544_v54  ;;  %402 = vmatmul.f32.vlgmr.msra.gmra.mxu0 %v2572_v59 }
  0x43   : > { %5149 = vst [vmem:[#allocation32_spill] sm:$0xff] %v2527_v57  ;;  %v2586_v57 = vld [vmem:[%s4853_s1 + $0x468] sm:$0xff]  ;;  %513 = vmatpush.msrb.mxu2 %v2563_v63  ;;  %422 = vmatmul.f32.vlgmr.msra.gmra.mxu1 %v2574_v60 }
  0x44   : > { %5150 = vst [vmem:[#allocation33_spill] sm:$0xff] %v2532_v0  ;;  %v2581_v0 = vld [vmem:[%s4853_s1 + $0x168] sm:$0xff]  ;;  %533 = vmatpush.msrb.mxu3 %v2568_v58 }
  0x45   : > { %5151 = vst [vmem:[#allocation34_spill] sm:$0xff] %v2539_v53  ;;  %v2598_v53 = vld [vmem:[%s4853_s1 + $0x4f0] sm:$0xff]  ;;  %514 = vmatpush.msrb.mxu2 %v2581_v0 }
  0x46   : > { %5152 = vst [vmem:[#allocation35_spill] sm:$0xff] %v2544_v54  ;;  %v2593_v54 = vld [vmem:[%s4853_s1 + $0x1f0] sm:$0xff]  ;;  %534 = vmatpush.msrb.mxu3 %v2586_v57  ;;  %491 = vmatpush.msrb.mxu1 %v2598_v53 }
  0x47   : > { %5153 = vst [vmem:[#allocation36_spill] sm:$0xff] %v2551_v62  ;;  %v2622_v62 = vld [vmem:[%s4853_s1 + $0x4c0] sm:$0xff]  ;;  %471 = vmatpush.msrb.mxu0 %v2593_v54 }
  0x48   : > { %5154 = vst [vmem:[#allocation37_spill] sm:$0xff] %v2556_v61  ;;  %v2617_v61 = vld [vmem:[%s4853_s1 + $0x1c0] sm:$0xff]  ;;  %492 = vmatpush.msrb.mxu1 %v2622_v62 }
  0x49   : > { %5155 = vst [vmem:[#allocation38_spill] sm:$0xff] %v2563_v63  ;;  %v2605_v63 = vld [vmem:[%s4853_s1 + $0x138] sm:$0xff]  ;;  %472 = vmatpush.msrb.mxu0 %v2617_v61 }
  0x4a   : > { %5156 = vst [vmem:[#allocation39_spill] sm:$0xff] %v2568_v58  ;;  %v2610_v58 = vld [vmem:[%s4853_s1 + $0x438] sm:$0xff]  ;;  %515 = vmatpush.msrb.mxu2 %v2605_v63 }
  0x4b   : > { %5157 = vst [vmem:[#allocation40_spill] sm:$0xff] %v2581_v0  ;;  %v2629_v0 = vld [vmem:[%s4853_s1 + $0x108] sm:$0xff]  ;;  %535 = vmatpush.msrb.mxu3 %v2610_v58 }
  0x4c   : > { %5158 = vst [vmem:[#allocation41_spill] sm:$0xff] %v2586_v57  ;;  %v2634_v57 = vld [vmem:[%s4853_s1 + $0x408] sm:$0xff]  ;;  %516 = vmatpush.msrb.mxu2 %v2629_v0 }
  0x4d   : > { %5159 = vst [vmem:[#allocation42_spill] sm:$0xff] %v2593_v54  ;;  %v2641_v54 = vld [vmem:[%s4853_s1 + $0x190] sm:$0xff]  ;;  %536 = vmatpush.msrb.mxu3 %v2634_v57 }
  0x4e   : > { %5160 = vst [vmem:[#allocation43_spill] sm:$0xff] %v2598_v53  ;;  %v2646_v53 = vld [vmem:[%s4853_s1 + $0x490] sm:$0xff]  ;;  %473 = vmatpush.msrb.mxu0 %v2641_v54 }
  0x4f   : > { %5161 = vst [vmem:[#allocation44_spill] sm:$0xff] %v2605_v63  ;;  %v2653_v63 = vld [vmem:[%s4853_s1 + $0xd8] sm:$0xff]  ;;  %493 = vmatpush.msrb.mxu1 %v2646_v53 }
  0x50   : > { %5162 = vst [vmem:[#allocation45_spill] sm:$0xff] %v2610_v58  ;;  %v2658_v58 = vld [vmem:[%s4853_s1 + $0x3d8] sm:$0xff]  ;;  %517 = vmatpush.msrb.mxu2 %v2653_v63 }
  0x51   : > { %5163 = vst [vmem:[#allocation46_spill] sm:$0xff] %v2617_v61  ;;  %v2665_v61 = vld [vmem:[%s4853_s1 + $0x160] sm:$0xff]  ;;  %537 = vmatpush.msrb.mxu3 %v2658_v58 }
  0x52   : > { %5164 = vst [vmem:[#allocation47_spill] sm:$0xff] %v2622_v62  ;;  %v2670_v62 = vld [vmem:[%s4853_s1 + $0x460] sm:$0xff]  ;;  %474 = vmatpush.msrb.mxu0 %v2665_v61 }
  0x53   : > { %5165 = vst [vmem:[#allocation48_spill] sm:$0xff] %v2629_v0  ;;  %v2677_v0 = vld [vmem:[%s4853_s1 + $0xa8] sm:$0xff]  ;;  %494 = vmatpush.msrb.mxu1 %v2670_v62 }
  0x54   : > { %5166 = vst [vmem:[#allocation49_spill] sm:$0xff] %v2634_v57  ;;  %v2682_v57 = vld [vmem:[%s4853_s1 + $0x3a8] sm:$0xff]  ;;  %518 = vmatpush.msrb.mxu2 %v2677_v0 }
  0x55   : > { %5167 = vst [vmem:[#allocation50_spill] sm:$0xff] %v2641_v54  ;;  %v2696_v54 = vld [vmem:[%s4853_s1 + $0x430] sm:$0xff]  ;;  %538 = vmatpush.msrb.mxu3 %v2682_v57 }
  0x56   : > { %5168 = vst [vmem:[#allocation51_spill] sm:$0xff] %v2646_v53  ;;  %v2691_v53 = vld [vmem:[%s4853_s1 + $0x130] sm:$0xff]  ;;  %495 = vmatpush.msrb.mxu1 %v2696_v54 }
  0x57   : > { %5169 = vst [vmem:[#allocation52_spill] sm:$0xff] %v2653_v63  ;;  %v2708_v63 = vld [vmem:[%s4853_s1 + $0x378] sm:$0xff]  ;;  %475 = vmatpush.msrb.mxu0 %v2691_v53 }
  0x58   : > { %5170 = vst [vmem:[#allocation53_spill] sm:$0xff] %v2658_v58  ;;  %v2703_v58 = vld [vmem:[%s4853_s1 + $0x78] sm:$0xff]  ;;  %539 = vmatpush.msrb.mxu3 %v2708_v63 }
  0x59   : > { %5171 = vst [vmem:[#allocation54_spill] sm:$0xff] %v2665_v61  ;;  %v2732_v61 = vld [vmem:[%s4853_s1 + $0x348] sm:$0xff]  ;;  %519 = vmatpush.msrb.mxu2 %v2703_v58 }
  0x5a   : > { %5172 = vst [vmem:[#allocation55_spill] sm:$0xff] %v2670_v62  ;;  %v2727_v62 = vld [vmem:[%s4853_s1 + $0x48] sm:$0xff]  ;;  %540 = vmatpush.msrb.mxu3 %v2732_v61 }
  0x5b   : > { %5173 = vst [vmem:[#allocation56_spill] sm:$0xff] %v2677_v0  ;;  %v2715_v0 = vld [vmem:[%s4853_s1 + $0x100] sm:$0xff]  ;;  %520 = vmatpush.msrb.mxu2 %v2727_v62 }
  0x5c   : > { %5174 = vst [vmem:[#allocation57_spill] sm:$0xff] %v2682_v57  ;;  %v2720_v57 = vld [vmem:[%s4853_s1 + $0x400] sm:$0xff]  ;;  %476 = vmatpush.msrb.mxu0 %v2715_v0 }
  0x5d   : > { %5175 = vst [vmem:[#allocation58_spill] sm:$0xff] %v2691_v53  ;;  %v2739_v53 = vld [vmem:[%s4853_s1 + $0xd0] sm:$0xff]  ;;  %496 = vmatpush.msrb.mxu1 %v2720_v57 }
  0x5e   : > { %5176 = vst [vmem:[#allocation59_spill] sm:$0xff] %v2696_v54  ;;  %v2744_v54 = vld [vmem:[%s4853_s1 + $0x3d0] sm:$0xff]  ;;  %477 = vmatpush.msrb.mxu0 %v2739_v53 }
  0x5f   : > { %5177 = vst [vmem:[#allocation60_spill] sm:$0xff] %v2703_v58  ;;  %v2751_v58 = vld [vmem:[%s4853_s1 + $0x18] sm:$0xff]  ;;  %497 = vmatpush.msrb.mxu1 %v2744_v54 }
  0x60   : > { %5178 = vst [vmem:[#allocation61_spill] sm:$0xff] %v2708_v63  ;;  %v2756_v63 = vld [vmem:[%s4853_s1 + $0x318] sm:$0xff]  ;;  %521 = vmatpush.msrb.mxu2 %v2751_v58 }
  0x61   : > { %5179 = vst [vmem:[#allocation62_spill] sm:$0xff] %v2715_v0  ;;  %v2770_v0 = vld [vmem:[%s4853_s1 + $0x5f8] sm:$0xff]  ;;  %541 = vmatpush.msrb.mxu3 %v2756_v63  ;;  %522 = vmatmul.f32.vlgmr.msrb.gmra.mxu2 %v2572_v59 }
  0x62   : > { %5180 = vst [vmem:[#allocation63_spill] sm:$0xff] %v2720_v57  ;;  %v2765_v57 = vld [vmem:[%s4853_s1 + $0x2f8] sm:$0xff]  ;;  %542 = vmatmul.f32.vlgmr.msrb.gmra.mxu3 %v2574_v60 }
  0x63   : > { %5181 = vst [vmem:[#allocation64_spill] sm:$0xff] %v2727_v62  ;;  %v2782_v62 = vld [vmem:[%s4853_s1 + $0x3a0] sm:$0xff]  ;;  %586 = vmatpush.msra.mxu2 %v2765_v57  ;;  %606 = vmatpush.msra.mxu3 %v2770_v0 }
  0x64   : > { %5182 = vst [vmem:[#allocation65_spill] sm:$0xff] %v2732_v61  ;;  %v2777_v61 = vld [vmem:[%s4853_s1 + $0xa0] sm:$0xff]  ;;  %498 = vmatpush.msrb.mxu1 %v2782_v62 }
  0x65   : > { %5183 = vst [vmem:[#allocation66_spill] sm:$0xff] %v2739_v53  ;;  %v2806_v53 = vld [vmem:[%s4853_s1 + $0x370] sm:$0xff]  ;;  %478 = vmatpush.msrb.mxu0 %v2777_v61 }
  0x66   : > { %5184 = vst [vmem:[#allocation67_spill] sm:$0xff] %v2744_v54  ;;  %v2801_v54 = vld [vmem:[%s4853_s1 + $0x70] sm:$0xff]  ;;  %499 = vmatpush.msrb.mxu1 %v2806_v53 }
  0x67   : > { %5185 = vst [vmem:[#allocation68_spill] sm:$0xff] %v2751_v58  ;;  %v2789_v58 = vld [vmem:[%s4853_s1 + $0x2c8] sm:$0xff]  ;;  %479 = vmatpush.msrb.mxu0 %v2801_v54 }
  0x68   : > { %5186 = vst [vmem:[#allocation69_spill] sm:$0xff] %v2756_v63  ;;  %v2794_v63 = vld [vmem:[%s4853_s1 + $0x5c8] sm:$0xff]  ;;  %587 = vmatpush.msra.mxu2 %v2789_v58 }
  0x69   : > { %5187 = vst [vmem:[#allocation70_spill] sm:$0xff] %v2765_v57  ;;  %v2813_v57 = vld [vmem:[%s4853_s1 + $0x298] sm:$0xff]  ;;  %607 = vmatpush.msra.mxu3 %v2794_v63 }
  0x6a   : > { %5188 = vst [vmem:[#allocation71_spill] sm:$0xff] %v2770_v0  ;;  %v2818_v0 = vld [vmem:[%s4853_s1 + $0x598] sm:$0xff]  ;;  %588 = vmatpush.msra.mxu2 %v2813_v57 }
  0x6b   : > { %5189 = vst [vmem:[#allocation72_spill] sm:$0xff] %v2777_v61  ;;  %v2825_v61 = vld [vmem:[%s4853_s1 + $0x40] sm:$0xff]  ;;  %608 = vmatpush.msra.mxu3 %v2818_v0 }
  0x6c   : > { %5190 = vst [vmem:[#allocation73_spill] sm:$0xff] %v2782_v62  ;;  %v2830_v62 = vld [vmem:[%s4853_s1 + $0x340] sm:$0xff]  ;;  %480 = vmatpush.msrb.mxu0 %v2825_v61 }
  0x6d   : > { %5191 = vst [vmem:[#allocation74_spill] sm:$0xff] %v2789_v58  ;;  %v2837_v58 = vld [vmem:[%s4853_s1 + $0x268] sm:$0xff]  ;;  %500 = vmatpush.msrb.mxu1 %v2830_v62 }
  0x6e   : > { %5192 = vst [vmem:[#allocation75_spill] sm:$0xff] %v2794_v63  ;;  %v2842_v63 = vld [vmem:[%s4853_s1 + $0x568] sm:$0xff]  ;;  %589 = vmatpush.msra.mxu2 %v2837_v58 }
  0x6f   : > { %5193 = vst [vmem:[#allocation76_spill] sm:$0xff] %v2801_v54  ;;  %v2849_v54 = vld [vmem:[%s4853_s1 + $0x10] sm:$0xff]  ;;  %609 = vmatpush.msra.mxu3 %v2842_v63 }
  0x70   : > { %5194 = vst [vmem:[#allocation77_spill] sm:$0xff] %v2806_v53  ;;  %v2854_v53 = vld [vmem:[%s4853_s1 + $0x310] sm:$0xff]  ;;  %481 = vmatpush.msrb.mxu0 %v2849_v54 }
  0x71   : > { %5195 = vst [vmem:[#allocation78_spill] sm:$0xff] %v2813_v57  ;;  %v2868_v57 = vld [vmem:[%s4853_s1 + $0x5f0] sm:$0xff]  ;;  %501 = vmatpush.msrb.mxu1 %v2854_v53  ;;  %482 = vmatmul.f32.vlgmr.msrb.gmra.mxu0 %v2572_v59 }
  0x72   : > { %5196 = vst [vmem:[#allocation79_spill] sm:$0xff] %v2818_v0  ;;  %v2863_v0 = vld [vmem:[%s4853_s1 + $0x2f0] sm:$0xff]  ;;  %502 = vmatmul.f32.vlgmr.msrb.gmra.mxu1 %v2574_v60 }
  0x73   : > { %5197 = vst [vmem:[#allocation80_spill] sm:$0xff] %v2825_v61  ;;  %546 = vmatpush.msra.mxu0 %v2863_v0  ;;  %566 = vmatpush.msra.mxu1 %v2868_v57  ;;  %v2904_v61 = vld [vmem:[%s4853_s1 + $0x508] sm:$0xff] }
  0x74   : > { %5198 = vst [vmem:[#allocation81_spill] sm:$0xff] %v2830_v62  ;;  %v2899_v62 = vld [vmem:[%s4853_s1 + $0x208] sm:$0xff] }
  0x75   : > { %5199 = vst [vmem:[#allocation82_spill] sm:$0xff] %v2837_v58  ;;  %v2875_v58 = vld [vmem:[%s4853_s1 + $0x238] sm:$0xff] }
  0x76   : > { %5200 = vst [vmem:[#allocation83_spill] sm:$0xff] %v2842_v63  ;;  %v2880_v63 = vld [vmem:[%s4853_s1 + $0x538] sm:$0xff]  ;;  %590 = vmatpush.msra.mxu2 %v2875_v58 }
  0x77   : > { %5201 = vst [vmem:[#allocation84_spill] sm:$0xff] %v2849_v54  ;;  %v2887_v54 = vld [vmem:[%s4853_s1 + $0x2c0] sm:$0xff]  ;;  %610 = vmatpush.msra.mxu3 %v2880_v63 }
  0x78   : > { %5202 = vst [vmem:[#allocation85_spill] sm:$0xff] %v2854_v53  ;;  %v2892_v53 = vld [vmem:[%s4853_s1 + $0x5c0] sm:$0xff]  ;;  %547 = vmatpush.msra.mxu0 %v2887_v54  ;;  %591 = vmatpush.msra.mxu2 %v2899_v62 }
  0x79   : > { %5203 = vst [vmem:[#allocation86_spill] sm:$0xff] %v2863_v0  ;;  %v2911_v0 = vld [vmem:[%s4853_s1 + $0x290] sm:$0xff]  ;;  %567 = vmatpush.msra.mxu1 %v2892_v53  ;;  %611 = vmatpush.msra.mxu3 %v2904_v61 }
  0x7a   : > { %5204 = vst [vmem:[#allocation87_spill] sm:$0xff] %v2868_v57  ;;  %v2916_v57 = vld [vmem:[%s4853_s1 + $0x590] sm:$0xff]  ;;  %548 = vmatpush.msra.mxu0 %v2911_v0 }
  0x7b   : > { %5205 = vst [vmem:[#allocation88_spill] sm:$0xff] %v2875_v58  ;;  %v2923_v58 = vld [vmem:[%s4853_s1 + $0x1d8] sm:$0xff]  ;;  %568 = vmatpush.msra.mxu1 %v2916_v57 }
  0x7c   : > { %5206 = vst [vmem:[#allocation89_spill] sm:$0xff] %v2880_v63  ;;  %v2928_v63 = vld [vmem:[%s4853_s1 + $0x4d8] sm:$0xff]  ;;  %592 = vmatpush.msra.mxu2 %v2923_v58 }
  0x7d   : > { %5207 = vst [vmem:[#allocation90_spill] sm:$0xff] %v2887_v54  ;;  %v2935_v54 = vld [vmem:[%s4853_s1 + $0x260] sm:$0xff]  ;;  %612 = vmatpush.msra.mxu3 %v2928_v63 }
  0x7e   : > { %5208 = vst [vmem:[#allocation91_spill] sm:$0xff] %v2892_v53  ;;  %v2940_v53 = vld [vmem:[%s4853_s1 + $0x560] sm:$0xff]  ;;  %549 = vmatpush.msra.mxu0 %v2935_v54 }
  0x7f   : > { %5209 = vst [vmem:[#allocation92_spill] sm:$0xff] %v2899_v62  ;;  %v2947_v62 = vld [vmem:[%s4853_s1 + $0x1a8] sm:$0xff]  ;;  %569 = vmatpush.msra.mxu1 %v2940_v53 }
  0x80   : > { %5210 = vst [vmem:[#allocation93_spill] sm:$0xff] %v2904_v61  ;;  %v2952_v61 = vld [vmem:[%s4853_s1 + $0x4a8] sm:$0xff]  ;;  %593 = vmatpush.msra.mxu2 %v2947_v62 }
  0x81   : > { %5211 = vst [vmem:[#allocation94_spill] sm:$0xff] %v2911_v0  ;;  %v2959_v0 = vld [vmem:[%s4853_s1 + $0x230] sm:$0xff]  ;;  %613 = vmatpush.msra.mxu3 %v2952_v61 }
  0x82   : > { %5212 = vst [vmem:[#allocation95_spill] sm:$0xff] %v2916_v57  ;;  %v2964_v57 = vld [vmem:[%s4853_s1 + $0x530] sm:$0xff]  ;;  %550 = vmatpush.msra.mxu0 %v2959_v0 }
  0x83   : > { %5213 = vst [vmem:[#allocation96_spill] sm:$0xff] %v2923_v58  ;;  %v2971_v58 = vld [vmem:[%s4853_s1 + $0x178] sm:$0xff]  ;;  %570 = vmatpush.msra.mxu1 %v2964_v57 }
  0x84   : > { %5214 = vst [vmem:[#allocation97_spill] sm:$0xff] %v2928_v63  ;;  %v2976_v63 = vld [vmem:[%s4853_s1 + $0x478] sm:$0xff]  ;;  %594 = vmatpush.msra.mxu2 %v2971_v58 }
  0x85   : > { %5215 = vst [vmem:[#allocation98_spill] sm:$0xff] %v2935_v54  ;;  %v2983_v54 = vld [vmem:[%s4853_s1 + $0x200] sm:$0xff]  ;;  %614 = vmatpush.msra.mxu3 %v2976_v63 }
  0x86   : > { %5216 = vst [vmem:[#allocation99_spill] sm:$0xff] %v2940_v53  ;;  %v2988_v53 = vld [vmem:[%s4853_s1 + $0x500] sm:$0xff]  ;;  %551 = vmatpush.msra.mxu0 %v2983_v54 }
  0x87   : > { %5217 = vst [vmem:[#allocation100_spill] sm:$0xff] %v2947_v62  ;;  %v2995_v62 = vld [vmem:[%s4853_s1 + $0x148] sm:$0xff]  ;;  %571 = vmatpush.msra.mxu1 %v2988_v53 }
  0x88   : > { %5218 = vst [vmem:[#allocation101_spill] sm:$0xff] %v2952_v61  ;;  %v3000_v61 = vld [vmem:[%s4853_s1 + $0x448] sm:$0xff]  ;;  %595 = vmatpush.msra.mxu2 %v2995_v62 }
  0x89   : > { %5219 = vst [vmem:[#allocation102_spill] sm:$0xff] %v2959_v0  ;;  %v3007_v0 = vld [vmem:[%s4853_s1 + $0x1d0] sm:$0xff]  ;;  %615 = vmatpush.msra.mxu3 %v3000_v61 }
  0x8a   : > { %5220 = vst [vmem:[#allocation103_spill] sm:$0xff] %v2964_v57  ;;  %v3012_v57 = vld [vmem:[%s4853_s1 + $0x4d0] sm:$0xff]  ;;  %552 = vmatpush.msra.mxu0 %v3007_v0 }
  0x8b   : > { %5221 = vst [vmem:[#allocation104_spill] sm:$0xff] %v2971_v58  ;;  %v3019_v58 = vld [vmem:[%s4853_s1 + $0x118] sm:$0xff]  ;;  %572 = vmatpush.msra.mxu1 %v3012_v57 }
  0x8c   : > { %5222 = vst [vmem:[#allocation105_spill] sm:$0xff] %v2976_v63  ;;  %v3024_v63 = vld [vmem:[%s4853_s1 + $0x418] sm:$0xff]  ;;  %596 = vmatpush.msra.mxu2 %v3019_v58 }
  0x8d   : > { %5223 = vst [vmem:[#allocation106_spill] sm:$0xff] %v2983_v54  ;;  %v3031_v54 = vld [vmem:[%s4853_s1 + $0x1a0] sm:$0xff]  ;;  %616 = vmatpush.msra.mxu3 %v3024_v63 }
  0x8e   : > { %5224 = vst [vmem:[#allocation107_spill] sm:$0xff] %v2988_v53  ;;  %v3036_v53 = vld [vmem:[%s4853_s1 + $0x4a0] sm:$0xff]  ;;  %553 = vmatpush.msra.mxu0 %v3031_v54 }
  0x8f   : > { %5225 = vst [vmem:[#allocation108_spill] sm:$0xff] %v2995_v62  ;;  %v3043_v62 = vld [vmem:[%s4853_s1 + $0xe8] sm:$0xff]  ;;  %573 = vmatpush.msra.mxu1 %v3036_v53 }
  0x90   : > { %5226 = vst [vmem:[#allocation109_spill] sm:$0xff] %v3000_v61  ;;  %v3048_v61 = vld [vmem:[%s4853_s1 + $0x3e8] sm:$0xff]  ;;  %597 = vmatpush.msra.mxu2 %v3043_v62 }
  0x91   : > { %5227 = vst [vmem:[#allocation110_spill] sm:$0xff] %v3007_v0  ;;  %v3055_v0 = vld [vmem:[%s4853_s1 + $0x170] sm:$0xff]  ;;  %617 = vmatpush.msra.mxu3 %v3048_v61 }
  0x92   : > { %5228 = vst [vmem:[#allocation111_spill] sm:$0xff] %v3012_v57  ;;  %v3060_v57 = vld [vmem:[%s4853_s1 + $0x470] sm:$0xff]  ;;  %554 = vmatpush.msra.mxu0 %v3055_v0 }
  0x93   : > { %5229 = vst [vmem:[#allocation112_spill] sm:$0xff] %v3019_v58  ;;  %v3067_v58 = vld [vmem:[%s4853_s1 + $0xb8] sm:$0xff]  ;;  %574 = vmatpush.msra.mxu1 %v3060_v57 }
  0x94   : > { %5230 = vst [vmem:[#allocation113_spill] sm:$0xff] %v3024_v63  ;;  %v3072_v63 = vld [vmem:[%s4853_s1 + $0x3b8] sm:$0xff]  ;;  %598 = vmatpush.msra.mxu2 %v3067_v58 }
  0x95   : > { %5231 = vst [vmem:[#allocation114_spill] sm:$0xff] %v3031_v54  ;;  %v3079_v54 = vld [vmem:[%s4853_s1 + $0x140] sm:$0xff]  ;;  %618 = vmatpush.msra.mxu3 %v3072_v63 }
  0x96   : > { %5232 = vst [vmem:[#allocation115_spill] sm:$0xff] %v3036_v53  ;;  %v3084_v53 = vld [vmem:[%s4853_s1 + $0x440] sm:$0xff]  ;;  %555 = vmatpush.msra.mxu0 %v3079_v54 }
  0x97   : > { %5233 = vst [vmem:[#allocation116_spill] sm:$0xff] %v3043_v62  ;;  %v3091_v62 = vld [vmem:[%s4853_s1 + $0x88] sm:$0xff]  ;;  %575 = vmatpush.msra.mxu1 %v3084_v53 }
  0x98   : > { %5234 = vst [vmem:[#allocation117_spill] sm:$0xff] %v3048_v61  ;;  %v3096_v61 = vld [vmem:[%s4853_s1 + $0x388] sm:$0xff]  ;;  %599 = vmatpush.msra.mxu2 %v3091_v62 }
  0x99   : > { %5235 = vst [vmem:[#allocation118_spill] sm:$0xff] %v3055_v0  ;;  %v3103_v0 = vld [vmem:[%s4853_s1 + $0x110] sm:$0xff]  ;;  %619 = vmatpush.msra.mxu3 %v3096_v61 }
  0x9a   : > { %5236 = vst [vmem:[#allocation119_spill] sm:$0xff] %v3060_v57  ;;  %v3108_v57 = vld [vmem:[%s4853_s1 + $0x410] sm:$0xff]  ;;  %556 = vmatpush.msra.mxu0 %v3103_v0 }
  0x9b   : > { %5237 = vst [vmem:[#allocation120_spill] sm:$0xff] %v3067_v58  ;;  %v3115_v58 = vld [vmem:[%s4853_s1 + $0x58] sm:$0xff]  ;;  %576 = vmatpush.msra.mxu1 %v3108_v57 }
  0x9c   : > { %5238 = vst [vmem:[#allocation121_spill] sm:$0xff] %v3072_v63  ;;  %v3120_v63 = vld [vmem:[%s4853_s1 + $0x358] sm:$0xff]  ;;  %600 = vmatpush.msra.mxu2 %v3115_v58 }
  0x9d   : > { %5239 = vst [vmem:[#allocation122_spill] sm:$0xff] %v3079_v54  ;;  %v3127_v54 = vld [vmem:[%s4853_s1 + $0xe0] sm:$0xff]  ;;  %620 = vmatpush.msra.mxu3 %v3120_v63 }
  0x9e   : > { %5240 = vst [vmem:[#allocation123_spill] sm:$0xff] %v3084_v53  ;;  %v3132_v53 = vld [vmem:[%s4853_s1 + $0x3e0] sm:$0xff]  ;;  %557 = vmatpush.msra.mxu0 %v3127_v54 }
  0x9f   : > { %5241 = vst [vmem:[#allocation124_spill] sm:$0xff] %v3091_v62  ;;  %v3139_v62 = vld [vmem:[%s4853_s1 + $0x28] sm:$0xff]  ;;  %577 = vmatpush.msra.mxu1 %v3132_v53 }
  0xa0   : > { %5242 = vst [vmem:[#allocation125_spill] sm:$0xff] %v3096_v61  ;;  %v3144_v61 = vld [vmem:[%s4853_s1 + $0x328] sm:$0xff]  ;;  %601 = vmatpush.msra.mxu2 %v3139_v62 }
  0xa1   : > { %5243 = vst [vmem:[#allocation126_spill] sm:$0xff] %v3103_v0  ;;  %v3158_v0 = vld [vmem:[%s4853_s1 + $0x3b0] sm:$0xff]  ;;  %621 = vmatpush.msra.mxu3 %v3144_v61  ;;  %602 = vmatmul.f32.vlgmr.msra.gmra.mxu2 %v2572_v59 }
  0xa2   : > { %5244 = vst [vmem:[#allocation127_spill] sm:$0xff] %v3108_v57  ;;  %v3153_v57 = vld [vmem:[%s4853_s1 + $0xb0] sm:$0xff]  ;;  %622 = vmatmul.f32.vlgmr.msra.gmra.mxu3 %v2574_v60  ;;  %578 = vmatpush.msra.mxu1 %v3158_v0 }
  0xa3   : > { %5245 = vst [vmem:[#allocation128_spill] sm:$0xff] %v3115_v58  ;;  %v3172_v58 = vld [vmem:[%s4853_s1 + $0x380] sm:$0xff]  ;;  %558 = vmatpush.msra.mxu0 %v3153_v57  ;;  %749 = vmatpush.msrb.mxu2 %v2036_v1  ;;  %v5251_v1 = vld [vmem:[#allocation3_spill] sm:$0xff] }
  0xa4   : > { %5246 = vst [vmem:[#allocation129_spill] sm:$0xff] %v3120_v63  ;;  %v3167_v63 = vld [vmem:[%s4853_s1 + $0x80] sm:$0xff]  ;;  %769 = vmatpush.msrb.mxu3 %v2041_v2  ;;  %579 = vmatpush.msra.mxu1 %v3172_v58  ;;  %v5252_v2 = vld [vmem:[#allocation4_spill] sm:$0xff] }
  0xa5   : > { %5247 = vst [vmem:[#allocation130_spill] sm:$0xff] %v3139_v62  ;;  %v3184_v62 = vld [vmem:[%s4853_s1 + $0x350] sm:$0xff]  ;;  %559 = vmatpush.msra.mxu0 %v3167_v63  ;;  %750 = vmatpush.msrb.mxu2 %v2046_v3 }
  0xa6   : > { %5248 = vst [vmem:[#allocation131_spill] sm:$0xff] %v3144_v61  ;;  %v3179_v61 = vld [vmem:[%s4853_s1 + $0x50] sm:$0xff]  ;;  %770 = vmatpush.msrb.mxu3 %v2053_v4  ;;  %580 = vmatpush.msra.mxu1 %v3184_v62 }
  0xa7   : > { %5249 = vst [vmem:[#allocation132_spill] sm:$0xff] %v3153_v57  ;;  %v3198_v57 = vld [vmem:[%s4853_s1 + $0x320] sm:$0xff]  ;;  %560 = vmatpush.msra.mxu0 %v3179_v61  ;;  %751 = vmatpush.msrb.mxu2 %v2058_v5  ;;  %v5253_v3 = vld [vmem:[#allocation7_spill] sm:$0xff]  ;;  %v5254_v4 = vld [vmem:[#allocation8_spill] sm:$0xff] }
  0xa8   : > { %5250 = vst [vmem:[#allocation133_spill] sm:$0xff] %v3158_v0  ;;  %v3193_v0 = vld [vmem:[%s4853_s1 + $0x20] sm:$0xff]  ;;  %771 = vmatpush.msrb.mxu3 %v2063_v6  ;;  %581 = vmatpush.msra.mxu1 %v3198_v57 }
  0xa9   : > { %561 = vmatpush.msra.mxu0 %v3193_v0  ;;  %582 = vmatmul.f32.vlgmr.msra.gmra.mxu1 %v2574_v60  ;;  %v5255_v5 = vld [vmem:[#allocation5_spill] sm:$0xff]  ;;  %v5256_v6 = vld [vmem:[#allocation6_spill] sm:$0xff]  ;;  %v5306_v60 = vld [vmem:[#allocation63_spill] sm:$0xff] }
  0xaa   : > { %562 = vmatmul.f32.vlgmr.msra.gmra.mxu0 %v2572_v59  ;;  %729 = vmatpush.msrb.mxu1 %v2080_v9  ;;  %v5259_v9 = vld [vmem:[#allocation11_spill] sm:$0xff]  ;;  %v5305_v59 = vld [vmem:[#allocation62_spill] sm:$0xff] }
  0xab   : > { %709 = vmatpush.msrb.mxu0 %v2068_v7  ;;  %752 = vmatpush.msrb.mxu2 %v2075_v8  ;;  %v5257_v7 = vld [vmem:[#allocation9_spill] sm:$0xff]  ;;  %v5258_v8 = vld [vmem:[#allocation10_spill] sm:$0xff] }
  0xac   : > { %772 = vmatpush.msrb.mxu3 %v2085_v10  ;;  %730 = vmatpush.msrb.mxu1 %v2097_v12  ;;  %v5260_v10 = vld [vmem:[#allocation12_spill] sm:$0xff]  ;;  %v5262_v12 = vld [vmem:[#allocation15_spill] sm:$0xff] }
  0xad   : > { %710 = vmatpush.msrb.mxu0 %v2092_v11  ;;  %753 = vmatpush.msrb.mxu2 %v2114_v15  ;;  %v5261_v11 = vld [vmem:[#allocation14_spill] sm:$0xff]  ;;  %v5265_v15 = vld [vmem:[#allocation20_spill] sm:$0xff] }
  0xae   : > { %773 = vmatpush.msrb.mxu3 %v2119_v16  ;;  %731 = vmatpush.msrb.mxu1 %v2109_v14  ;;  %v5264_v14 = vld [vmem:[#allocation17_spill] sm:$0xff] }
  0xaf   : > { %711 = vmatpush.msrb.mxu0 %v2104_v13  ;;  %754 = vmatpush.msrb.mxu2 %v2138_v19  ;;  %v5263_v13 = vld [vmem:[#allocation16_spill] sm:$0xff]  ;;  %v5266_v16 = vld [vmem:[#allocation21_spill] sm:$0xff] }
  0xb0   : > { %774 = vmatpush.msrb.mxu3 %v2143_v20  ;;  %732 = vmatpush.msrb.mxu1 %v2133_v18  ;;  %v5268_v18 = vld [vmem:[#allocation19_spill] sm:$0xff]  ;;  %v5269_v19 = vld [vmem:[#allocation24_spill] sm:$0xff]  ;;  %v5270_v20 = vld [vmem:[#allocation25_spill] sm:$0xff] }
  0xb1   : > { %712 = vmatpush.msrb.mxu0 %v2128_v17  ;;  %755 = vmatpush.msrb.mxu2 %v2162_v23  ;;  %v5267_v17 = vld [vmem:[#allocation18_spill] sm:$0xff]  ;;  %v5273_v23 = vld [vmem:[#allocation28_spill] sm:$0xff] }
  0xb2   : > { %775 = vmatpush.msrb.mxu3 %v2167_v24  ;;  %733 = vmatpush.msrb.mxu1 %v2157_v22  ;;  %v5272_v22 = vld [vmem:[#allocation23_spill] sm:$0xff]  ;;  %v5274_v24 = vld [vmem:[#allocation29_spill] sm:$0xff] }
  0xb3   : > { %713 = vmatpush.msrb.mxu0 %v2152_v21  ;;  %756 = vmatpush.msrb.mxu2 %v2186_v27  ;;  %v5271_v21 = vld [vmem:[#allocation22_spill] sm:$0xff]  ;;  %v5277_v27 = vld [vmem:[#allocation32_spill] sm:$0xff] }
  0xb4   : > { %776 = vmatpush.msrb.mxu3 %v2191_v28  ;;  %734 = vmatpush.msrb.mxu1 %v2181_v26  ;;  %v5276_v26 = vld [vmem:[#allocation27_spill] sm:$0xff]  ;;  %v5278_v28 = vld [vmem:[#allocation33_spill] sm:$0xff] }
  0xb5   : > { %714 = vmatpush.msrb.mxu0 %v2176_v25  ;;  %757 = vmatpush.msrb.mxu2 %v2210_v31  ;;  %v5275_v25 = vld [vmem:[#allocation26_spill] sm:$0xff]  ;;  %v5281_v31 = vld [vmem:[#allocation36_spill] sm:$0xff] }
  0xb6   : > { %777 = vmatpush.msrb.mxu3 %v2215_v32  ;;  %735 = vmatpush.msrb.mxu1 %v2205_v30  ;;  %v5280_v30 = vld [vmem:[#allocation31_spill] sm:$0xff]  ;;  %v5282_v32 = vld [vmem:[#allocation37_spill] sm:$0xff] }
  0xb7   : > { %715 = vmatpush.msrb.mxu0 %v2200_v29  ;;  %758 = vmatpush.msrb.mxu2 %v2234_v35  ;;  %v5279_v29 = vld [vmem:[#allocation30_spill] sm:$0xff] }
  0xb8   : > { %778 = vmatpush.msrb.mxu3 %v2239_v36  ;;  %736 = vmatpush.msrb.mxu1 %v2229_v34  ;;  %v5284_v34 = vld [vmem:[#allocation35_spill] sm:$0xff]  ;;  %v5285_v35 = vld [vmem:[#allocation42_spill] sm:$0xff] }
  0xb9   : > { %716 = vmatpush.msrb.mxu0 %v2224_v33  ;;  %759 = vmatpush.msrb.mxu2 %v2258_v39  ;;  %v5283_v33 = vld [vmem:[#allocation34_spill] sm:$0xff]  ;;  %v5286_v36 = vld [vmem:[#allocation43_spill] sm:$0xff] }
  0xba   : > { %779 = vmatpush.msrb.mxu3 %v2263_v40  ;;  %737 = vmatpush.msrb.mxu1 %v2253_v38  ;;  %v5288_v38 = vld [vmem:[#allocation39_spill] sm:$0xff]  ;;  %v5289_v39 = vld [vmem:[#allocation46_spill] sm:$0xff] }
  0xbb   : > { %717 = vmatpush.msrb.mxu0 %v2248_v37  ;;  %760 = vmatpush.msrb.mxu2 %v2282_v43  ;;  %v5287_v37 = vld [vmem:[#allocation38_spill] sm:$0xff]  ;;  %v5290_v40 = vld [vmem:[#allocation47_spill] sm:$0xff] }
  0xbc   : > { %780 = vmatpush.msrb.mxu3 %v2287_v44  ;;  %738 = vmatpush.msrb.mxu1 %v2277_v42  ;;  %v5292_v42 = vld [vmem:[#allocation41_spill] sm:$0xff]  ;;  %v5293_v43 = vld [vmem:[#allocation50_spill] sm:$0xff]  ;;  %v5294_v44 = vld [vmem:[#allocation51_spill] sm:$0xff] }
  0xbd   : > { %718 = vmatpush.msrb.mxu0 %v2272_v41  ;;  %761 = vmatpush.msrb.mxu2 %v2306_v47  ;;  %v5291_v41 = vld [vmem:[#allocation40_spill] sm:$0xff]  ;;  %v5297_v47 = vld [vmem:[#allocation54_spill] sm:$0xff] }
  0xbe   : > { %781 = vmatpush.msrb.mxu3 %v2311_v48  ;;  %739 = vmatpush.msrb.mxu1 %v2301_v46  ;;  %v5296_v46 = vld [vmem:[#allocation45_spill] sm:$0xff]  ;;  %v5298_v48 = vld [vmem:[#allocation55_spill] sm:$0xff] }
  0xbf   : > { %719 = vmatpush.msrb.mxu0 %v2296_v45  ;;  %762 = vmatpush.msrb.mxu2 %v2330_v51  ;;  %v5295_v45 = vld [vmem:[#allocation44_spill] sm:$0xff]  ;;  %v5301_v51 = vld [vmem:[#allocation58_spill] sm:$0xff] }
  0xc0   : > { %782 = vmatpush.msrb.mxu3 %v2335_v52  ;;  %740 = vmatpush.msrb.mxu1 %v2325_v50  ;;  %v5300_v50 = vld [vmem:[#allocation49_spill] sm:$0xff]  ;;  %v5302_v52 = vld [vmem:[#allocation59_spill] sm:$0xff] }
  0xc1   : > { %720 = vmatpush.msrb.mxu0 %v2320_v49  ;;  %763 = vmatpush.msrb.mxu2 %v2354_v55  ;;  %v5299_v49 = vld [vmem:[#allocation48_spill] sm:$0xff] }
  0xc2   : > { %783 = vmatpush.msrb.mxu3 %v2359_v56  ;;  %741 = vmatpush.msrb.mxu1 %v5252_v2  ;;  %v5303_v55 = vld [vmem:[#allocation52_spill] sm:$0xff]  ;;  %v5304_v56 = vld [vmem:[#allocation53_spill] sm:$0xff] }
  0xc3   : > { %721 = vmatpush.msrb.mxu0 %v5251_v1  ;;  %764 = vmatpush.msrb.mxu2 %v5253_v3  ;;  %v5307_v1 = vld [vmem:[#allocation56_spill] sm:$0xff]  ;;  %v5308_v2 = vld [vmem:[#allocation57_spill] sm:$0xff]  ;;  %v5309_v3 = vld [vmem:[#allocation66_spill] sm:$0xff] }
  0xc4   : > { %784 = vmatpush.msrb.mxu3 %v5254_v4  ;;  %742 = vmatpush.msrb.mxu1 %v5256_v6  ;;  %v5310_v4 = vld [vmem:[#allocation67_spill] sm:$0xff]  ;;  %v5312_v6 = vld [vmem:[#allocation61_spill] sm:$0xff] }
  0xc5   : > { %722 = vmatpush.msrb.mxu0 %v5255_v5  ;;  %829 = vmatpush.msra.mxu2 %v5257_v7  ;;  %v5311_v5 = vld [vmem:[#allocation60_spill] sm:$0xff] }
  0xc6   : > { %849 = vmatpush.msra.mxu3 %v5258_v8  ;;  %743 = vmatpush.msrb.mxu1 %v5260_v10  ;;  %v5313_v7 = vld [vmem:[#allocation72_spill] sm:$0xff]  ;;  %v5314_v8 = vld [vmem:[#allocation73_spill] sm:$0xff] }
  0xc7   : > { %723 = vmatpush.msrb.mxu0 %v5259_v9  ;;  %830 = vmatpush.msra.mxu2 %v5261_v11  ;;  %v5315_v9 = vld [vmem:[#allocation64_spill] sm:$0xff]  ;;  %v5316_v10 = vld [vmem:[#allocation65_spill] sm:$0xff] }
  0xc8   : > { %850 = vmatpush.msra.mxu3 %v5262_v12  ;;  %744 = vmatpush.msrb.mxu1 %v5264_v14  ;;  %v5317_v11 = vld [vmem:[#allocation76_spill] sm:$0xff]  ;;  %v5318_v12 = vld [vmem:[#allocation77_spill] sm:$0xff] }
  0xc9   : > { %724 = vmatpush.msrb.mxu0 %v5263_v13  ;;  %831 = vmatpush.msra.mxu2 %v5267_v17  ;;  %v5319_v13 = vld [vmem:[#allocation68_spill] sm:$0xff]  ;;  %v5320_v14 = vld [vmem:[#allocation69_spill] sm:$0xff] }
  0xca   : > { %809 = vmatpush.msra.mxu1 %v5266_v16  ;;  %851 = vmatpush.msra.mxu3 %v5268_v18  ;;  %v5322_v16 = vld [vmem:[#allocation81_spill] sm:$0xff]  ;;  %v5323_v17 = vld [vmem:[#allocation84_spill] sm:$0xff] }
  0xcb   : > { %789 = vmatpush.msra.mxu0 %v5265_v15  ;;  %832 = vmatpush.msra.mxu2 %v5271_v21  ;;  %v5321_v15 = vld [vmem:[#allocation80_spill] sm:$0xff]  ;;  %v5324_v18 = vld [vmem:[#allocation85_spill] sm:$0xff] }
  0xcc   : > { %810 = vmatpush.msra.mxu1 %v5270_v20  ;;  %852 = vmatpush.msra.mxu3 %v5272_v22  ;;  %v463_v20 = vpop.f32.mrf.mxu3 }
  0xcd   : > { %790 = vmatpush.msra.mxu0 %v5269_v19  ;;  %833 = vmatpush.msra.mxu2 %v5275_v25  ;;  %v443_v19 = vpop.f32.mrf.mxu2 }
  0xce   : > { %811 = vmatpush.msra.mxu1 %v5274_v24  ;;  %853 = vmatpush.msra.mxu3 %v5276_v26  ;;  %v464_v21 = vadd.f32 %v463_v20, %v443_v19  ;;  %v423_v24 = vpop.f32.mrf.mxu1  ;;  %v378_v26 = vld [vmem:[%s2031_s22] sm:$0xff] }
  0xcf   : > { %791 = vmatpush.msra.mxu0 %v5273_v23  ;;  %834 = vmatpush.msra.mxu2 %v5279_v29  ;;  %v403_v23 = vpop.f32.mrf.mxu0 }
  0xd0   : > { %812 = vmatpush.msra.mxu1 %v5278_v28  ;;  %854 = vmatpush.msra.mxu3 %v5280_v30  ;;  %v628_v22 = vrot.slane %v464_v21, 6  ;;  %v424_v25 = vadd.f32 %v423_v24, %v403_v23 }
  0xd1   : > { %792 = vmatpush.msra.mxu0 %v5277_v27  ;;  %835 = vmatpush.msra.mxu2 %v5283_v33 }
  0xd2   : > { %813 = vmatpush.msra.mxu1 %v5282_v32  ;;  %855 = vmatpush.msra.mxu3 %v5284_v34  ;;  %v630_v27 = vsel %vm629_vm0, %v424_v25, %v628_v22 }
  0xd3   : > { %793 = vmatpush.msra.mxu0 %v5281_v31  ;;  %836 = vmatpush.msra.mxu2 %v5287_v37  ;;  %v632_v28 = vadd.f32 %v630_v27, %v378_v26 }
  0xd4   : > { %814 = vmatpush.msra.mxu1 %v5286_v36  ;;  %856 = vmatpush.msra.mxu3 %v5288_v38  ;;  %v653_v36 = vrot.slane %v378_v26, 4 }
  0xd5   : > { %794 = vmatpush.msra.mxu0 %v5285_v35  ;;  %837 = vmatpush.msra.mxu2 %v5291_v41  ;;  %v1724_v29 = vmul.f32 -1.442695, %v632_v28 }
  0xd6   : > { %815 = vmatpush.msra.mxu1 %v5290_v40  ;;  %857 = vmatpush.msra.mxu3 %v5292_v42 }
  0xd7   : > { %795 = vmatpush.msra.mxu0 %v5289_v39  ;;  %838 = vmatpush.msra.mxu2 %v5295_v45  ;;  %1754 = vpow2.f32 %v1724_v29  ;;  %v5327_v29 = vld [vmem:[#allocation13_spill] sm:$0xff] }
  0xd8   : > { %816 = vmatpush.msra.mxu1 %v5294_v44  ;;  %858 = vmatpush.msra.mxu3 %v5296_v46 }
  0xd9   : > { %796 = vmatpush.msra.mxu0 %v5293_v43  ;;  %839 = vmatpush.msra.mxu2 %v5299_v49 }
  0xda   : > { %817 = vmatpush.msra.mxu1 %v5298_v48  ;;  %859 = vmatpush.msra.mxu3 %v5300_v50  ;;  %v376_v50 = vld [vmem:[%s4854_s2] sm:$0x3] }
  0xdb   : > { %797 = vmatpush.msra.mxu0 %v5297_v47  ;;  %840 = vmatpush.msra.mxu2 %v5303_v55  ;;  %v3338_v55 = vperm.slane %v376_v50, 1 }
  0xdc   : > { %818 = vmatpush.msra.mxu1 %v5302_v52  ;;  %860 = vmatpush.msra.mxu3 %v5304_v56 }
  0xdd   : > { %798 = vmatpush.msra.mxu0 %v5301_v51  ;;  %841 = vmatpush.msra.mxu2 %v5307_v1  ;;  %v1755_v38 = vpop.eup %1754 }
  0xde   : > { %819 = vmatpush.msra.mxu1 %v5306_v60  ;;  %861 = vmatpush.msra.mxu3 %v5308_v2  ;;  %v636_v41 = vadd.f32 1.0, %v1755_v38  ;;  %v5332_v38 = vld [vmem:[#allocation90_spill] sm:$0xff] }
  0xdf   : > { %799 = vmatpush.msra.mxu0 %v5305_v59  ;;  %842 = vmatpush.msra.mxu2 %v5311_v5  ;;  %v3344_v5 = vperm.slane %v376_v50, 0  ;;  %v5344_v50 = vld [vmem:[#allocation102_spill] sm:$0xff] }
  0xe0   : > { %820 = vmatpush.msra.mxu1 %v5310_v4  ;;  %862 = vmatpush.msra.mxu3 %v5312_v6  ;;  %vm642_vm1 = vweird.f32 %v636_v41  ;;  %v648_v56 = vand.u32 2147483648, %v636_v41  ;;  %v646_v2 = vand.u32 2147483647, %v636_v41  ;;  %v5353_v4 = vld [vmem:[#allocation111_spill] sm:$0xff] }
  0xe1   : > { %800 = vmatpush.msra.mxu0 %v5309_v3  ;;  %843 = vmatpush.msra.mxu2 %v5315_v9 }
  0xe2   : > { %821 = vmatpush.msra.mxu1 %v5314_v8  ;;  %863 = vmatpush.msra.mxu3 %v5316_v10  ;;  %vm647_vm4 = vcmp.eq.f32.partialorder %v646_v2, 8.507059e+37  ;;  %v5351_v2 = vld [vmem:[#allocation93_spill] sm:$0xff] }
  0xe3   : > { %801 = vmatpush.msra.mxu0 %v5313_v7  ;;  %844 = vmatpush.msra.mxu2 %v5319_v13 }
  0xe4   : > { %822 = vmatpush.msra.mxu1 %v5318_v12  ;;  %864 = vmatpush.msra.mxu3 %v5320_v14  ;;  %v523_v30 = vpop.f32.mrf.mxu2 }
  0xe5   : > { %802 = vmatpush.msra.mxu0 %v5317_v11  ;;  %v543_v31 = vpop.f32.mrf.mxu3  ;;  %v649_v11 = vor.u32 1.1754944e-38, %v648_v56  ;;  %v5347_v56 = vld [vmem:[#allocation89_spill] sm:$0xff] }
  0xe6   : > { %823 = vmatpush.msra.mxu1 %v5322_v16  ;;  %v544_v32 = vadd.f32 %v543_v31, %v523_v30 }
  0xe7   : > { %803 = vmatpush.msra.mxu0 %v5321_v15 }
  0xe8   : > { %824 = vmatpush.msra.mxu1 %v5324_v18  ;;  %v657_v33 = vrot.slane %v544_v32, 6  ;;  %v379_v18 = vld [vmem:[%s2031_s22 + $0x8] sm:$0xf] }
  0xe9   : > { %804 = vmatpush.msra.mxu0 %v5323_v17 }
  0xee   : > { %v483_v34 = vpop.f32.mrf.mxu0 }
  0xef   : > { %v503_v35 = vpop.f32.mrf.mxu1 }
  0xf0   : > { %v504_v37 = vadd.f32 %v503_v35, %v483_v34  ;;  %v5328_v34 = vld [vmem:[#allocation86_spill] sm:$0xff]  ;;  %v5329_v35 = vld [vmem:[#allocation87_spill] sm:$0xff] }
  0xf2   : > { %v658_v39 = vsel %vm629_vm0, %v504_v37, %v657_v33  ;;  %v5331_v37 = vld [vmem:[#allocation71_spill] sm:$0xff] }
  0xf3   : > { %v660_v40 = vadd.f32 %v658_v39, %v653_v36  ;;  %v5330_v36 = vld [vmem:[#allocation70_spill] sm:$0xff]  ;;  %v5333_v39 = vld [vmem:[#allocation91_spill] sm:$0xff] }
  0xf5   : > { %v1725_v42 = vmul.f32 -1.442695, %v660_v40  ;;  %v5334_v40 = vld [vmem:[#allocation74_spill] sm:$0xff] }
  0xf7   : > { %1756 = vpow2.f32 %v1725_v42  ;;  %v5336_v42 = vld [vmem:[#allocation94_spill] sm:$0xff] }
  0xf8   : > { %1758 = vrcp.f32 %v636_v41 }
  0xfd   : > { %v1757_v43 = vpop.eup %1756 }
  0xfe   : > { %v664_v44 = vadd.f32 1.0, %v1757_v43  ;;  %v1759_v45 = vpop.eup %1758  ;;  %v5337_v43 = vld [vmem:[#allocation95_spill] sm:$0xff] }
  0xff   : > { %v638_v46 = vmul.f32 %v1759_v45, %v636_v41  ;;  %vm643_vm2 = vweird.f32 %v1759_v45  ;;  %v5335_v41 = vld [vmem:[#allocation75_spill] sm:$0xff] }
 0x100   : > { %1760 = vrcp.f32 %v664_v44  ;;  %vm3340_vm3 = vmor %vm642_vm1, %vm643_vm2  ;;  %vm670_vm5 = vweird.f32 %v664_v44  ;;  %v676_v15 = vand.u32 2147483648, %v664_v44  ;;  %v674_v17 = vand.u32 2147483647, %v664_v44 }
 0x101   : > { %v639_v48 = vsub.f32 1.0, %v638_v46  ;;  %v5340_v46 = vld [vmem:[#allocation98_spill] sm:$0xff] }
 0x102   : > { %v677_v22 = vor.u32 1.1754944e-38, %v676_v15  ;;  %vm675_vm8 = vcmp.eq.f32.partialorder %v674_v17, 8.507059e+37  ;;  %v5363_v15 = vld [vmem:[#allocation105_spill] sm:$0xff]  ;;  %v5365_v17 = vld [vmem:[#allocation123_spill] sm:$0xff] }
 0x103   : > { %v640_v51 = vmul.f32 %v1759_v45, %v639_v48  ;;  %v5342_v48 = vld [vmem:[#allocation82_spill] sm:$0xff] }
 0x105   : > { %v641_v1 = vadd.f32 %v1759_v45, %v640_v51  ;;  %v5345_v51 = vld [vmem:[#allocation103_spill] sm:$0xff] }
 0x106   : > { %v1761_v47 = vpop.eup %1760 }
 0x107   : > { %v666_v49 = vmul.f32 %v1761_v47, %v664_v44  ;;  %v645_v12 = vsel %vm3340_vm3, %v1759_v45, %v641_v1  ;;  %vm671_vm6 = vweird.f32 %v1761_v47  ;;  %v5338_v44 = vld [vmem:[#allocation78_spill] sm:$0xff]  ;;  %v5339_v45 = vld [vmem:[#allocation79_spill] sm:$0xff]  ;;  %v5350_v1 = vld [vmem:[#allocation92_spill] sm:$0xff] }
 0x108   : > { %v650_v19 = vsel %vm647_vm4, %v649_v11, %v645_v12  ;;  %vm672_vm7 = vmor %vm670_vm5, %vm671_vm6  ;;  %v5359_v11 = vld [vmem:[#allocation101_spill] sm:$0xff]  ;;  %v5360_v12 = vld [vmem:[#allocation118_spill] sm:$0xff] }
 0x109   : > { %v667_v52 = vsub.f32 1.0, %v666_v49  ;;  %v5343_v49 = vld [vmem:[#allocation83_spill] sm:$0xff] }
 0x10b   : > { %v668_v8 = vmul.f32 %v1761_v47, %v667_v52  ;;  %v5346_v52 = vld [vmem:[#allocation88_spill] sm:$0xff] }
 0x10d   : > { %v669_v16 = vadd.f32 %v1761_v47, %v668_v8  ;;  %v5356_v8 = vld [vmem:[#allocation114_spill] sm:$0xff] }
 0x10f   : > { %v673_v24 = vsel %vm672_vm7, %v1761_v47, %v669_v16  ;;  %v5341_v47 = vld [vmem:[#allocation99_spill] sm:$0xff]  ;;  %v5364_v16 = vld [vmem:[#allocation122_spill] sm:$0xff] }
 0x110   : > { %v678_v25 = vsel %vm675_vm8, %v677_v22, %v673_v24  ;;  %v5370_v22 = vld [vmem:[#allocation112_spill] sm:$0xff] }
 0x111   : > { %v695_v26 = vsub.f32 1.0, %v678_v25  ;;  %v697_v30 = vmul.f32 %v678_v25, %v5327_v29  ;;  %v5372_v24 = vld [vmem:[#allocation116_spill] sm:$0xff]  ;;  %v5373_v25 = vld [vmem:[#allocation117_spill] sm:$0xff] }
 0x112   : > { %v5377_v29 = vld [vmem:[#allocation121_spill] sm:$0xff] }
 0x124   : > { %v603_v59 = vpop.f32.mrf.mxu2 }
 0x125   : > { %v623_v60 = vpop.f32.mrf.mxu3 }
 0x126   : > { %v624_v3 = vadd.f32 %v623_v60, %v603_v59  ;;  %v583_v7 = vpop.f32.mrf.mxu1  ;;  %v5348_v59 = vld [vmem:[#allocation106_spill] sm:$0xff]  ;;  %v5349_v60 = vld [vmem:[#allocation107_spill] sm:$0xff] }
 0x127   : > { %v563_v6 = vpop.f32.mrf.mxu0 }
 0x128   : > { %v686_v9 = vadd.f32 %v3338_v55, %v624_v3  ;;  %v584_v10 = vadd.f32 %v583_v7, %v563_v6  ;;  %v5352_v3 = vld [vmem:[#allocation110_spill] sm:$0xff]  ;;  %v5354_v6 = vld [vmem:[#allocation96_spill] sm:$0xff]  ;;  %v5355_v7 = vld [vmem:[#allocation97_spill] sm:$0xff] }
 0x12a   : > { %v689_v13 = vrot.slane %v686_v9, 6  ;;  %v685_v14 = vadd.f32 %v3344_v5, %v584_v10  ;;  %v5357_v9 = vld [vmem:[#allocation115_spill] sm:$0xff]  ;;  %v5358_v10 = vld [vmem:[#allocation100_spill] sm:$0xff] }
 0x12c   : > { %v690_v20 = vsel %vm629_vm0, %v685_v14, %v689_v13  ;;  %v5361_v13 = vld [vmem:[#allocation119_spill] sm:$0xff]  ;;  %v5362_v14 = vld [vmem:[#allocation104_spill] sm:$0xff] }
 0x12d   : > { %v692_v21 = vmul.f32 %v690_v20, %v650_v19  ;;  %v5367_v19 = vld [vmem:[#allocation109_spill] sm:$0xff]  ;;  %v5368_v20 = vld [vmem:[#allocation126_spill] sm:$0xff] }
 0x12f   : > { %v693_v23 = vadd.f32 %v692_v21, %v379_v18  ;;  %v5366_v18 = vld [vmem:[#allocation108_spill] sm:$0xff]  ;;  %v5369_v21 = vld [vmem:[#allocation127_spill] sm:$0xff] }
 0x131   : > { %1762 = vtanh.f32 %v693_v23  ;;  %v5371_v23 = vld [vmem:[#allocation113_spill] sm:$0xff] }
 0x137   : > { %v1763_v27 = vpop.eup %1762 }
 0x138   : > { %v696_v28 = vmul.f32 %v1763_v27, %v695_v26  ;;  %v5374_v26 = vld [vmem:[#allocation132_spill] sm:$0xff]  ;;  %v5375_v27 = vld [vmem:[#allocation133_spill] sm:$0xff] }
 0x13a   : > { %v3353_v31 = vadd.f32 %v697_v30, %v696_v28  ;;  %v5376_v28 = vld [vmem:[#allocation120_spill] sm:$0xff] }
 0x13b   : > { %v5378_v30 = vld [vmem:[#allocation124_spill] sm:$0xff] }
 0x13c   : > { %699 = vst [vmem:[%s2026_s19] sm:$0xf] %v3353_v31 }
 0x13d   : > { %704 = vst [vmem:[#allocation1] ss:$4 sm:$0xff] %v3353_v31 }
 0x144   : > { %v3358_v32 = vld.sshfl [vmem:[#allocation1] sm:$0xff pattern:$0x73625140]  ;;  %v3360_v33 = vld.sshfl [vmem:[#allocation1 + $0x8] sm:$0xff pattern:$0x73625140] }
 0x145   : > { %725 = vmatmul.f32.vlgmr.msrb.gmra.mxu0 %v3358_v32  ;;  %745 = vmatmul.f32.vlgmr.msrb.gmra.mxu1 %v3360_v33 }
 0x146   : > { %765 = vmatmul.f32.vlgmr.msrb.gmra.mxu2 %v3358_v32  ;;  %785 = vmatmul.f32.vlgmr.msrb.gmra.mxu3 %v3360_v33 }
 0x147   : > { %869 = vmatpush.msrb.mxu0 %v5328_v34  ;;  %889 = vmatpush.msrb.mxu1 %v5329_v35  ;;  %v5381_v34 = vld [vmem:[#allocation129_spill] sm:$0xff]  ;;  %v5382_v35 = vld [vmem:[#allocation130_spill] sm:$0xff] }
 0x148   : > { %909 = vmatpush.msrb.mxu2 %v5330_v36  ;;  %929 = vmatpush.msrb.mxu3 %v5331_v37  ;;  %v3483_v36 = vld [vmem:[%s4853_s1 + $0x5a8] sm:$0xff]  ;;  %v3489_v37 = vld [vmem:[%s4853_s1 + $0x270] sm:$0xff] }
 0x149   : > { %870 = vmatpush.msrb.mxu0 %v5332_v38  ;;  %890 = vmatpush.msrb.mxu1 %v5333_v39  ;;  %v3495_v38 = vld [vmem:[%s4853_s1 + $0x570] sm:$0xff]  ;;  %v3501_v39 = vld [vmem:[%s4853_s1 + $0x278] sm:$0xff] }
 0x14a   : > { %910 = vmatpush.msrb.mxu2 %v5334_v40  ;;  %930 = vmatpush.msrb.mxu3 %v5335_v41  ;;  %v3507_v40 = vld [vmem:[%s4853_s1 + $0x578] sm:$0xff]  ;;  %v3513_v41 = vld [vmem:[%s4853_s1 + $0x240] sm:$0xff] }
 0x14b   : > { %871 = vmatpush.msrb.mxu0 %v5336_v42  ;;  %891 = vmatpush.msrb.mxu1 %v5337_v43  ;;  %v3519_v42 = vld [vmem:[%s4853_s1 + $0x540] sm:$0xff]  ;;  %v3525_v43 = vld [vmem:[%s4853_s1 + $0x248] sm:$0xff] }
 0x14c   : > { %911 = vmatpush.msrb.mxu2 %v5338_v44  ;;  %931 = vmatpush.msrb.mxu3 %v5339_v45  ;;  %v3531_v44 = vld [vmem:[%s4853_s1 + $0x548] sm:$0xff]  ;;  %v3537_v45 = vld [vmem:[%s4853_s1 + $0x210] sm:$0xff] }
 0x14d   : > { %872 = vmatpush.msrb.mxu0 %v5340_v46  ;;  %892 = vmatpush.msrb.mxu1 %v5341_v47  ;;  %v3543_v46 = vld [vmem:[%s4853_s1 + $0x510] sm:$0xff]  ;;  %v3549_v47 = vld [vmem:[%s4853_s1 + $0x218] sm:$0xff] }
 0x14e   : > { %912 = vmatpush.msrb.mxu2 %v5342_v48  ;;  %932 = vmatpush.msrb.mxu3 %v5343_v49  ;;  %v3555_v48 = vld [vmem:[%s4853_s1 + $0x518] sm:$0xff]  ;;  %v3561_v49 = vld [vmem:[%s4853_s1 + $0x1e0] sm:$0xff] }
 0x14f   : > { %805 = vmatmul.f32.vlgmr.msra.gmra.mxu0 %v3358_v32  ;;  %825 = vmatmul.f32.vlgmr.msra.gmra.mxu1 %v3360_v33 }
 0x150   : > { %845 = vmatmul.f32.vlgmr.msra.gmra.mxu2 %v3358_v32  ;;  %865 = vmatmul.f32.vlgmr.msra.gmra.mxu3 %v3360_v33 }
 0x151   : > { %873 = vmatpush.msrb.mxu0 %v5344_v50  ;;  %893 = vmatpush.msrb.mxu1 %v5345_v51  ;;  %v3567_v50 = vld [vmem:[%s4853_s1 + $0x4e0] sm:$0xff]  ;;  %v3573_v51 = vld [vmem:[%s4853_s1 + $0x1e8] sm:$0xff] }
 0x152   : > { %913 = vmatpush.msrb.mxu2 %v5346_v52  ;;  %933 = vmatpush.msrb.mxu3 %v5347_v56  ;;  %v3579_v52 = vld [vmem:[%s4853_s1 + $0x4e8] sm:$0xff]  ;;  %v3585_v56 = vld [vmem:[%s4853_s1 + $0x1b0] sm:$0xff] }
 0x153   : > { %874 = vmatpush.msrb.mxu0 %v5348_v59  ;;  %894 = vmatpush.msrb.mxu1 %v5349_v60  ;;  %v3591_v59 = vld [vmem:[%s4853_s1 + $0x4b0] sm:$0xff]  ;;  %v3597_v60 = vld [vmem:[%s4853_s1 + $0x1b8] sm:$0xff] }
 0x154   : > { %914 = vmatpush.msrb.mxu2 %v5350_v1  ;;  %934 = vmatpush.msrb.mxu3 %v5351_v2  ;;  %v3603_v1 = vld [vmem:[%s4853_s1 + $0x4b8] sm:$0xff]  ;;  %v3609_v2 = vld [vmem:[%s4853_s1 + $0x180] sm:$0xff] }
 0x155   : > { %875 = vmatpush.msrb.mxu0 %v5352_v3  ;;  %895 = vmatpush.msrb.mxu1 %v5353_v4  ;;  %v3615_v3 = vld [vmem:[%s4853_s1 + $0x480] sm:$0xff]  ;;  %v3621_v4 = vld [vmem:[%s4853_s1 + $0x188] sm:$0xff] }
 0x156   : > { %915 = vmatpush.msrb.mxu2 %v5354_v6  ;;  %935 = vmatpush.msrb.mxu3 %v5355_v7  ;;  %v3627_v6 = vld [vmem:[%s4853_s1 + $0x488] sm:$0xff]  ;;  %v3633_v7 = vld [vmem:[%s4853_s1 + $0x150] sm:$0xff] }
 0x157   : > { %876 = vmatpush.msrb.mxu0 %v5356_v8  ;;  %896 = vmatpush.msrb.mxu1 %v5357_v9  ;;  %v3639_v8 = vld [vmem:[%s4853_s1 + $0x450] sm:$0xff]  ;;  %v3645_v9 = vld [vmem:[%s4853_s1 + $0x158] sm:$0xff] }
 0x158   : > { %916 = vmatpush.msrb.mxu2 %v5358_v10  ;;  %936 = vmatpush.msrb.mxu3 %v5359_v11  ;;  %v3651_v10 = vld [vmem:[%s4853_s1 + $0x458] sm:$0xff]  ;;  %v3657_v11 = vld [vmem:[%s4853_s1 + $0x120] sm:$0xff] }
 0x159   : > { %877 = vmatpush.msrb.mxu0 %v5360_v12  ;;  %897 = vmatpush.msrb.mxu1 %v5361_v13  ;;  %v3663_v12 = vld [vmem:[%s4853_s1 + $0x420] sm:$0xff]  ;;  %v3669_v13 = vld [vmem:[%s4853_s1 + $0x128] sm:$0xff] }
 0x15a   : > { %917 = vmatpush.msrb.mxu2 %v5362_v14  ;;  %937 = vmatpush.msrb.mxu3 %v5363_v15  ;;  %5384 = vst [vmem:[#allocation3_spill] sm:$0xff] %v3669_v13  ;;  %v3675_v14 = vld [vmem:[%s4853_s1 + $0x428] sm:$0xff]  ;;  %v3681_v15 = vld [vmem:[%s4853_s1 + $0xf0] sm:$0xff] }
 0x15b   : > { %878 = vmatpush.msrb.mxu0 %v5364_v16  ;;  %898 = vmatpush.msrb.mxu1 %v5365_v17  ;;  %5385 = vst [vmem:[#allocation4_spill] sm:$0xff] %v3675_v14  ;;  %v3687_v16 = vld [vmem:[%s4853_s1 + $0x3f0] sm:$0xff]  ;;  %v3693_v17 = vld [vmem:[%s4853_s1 + $0xf8] sm:$0xff] }
 0x15c   : > { %918 = vmatpush.msrb.mxu2 %v5366_v18  ;;  %938 = vmatpush.msrb.mxu3 %v5367_v19  ;;  %5386 = vst [vmem:[#allocation7_spill] sm:$0xff] %v3681_v15  ;;  %v3699_v18 = vld [vmem:[%s4853_s1 + $0x3f8] sm:$0xff]  ;;  %v3705_v19 = vld [vmem:[%s4853_s1 + $0xc0] sm:$0xff] }
 0x15d   : > { %879 = vmatpush.msrb.mxu0 %v5368_v20  ;;  %899 = vmatpush.msrb.mxu1 %v5369_v21  ;;  %5387 = vst [vmem:[#allocation8_spill] sm:$0xff] %v3687_v16  ;;  %v3711_v20 = vld [vmem:[%s4853_s1 + $0x3c0] sm:$0xff]  ;;  %v3717_v21 = vld [vmem:[%s4853_s1 + $0xc8] sm:$0xff] }
 0x15e   : > { %919 = vmatpush.msrb.mxu2 %v5370_v22  ;;  %939 = vmatpush.msrb.mxu3 %v5371_v23  ;;  %5388 = vst [vmem:[#allocation5_spill] sm:$0xff] %v3693_v17  ;;  %v3723_v22 = vld [vmem:[%s4853_s1 + $0x3c8] sm:$0xff]  ;;  %v3729_v23 = vld [vmem:[%s4853_s1 + $0x90] sm:$0xff] }
 0x15f   : > { %880 = vmatpush.msrb.mxu0 %v3127_v54  ;;  %900 = vmatpush.msrb.mxu1 %v3132_v53  ;;  %v5379_v54 = vld [vmem:[#allocation125_spill] sm:$0xff]  ;;  %v5380_v53 = vld [vmem:[#allocation128_spill] sm:$0xff]  ;;  %5389 = vst [vmem:[#allocation6_spill] sm:$0xff] %v3699_v18 }
 0x160   : > { %920 = vmatpush.msrb.mxu2 %v5372_v24  ;;  %940 = vmatpush.msrb.mxu3 %v5373_v25  ;;  %5390 = vst [vmem:[#allocation9_spill] sm:$0xff] %v3705_v19  ;;  %v3735_v24 = vld [vmem:[%s4853_s1 + $0x390] sm:$0xff]  ;;  %v3741_v25 = vld [vmem:[%s4853_s1 + $0x98] sm:$0xff] }
 0x161   : > { %881 = vmatpush.msrb.mxu0 %v5374_v26  ;;  %901 = vmatpush.msrb.mxu1 %v5375_v27  ;;  %5391 = vst [vmem:[#allocation10_spill] sm:$0xff] %v3711_v20  ;;  %v3747_v26 = vld [vmem:[%s4853_s1 + $0x398] sm:$0xff]  ;;  %v3753_v27 = vld [vmem:[%s4853_s1 + $0x60] sm:$0xff] }
 0x162   : > { %921 = vmatpush.msrb.mxu2 %v5376_v28  ;;  %941 = vmatpush.msrb.mxu3 %v5377_v29  ;;  %5392 = vst [vmem:[#allocation11_spill] sm:$0xff] %v3717_v21  ;;  %v3759_v28 = vld [vmem:[%s4853_s1 + $0x360] sm:$0xff]  ;;  %v3765_v29 = vld [vmem:[%s4853_s1 + $0x68] sm:$0xff] }
 0x163   : > { %882 = vmatpush.msrb.mxu0 %v3167_v63  ;;  %902 = vmatpush.msrb.mxu1 %v3172_v58  ;;  %v5383_v63 = vld [vmem:[#allocation131_spill] sm:$0xff]  ;;  %5393 = vst [vmem:[#allocation12_spill] sm:$0xff] %v3723_v22 }
 0x164   : > { %922 = vmatpush.msrb.mxu2 %v5378_v30  ;;  %942 = vmatpush.msrb.mxu3 %v5379_v54  ;;  %v3441_v58 = vld [vmem:[%s4853_s1 + $0x2d0] sm:$0xff]  ;;  %5394 = vst [vmem:[#allocation14_spill] sm:$0xff] %v3729_v23  ;;  %v3771_v30 = vld [vmem:[%s4853_s1 + $0x368] sm:$0xff] }
 0x165   : > { %883 = vmatpush.msrb.mxu0 %v3179_v61  ;;  %903 = vmatpush.msrb.mxu1 %v3184_v62  ;;  %v3453_v61 = vld [vmem:[%s4853_s1 + $0x2d8] sm:$0xff]  ;;  %5395 = vst [vmem:[#allocation15_spill] sm:$0xff] %v3735_v24  ;;  %v3777_v54 = vld [vmem:[%s4853_s1 + $0x30] sm:$0xff] }
 0x166   : > { %923 = vmatpush.msrb.mxu2 %v5380_v53  ;;  %943 = vmatpush.msrb.mxu3 %v5381_v34  ;;  %v3459_v62 = vld [vmem:[%s4853_s1 + $0x5d8] sm:$0xff]  ;;  %5396 = vst [vmem:[#allocation16_spill] sm:$0xff] %v3741_v25  ;;  %v3783_v53 = vld [vmem:[%s4853_s1 + $0x330] sm:$0xff] }
 0x167   : > { %884 = vmatpush.msrb.mxu0 %v3193_v0  ;;  %904 = vmatpush.msrb.mxu1 %v3198_v57  ;;  %v3447_v57 = vld [vmem:[%s4853_s1 + $0x5d0] sm:$0xff]  ;;  %v3465_v0 = vld [vmem:[%s4853_s1 + $0x2a0] sm:$0xff]  ;;  %5397 = vst [vmem:[#allocation17_spill] sm:$0xff] %v3747_v26  ;;  %v3789_v34 = vld [vmem:[%s4853_s1 + $0x38] sm:$0xff] }
 0x168   : > { %924 = vmatpush.msrb.mxu2 %v5382_v35  ;;  %944 = vmatpush.msrb.mxu3 %v5383_v63  ;;  %5398 = vst [vmem:[#allocation20_spill] sm:$0xff] %v3753_v27  ;;  %v3795_v35 = vld [vmem:[%s4853_s1 + $0x338] sm:$0xff]  ;;  %v3801_v63 = vld [vmem:[%s4853_s1] sm:$0xff] }
 0x169   : > { %885 = vmatmul.f32.vlgmr.msrb.gmra.mxu0 %v3358_v32  ;;  %905 = vmatmul.f32.vlgmr.msrb.gmra.mxu1 %v3360_v33  ;;  %5399 = vst [vmem:[#allocation21_spill] sm:$0xff] %v3759_v28 }
 0x16a   : > { %925 = vmatmul.f32.vlgmr.msrb.gmra.mxu2 %v3358_v32  ;;  %945 = vmatmul.f32.vlgmr.msrb.gmra.mxu3 %v3360_v33  ;;  %v3471_v32 = vld [vmem:[%s4853_s1 + $0x5a0] sm:$0xff]  ;;  %v3477_v33 = vld [vmem:[%s4853_s1 + $0x2a8] sm:$0xff]  ;;  %5400 = vst [vmem:[#allocation18_spill] sm:$0xff] %v3765_v29 }
 0x16b   : > { %1027 = vmatpush.msra.mxu0 %v3441_v58  ;;  %1047 = vmatpush.msra.mxu1 %v3447_v57  ;;  %5401 = vst [vmem:[#allocation19_spill] sm:$0xff] %v3771_v30 }
 0x16c   : > { %1067 = vmatpush.msra.mxu2 %v3453_v61  ;;  %1087 = vmatpush.msra.mxu3 %v3459_v62  ;;  %5402 = vst [vmem:[#allocation24_spill] sm:$0xff] %v3777_v54 }
 0x16d   : > { %1028 = vmatpush.msra.mxu0 %v3465_v0  ;;  %1048 = vmatpush.msra.mxu1 %v3471_v32  ;;  %5403 = vst [vmem:[#allocation25_spill] sm:$0xff] %v3783_v53 }
 0x16e   : > { %1068 = vmatpush.msra.mxu2 %v3477_v33  ;;  %1088 = vmatpush.msra.mxu3 %v3483_v36  ;;  %5404 = vst [vmem:[#allocation22_spill] sm:$0xff] %v3789_v34 }
 0x16f   : > { %1029 = vmatpush.msra.mxu0 %v3489_v37  ;;  %1049 = vmatpush.msra.mxu1 %v3495_v38  ;;  %5405 = vst [vmem:[#allocation23_spill] sm:$0xff] %v3795_v35 }
 0x170   : > { %1069 = vmatpush.msra.mxu2 %v3501_v39  ;;  %1089 = vmatpush.msra.mxu3 %v3507_v40  ;;  %5406 = vst [vmem:[#allocation28_spill] sm:$0xff] %v3801_v63 }
 0x171   : > { %1030 = vmatpush.msra.mxu0 %v3513_v41  ;;  %1050 = vmatpush.msra.mxu1 %v3519_v42 }
 0x172   : > { %1070 = vmatpush.msra.mxu2 %v3525_v43  ;;  %1090 = vmatpush.msra.mxu3 %v3531_v44 }
 0x173   : > { %1031 = vmatpush.msra.mxu0 %v3537_v45  ;;  %1051 = vmatpush.msra.mxu1 %v3543_v46 }
 0x174   : > { %1071 = vmatpush.msra.mxu2 %v3549_v47  ;;  %1091 = vmatpush.msra.mxu3 %v3555_v48 }
 0x175   : > { %1032 = vmatpush.msra.mxu0 %v3561_v49  ;;  %1052 = vmatpush.msra.mxu1 %v3567_v50 }
 0x176   : > { %1072 = vmatpush.msra.mxu2 %v3573_v51  ;;  %1092 = vmatpush.msra.mxu3 %v3579_v52 }
 0x177   : > { %1033 = vmatpush.msra.mxu0 %v3585_v56  ;;  %1053 = vmatpush.msra.mxu1 %v3591_v59 }
 0x178   : > { %1073 = vmatpush.msra.mxu2 %v3597_v60  ;;  %1093 = vmatpush.msra.mxu3 %v3603_v1 }
 0x179   : > { %1034 = vmatpush.msra.mxu0 %v3609_v2  ;;  %1054 = vmatpush.msra.mxu1 %v3615_v3 }
 0x17a   : > { %1074 = vmatpush.msra.mxu2 %v3621_v4  ;;  %1094 = vmatpush.msra.mxu3 %v3627_v6 }
 0x17b   : > { %1035 = vmatpush.msra.mxu0 %v3633_v7  ;;  %1055 = vmatpush.msra.mxu1 %v3639_v8 }
 0x17c   : > { %1075 = vmatpush.msra.mxu2 %v3645_v9  ;;  %1095 = vmatpush.msra.mxu3 %v3651_v10 }
 0x17d   : > { %1036 = vmatpush.msra.mxu0 %v3657_v11  ;;  %1056 = vmatpush.msra.mxu1 %v3663_v12 }
 0x17e   : > { %1076 = vmatpush.msra.mxu2 %v3669_v13  ;;  %1096 = vmatpush.msra.mxu3 %v3675_v14 }
 0x17f   : > { %1037 = vmatpush.msra.mxu0 %v3681_v15  ;;  %1057 = vmatpush.msra.mxu1 %v3687_v16 }
 0x180   : > { %1077 = vmatpush.msra.mxu2 %v3693_v17  ;;  %1097 = vmatpush.msra.mxu3 %v3699_v18 }
 0x181   : > { %1038 = vmatpush.msra.mxu0 %v3705_v19  ;;  %1058 = vmatpush.msra.mxu1 %v3711_v20 }
 0x182   : > { %1078 = vmatpush.msra.mxu2 %v3717_v21  ;;  %1098 = vmatpush.msra.mxu3 %v3723_v22 }
 0x183   : > { %1039 = vmatpush.msra.mxu0 %v3729_v23  ;;  %1059 = vmatpush.msra.mxu1 %v3735_v24 }
 0x184   : > { %1079 = vmatpush.msra.mxu2 %v3741_v25  ;;  %1099 = vmatpush.msra.mxu3 %v3747_v26 }
 0x185   : > { %1040 = vmatpush.msra.mxu0 %v3753_v27  ;;  %1060 = vmatpush.msra.mxu1 %v3759_v28  ;;  %v1726_v27 = vld [vmem:[%s2031_s22 + $0xc] sm:$0xff] }
 0x186   : > { %1080 = vmatpush.msra.mxu2 %v3765_v29  ;;  %1100 = vmatpush.msra.mxu3 %v3771_v30  ;;  %v975_v18 = vrot.slane %v1726_v27, 4 }
 0x187   : > { %1041 = vmatpush.msra.mxu0 %v3777_v54  ;;  %1061 = vmatpush.msra.mxu1 %v3783_v53  ;;  %v3807_v53 = vld [vmem:[%s4853_s1 + $0x300] sm:$0xff] }
 0x188   : > { %1081 = vmatpush.msra.mxu2 %v3789_v34  ;;  %1101 = vmatpush.msra.mxu3 %v3795_v35  ;;  %5407 = vst [vmem:[#allocation29_spill] sm:$0xff] %v3807_v53  ;;  %v3813_v34 = vld [vmem:[%s4853_s1 + $0x8] sm:$0xff] }
 0x189   : > { %1042 = vmatpush.msra.mxu0 %v3801_v63  ;;  %1062 = vmatpush.msra.mxu1 %v3807_v53  ;;  %5408 = vst [vmem:[#allocation26_spill] sm:$0xff] %v3813_v34  ;;  %v3819_v35 = vld [vmem:[%s4853_s1 + $0x308] sm:$0xff]  ;;  %v3825_v63 = vld [vmem:[%s4853_s1 + $0x2e0] sm:$0xff] }
 0x18a   : > { %1082 = vmatpush.msra.mxu2 %v3813_v34  ;;  %5409 = vst [vmem:[#allocation27_spill] sm:$0xff] %v3819_v35  ;;  %1102 = vmatpush.msra.mxu3 %v3819_v35  ;;  %v3831_v53 = vld [vmem:[%s4853_s1 + $0x5e0] sm:$0xff]  ;;  %v3837_v34 = vld [vmem:[%s4853_s1 + $0x2e8] sm:$0xff] }
 0x18b   : > { %5410 = vst [vmem:[#allocation32_spill] sm:$0xff] %v3825_v63  ;;  %1107 = vmatpush.msrb.mxu0 %v3825_v63  ;;  %1127 = vmatpush.msrb.mxu1 %v3831_v53  ;;  %v3843_v35 = vld [vmem:[%s4853_s1 + $0x5e8] sm:$0xff]  ;;  %v3849_v63 = vld [vmem:[%s4853_s1 + $0x2b0] sm:$0xff] }
 0x18c   : > { %5411 = vst [vmem:[#allocation33_spill] sm:$0xff] %v3831_v53  ;;  %1147 = vmatpush.msrb.mxu2 %v3837_v34  ;;  %1167 = vmatpush.msrb.mxu3 %v3843_v35  ;;  %v3855_v53 = vld [vmem:[%s4853_s1 + $0x5b0] sm:$0xff] }
 0x18d   : > { %5412 = vst [vmem:[#allocation30_spill] sm:$0xff] %v3837_v34  ;;  %1108 = vmatpush.msrb.mxu0 %v3849_v63  ;;  %1128 = vmatpush.msrb.mxu1 %v3855_v53  ;;  %v3861_v34 = vld [vmem:[%s4853_s1 + $0x2b8] sm:$0xff] }
 0x18e   : > { %5413 = vst [vmem:[#allocation31_spill] sm:$0xff] %v3843_v35  ;;  %1148 = vmatpush.msrb.mxu2 %v3861_v34  ;;  %v3867_v35 = vld [vmem:[%s4853_s1 + $0x5b8] sm:$0xff] }
 0x18f   : > { %5414 = vst [vmem:[#allocation36_spill] sm:$0xff] %v3849_v63  ;;  %1168 = vmatpush.msrb.mxu3 %v3867_v35  ;;  %v3873_v63 = vld [vmem:[%s4853_s1 + $0x280] sm:$0xff] }
 0x190   : > { %5415 = vst [vmem:[#allocation37_spill] sm:$0xff] %v3855_v53  ;;  %1109 = vmatpush.msrb.mxu0 %v3873_v63  ;;  %v3879_v53 = vld [vmem:[%s4853_s1 + $0x580] sm:$0xff] }
 0x191   : > { %5416 = vst [vmem:[#allocation34_spill] sm:$0xff] %v3861_v34  ;;  %1129 = vmatpush.msrb.mxu1 %v3879_v53  ;;  %v3885_v34 = vld [vmem:[%s4853_s1 + $0x288] sm:$0xff] }
 0x192   : > { %5417 = vst [vmem:[#allocation35_spill] sm:$0xff] %v3867_v35  ;;  %1149 = vmatpush.msrb.mxu2 %v3885_v34  ;;  %v3891_v35 = vld [vmem:[%s4853_s1 + $0x588] sm:$0xff] }
 0x193   : > { %5418 = vst [vmem:[#allocation42_spill] sm:$0xff] %v3873_v63  ;;  %1169 = vmatpush.msrb.mxu3 %v3891_v35  ;;  %v3897_v63 = vld [vmem:[%s4853_s1 + $0x250] sm:$0xff] }
 0x194   : > { %5419 = vst [vmem:[#allocation43_spill] sm:$0xff] %v3879_v53  ;;  %1110 = vmatpush.msrb.mxu0 %v3897_v63  ;;  %v3903_v53 = vld [vmem:[%s4853_s1 + $0x550] sm:$0xff] }
 0x195   : > { %5420 = vst [vmem:[#allocation38_spill] sm:$0xff] %v3885_v34  ;;  %1130 = vmatpush.msrb.mxu1 %v3903_v53  ;;  %v3909_v34 = vld [vmem:[%s4853_s1 + $0x258] sm:$0xff] }
 0x196   : > { %5421 = vst [vmem:[#allocation39_spill] sm:$0xff] %v3891_v35  ;;  %1150 = vmatpush.msrb.mxu2 %v3909_v34  ;;  %v3915_v35 = vld [vmem:[%s4853_s1 + $0x558] sm:$0xff] }
 0x197   : > { %5422 = vst [vmem:[#allocation46_spill] sm:$0xff] %v3897_v63  ;;  %1170 = vmatpush.msrb.mxu3 %v3915_v35  ;;  %v3921_v63 = vld [vmem:[%s4853_s1 + $0x220] sm:$0xff] }
 0x198   : > { %5423 = vst [vmem:[#allocation47_spill] sm:$0xff] %v3903_v53  ;;  %1111 = vmatpush.msrb.mxu0 %v3921_v63  ;;  %v3927_v53 = vld [vmem:[%s4853_s1 + $0x520] sm:$0xff] }
 0x199   : > { %5424 = vst [vmem:[#allocation40_spill] sm:$0xff] %v3909_v34  ;;  %1131 = vmatpush.msrb.mxu1 %v3927_v53  ;;  %v3933_v34 = vld [vmem:[%s4853_s1 + $0x228] sm:$0xff] }
 0x19a   : > { %5425 = vst [vmem:[#allocation41_spill] sm:$0xff] %v3915_v35  ;;  %1151 = vmatpush.msrb.mxu2 %v3933_v34  ;;  %v3939_v35 = vld [vmem:[%s4853_s1 + $0x528] sm:$0xff] }
 0x19b   : > { %5426 = vst [vmem:[#allocation50_spill] sm:$0xff] %v3921_v63  ;;  %1171 = vmatpush.msrb.mxu3 %v3939_v35  ;;  %v3945_v63 = vld [vmem:[%s4853_s1 + $0x1f0] sm:$0xff] }
 0x19c   : > { %5427 = vst [vmem:[#allocation51_spill] sm:$0xff] %v3927_v53  ;;  %1112 = vmatpush.msrb.mxu0 %v3945_v63  ;;  %v3951_v53 = vld [vmem:[%s4853_s1 + $0x4f0] sm:$0xff] }
 0x19d   : > { %5428 = vst [vmem:[#allocation44_spill] sm:$0xff] %v3933_v34  ;;  %1132 = vmatpush.msrb.mxu1 %v3951_v53  ;;  %v3957_v34 = vld [vmem:[%s4853_s1 + $0x1f8] sm:$0xff] }
 0x19e   : > { %5429 = vst [vmem:[#allocation45_spill] sm:$0xff] %v3939_v35  ;;  %1152 = vmatpush.msrb.mxu2 %v3957_v34  ;;  %v3963_v35 = vld [vmem:[%s4853_s1 + $0x4f8] sm:$0xff] }
 0x19f   : > { %5430 = vst [vmem:[#allocation54_spill] sm:$0xff] %v3945_v63  ;;  %1172 = vmatpush.msrb.mxu3 %v3963_v35  ;;  %v3969_v63 = vld [vmem:[%s4853_s1 + $0x1c0] sm:$0xff] }
 0x1a0   : > { %5431 = vst [vmem:[#allocation55_spill] sm:$0xff] %v3951_v53  ;;  %1113 = vmatpush.msrb.mxu0 %v3969_v63  ;;  %v3975_v53 = vld [vmem:[%s4853_s1 + $0x4c0] sm:$0xff] }
 0x1a1   : > { %5432 = vst [vmem:[#allocation48_spill] sm:$0xff] %v3957_v34  ;;  %1133 = vmatpush.msrb.mxu1 %v3975_v53  ;;  %v3981_v34 = vld [vmem:[%s4853_s1 + $0x1c8] sm:$0xff] }
 0x1a2   : > { %5433 = vst [vmem:[#allocation49_spill] sm:$0xff] %v3963_v35  ;;  %1153 = vmatpush.msrb.mxu2 %v3981_v34  ;;  %v3987_v35 = vld [vmem:[%s4853_s1 + $0x4c8] sm:$0xff] }
 0x1a3   : > { %5434 = vst [vmem:[#allocation58_spill] sm:$0xff] %v3969_v63  ;;  %1173 = vmatpush.msrb.mxu3 %v3987_v35  ;;  %v3993_v63 = vld [vmem:[%s4853_s1 + $0x190] sm:$0xff] }
 0x1a4   : > { %5435 = vst [vmem:[#allocation59_spill] sm:$0xff] %v3975_v53  ;;  %1114 = vmatpush.msrb.mxu0 %v3993_v63  ;;  %v3999_v53 = vld [vmem:[%s4853_s1 + $0x490] sm:$0xff] }
 0x1a5   : > { %5436 = vst [vmem:[#allocation52_spill] sm:$0xff] %v3981_v34  ;;  %1134 = vmatpush.msrb.mxu1 %v3999_v53  ;;  %v4005_v34 = vld [vmem:[%s4853_s1 + $0x198] sm:$0xff] }
 0x1a6   : > { %5437 = vst [vmem:[#allocation53_spill] sm:$0xff] %v3987_v35  ;;  %1154 = vmatpush.msrb.mxu2 %v4005_v34  ;;  %v4011_v35 = vld [vmem:[%s4853_s1 + $0x498] sm:$0xff] }
 0x1a7   : > { %5438 = vst [vmem:[#allocation62_spill] sm:$0xff] %v3993_v63  ;;  %1174 = vmatpush.msrb.mxu3 %v4011_v35  ;;  %v4017_v63 = vld [vmem:[%s4853_s1 + $0x160] sm:$0xff] }
 0x1a8   : > { %5439 = vst [vmem:[#allocation63_spill] sm:$0xff] %v3999_v53  ;;  %1115 = vmatpush.msrb.mxu0 %v4017_v63  ;;  %v4023_v53 = vld [vmem:[%s4853_s1 + $0x460] sm:$0xff] }
 0x1a9   : > { %5440 = vst [vmem:[#allocation56_spill] sm:$0xff] %v4005_v34  ;;  %1135 = vmatpush.msrb.mxu1 %v4023_v53  ;;  %v4029_v34 = vld [vmem:[%s4853_s1 + $0x168] sm:$0xff] }
 0x1aa   : > { %5441 = vst [vmem:[#allocation57_spill] sm:$0xff] %v4011_v35  ;;  %1155 = vmatpush.msrb.mxu2 %v4029_v34  ;;  %v4035_v35 = vld [vmem:[%s4853_s1 + $0x468] sm:$0xff] }
 0x1ab   : > { %5442 = vst [vmem:[#allocation66_spill] sm:$0xff] %v4017_v63  ;;  %1175 = vmatpush.msrb.mxu3 %v4035_v35  ;;  %v4041_v63 = vld [vmem:[%s4853_s1 + $0x130] sm:$0xff] }
 0x1ac   : > { %5443 = vst [vmem:[#allocation67_spill] sm:$0xff] %v4023_v53  ;;  %1116 = vmatpush.msrb.mxu0 %v4041_v63  ;;  %v4047_v53 = vld [vmem:[%s4853_s1 + $0x430] sm:$0xff] }
 0x1ad   : > { %5444 = vst [vmem:[#allocation60_spill] sm:$0xff] %v4029_v34  ;;  %1136 = vmatpush.msrb.mxu1 %v4047_v53  ;;  %v4053_v34 = vld [vmem:[%s4853_s1 + $0x138] sm:$0xff] }
 0x1ae   : > { %5445 = vst [vmem:[#allocation61_spill] sm:$0xff] %v4035_v35  ;;  %1156 = vmatpush.msrb.mxu2 %v4053_v34  ;;  %v4059_v35 = vld [vmem:[%s4853_s1 + $0x438] sm:$0xff] }
 0x1af   : > { %5446 = vst [vmem:[#allocation72_spill] sm:$0xff] %v4041_v63  ;;  %1176 = vmatpush.msrb.mxu3 %v4059_v35  ;;  %v4065_v63 = vld [vmem:[%s4853_s1 + $0x100] sm:$0xff] }
 0x1b0   : > { %5447 = vst [vmem:[#allocation73_spill] sm:$0xff] %v4047_v53  ;;  %1117 = vmatpush.msrb.mxu0 %v4065_v63  ;;  %v4071_v53 = vld [vmem:[%s4853_s1 + $0x400] sm:$0xff] }
 0x1b1   : > { %5448 = vst [vmem:[#allocation64_spill] sm:$0xff] %v4053_v34  ;;  %1137 = vmatpush.msrb.mxu1 %v4071_v53  ;;  %v4077_v34 = vld [vmem:[%s4853_s1 + $0x108] sm:$0xff] }
 0x1b2   : > { %5449 = vst [vmem:[#allocation65_spill] sm:$0xff] %v4059_v35  ;;  %1157 = vmatpush.msrb.mxu2 %v4077_v34  ;;  %v4083_v35 = vld [vmem:[%s4853_s1 + $0x408] sm:$0xff] }
 0x1b3   : > { %5450 = vst [vmem:[#allocation76_spill] sm:$0xff] %v4065_v63  ;;  %1177 = vmatpush.msrb.mxu3 %v4083_v35  ;;  %v4089_v63 = vld [vmem:[%s4853_s1 + $0xd0] sm:$0xff] }
 0x1b4   : > { %5451 = vst [vmem:[#allocation77_spill] sm:$0xff] %v4071_v53  ;;  %1118 = vmatpush.msrb.mxu0 %v4089_v63  ;;  %v4095_v53 = vld [vmem:[%s4853_s1 + $0x3d0] sm:$0xff] }
 0x1b5   : > { %5452 = vst [vmem:[#allocation68_spill] sm:$0xff] %v4077_v34  ;;  %1138 = vmatpush.msrb.mxu1 %v4095_v53  ;;  %v4101_v34 = vld [vmem:[%s4853_s1 + $0xd8] sm:$0xff] }
 0x1b6   : > { %5453 = vst [vmem:[#allocation69_spill] sm:$0xff] %v4083_v35  ;;  %1158 = vmatpush.msrb.mxu2 %v4101_v34  ;;  %v4107_v35 = vld [vmem:[%s4853_s1 + $0x3d8] sm:$0xff] }
 0x1b7   : > { %5454 = vst [vmem:[#allocation80_spill] sm:$0xff] %v4089_v63  ;;  %1178 = vmatpush.msrb.mxu3 %v4107_v35  ;;  %v4113_v63 = vld [vmem:[%s4853_s1 + $0xa0] sm:$0xff] }
 0x1b8   : > { %5455 = vst [vmem:[#allocation81_spill] sm:$0xff] %v4095_v53  ;;  %1119 = vmatpush.msrb.mxu0 %v4113_v63  ;;  %v4119_v53 = vld [vmem:[%s4853_s1 + $0x3a0] sm:$0xff] }
 0x1b9   : > { %5456 = vst [vmem:[#allocation84_spill] sm:$0xff] %v4101_v34  ;;  %1139 = vmatpush.msrb.mxu1 %v4119_v53  ;;  %v4125_v34 = vld [vmem:[%s4853_s1 + $0xa8] sm:$0xff] }
 0x1ba   : > { %5457 = vst [vmem:[#allocation85_spill] sm:$0xff] %v4107_v35  ;;  %1159 = vmatpush.msrb.mxu2 %v4125_v34  ;;  %v4131_v35 = vld [vmem:[%s4853_s1 + $0x3a8] sm:$0xff] }
 0x1bb   : > { %5458 = vst [vmem:[#allocation13_spill] sm:$0xff] %v4113_v63  ;;  %1179 = vmatpush.msrb.mxu3 %v4131_v35  ;;  %v4137_v63 = vld [vmem:[%s4853_s1 + $0x70] sm:$0xff] }
 0x1bc   : > { %5459 = vst [vmem:[#allocation86_spill] sm:$0xff] %v4119_v53  ;;  %1120 = vmatpush.msrb.mxu0 %v4137_v63  ;;  %v4143_v53 = vld [vmem:[%s4853_s1 + $0x370] sm:$0xff] }
 0x1bd   : > { %5460 = vst [vmem:[#allocation87_spill] sm:$0xff] %v4125_v34  ;;  %1140 = vmatpush.msrb.mxu1 %v4143_v53  ;;  %v4149_v34 = vld [vmem:[%s4853_s1 + $0x78] sm:$0xff] }
 0x1be   : > { %5461 = vst [vmem:[#allocation70_spill] sm:$0xff] %v4131_v35  ;;  %1160 = vmatpush.msrb.mxu2 %v4149_v34  ;;  %v4155_v35 = vld [vmem:[%s4853_s1 + $0x378] sm:$0xff] }
 0x1bf   : > { %5462 = vst [vmem:[#allocation71_spill] sm:$0xff] %v4137_v63  ;;  %1180 = vmatpush.msrb.mxu3 %v4155_v35  ;;  %v4161_v63 = vld [vmem:[%s4853_s1 + $0x40] sm:$0xff] }
 0x1c0   : > { %5463 = vst [vmem:[#allocation90_spill] sm:$0xff] %v4143_v53  ;;  %1121 = vmatpush.msrb.mxu0 %v4161_v63  ;;  %v4167_v53 = vld [vmem:[%s4853_s1 + $0x340] sm:$0xff] }
 0x1c1   : > { %5464 = vst [vmem:[#allocation91_spill] sm:$0xff] %v4149_v34  ;;  %1141 = vmatpush.msrb.mxu1 %v4167_v53  ;;  %v4173_v34 = vld [vmem:[%s4853_s1 + $0x48] sm:$0xff] }
 0x1c2   : > { %5465 = vst [vmem:[#allocation74_spill] sm:$0xff] %v4155_v35  ;;  %1161 = vmatpush.msrb.mxu2 %v4173_v34  ;;  %v4179_v35 = vld [vmem:[%s4853_s1 + $0x348] sm:$0xff]  ;;  %v746_v54 = vpop.f32.mrf.mxu1 }
 0x1c3   : > { %5466 = vst [vmem:[#allocation75_spill] sm:$0xff] %v4161_v63  ;;  %1181 = vmatpush.msrb.mxu3 %v4179_v35  ;;  %v4185_v63 = vld [vmem:[%s4853_s1 + $0x10] sm:$0xff] }
 0x1c4   : > { %5467 = vst [vmem:[#allocation94_spill] sm:$0xff] %v4167_v53  ;;  %1122 = vmatpush.msrb.mxu0 %v4185_v63  ;;  %v4191_v53 = vld [vmem:[%s4853_s1 + $0x310] sm:$0xff] }
 0x1c5   : > { %5468 = vst [vmem:[#allocation95_spill] sm:$0xff] %v4173_v34  ;;  %1142 = vmatpush.msrb.mxu1 %v4191_v53  ;;  %v4197_v34 = vld [vmem:[%s4853_s1 + $0x18] sm:$0xff] }
 0x1c6   : > { %5469 = vst [vmem:[#allocation78_spill] sm:$0xff] %v4179_v35  ;;  %1162 = vmatpush.msrb.mxu2 %v4197_v34  ;;  %v4203_v35 = vld [vmem:[%s4853_s1 + $0x318] sm:$0xff] }
 0x1c7   : > { %5470 = vst [vmem:[#allocation79_spill] sm:$0xff] %v4185_v63  ;;  %1182 = vmatpush.msrb.mxu3 %v4203_v35  ;;  %v726_v63 = vpop.f32.mrf.mxu0 }
 0x1c8   : > { %5471 = vst [vmem:[#allocation98_spill] sm:$0xff] %v4191_v53  ;;  %v747_v53 = vadd.f32 %v746_v54, %v726_v63 }
 0x1c9   : > { %5472 = vst [vmem:[#allocation99_spill] sm:$0xff] %v4197_v34  ;;  %v766_v30 = vpop.f32.mrf.mxu2  ;;  %v786_v29 = vpop.f32.mrf.mxu3 }
 0x1ca   : > { %5473 = vst [vmem:[#allocation82_spill] sm:$0xff] %v4203_v35  ;;  %v787_v28 = vadd.f32 %v786_v29, %v766_v30 }
 0x1cc   : > { %v951_v26 = vrot.slane %v787_v28, 6  ;;  %v826_v22 = vpop.f32.mrf.mxu1 }
 0x1ce   : > { %v952_v25 = vsel %vm629_vm0, %v747_v53, %v951_v26 }
 0x1cf   : > { %v954_v24 = vadd.f32 %v1726_v27, %v952_v25  ;;  %v806_v34 = vpop.f32.mrf.mxu0 }
 0x1d0   : > { %v827_v35 = vadd.f32 %v826_v22, %v806_v34 }
 0x1d1   : > { %v1728_v23 = vmul.f32 -1.442695, %v954_v24 }
 0x1d3   : > { %1764 = vpow2.f32 %v1728_v23  ;;  %v846_v21 = vpop.f32.mrf.mxu2  ;;  %v866_v20 = vpop.f32.mrf.mxu3 }
 0x1d4   : > { %v867_v19 = vadd.f32 %v866_v20, %v846_v21 }
 0x1d6   : > { %v979_v17 = vrot.slane %v867_v19, 6 }
 0x1d8   : > { %v980_v16 = vsel %vm629_vm0, %v827_v35, %v979_v17 }
 0x1d9   : > { %v1765_v15 = vpop.eup %1764  ;;  %v982_v29 = vadd.f32 %v980_v16, %v975_v18 }
 0x1da   : > { %v958_v30 = vadd.f32 1.0, %v1765_v15 }
 0x1db   : > { %v1729_v54 = vmul.f32 -1.442695, %v982_v29 }
 0x1dc   : > { %1766 = vrcp.f32 %v958_v30  ;;  %v970_v18 = vand.u32 2147483648, %v958_v30  ;;  %vm964_vm10 = vweird.f32 %v958_v30  ;;  %v968_v35 = vand.u32 2147483647, %v958_v30 }
 0x1dd   : > { %1768 = vpow2.f32 %v1729_v54 }
 0x1de   : > { %vm969_vm12 = vcmp.eq.f32.partialorder %v968_v35, 8.507059e+37 }
 0x1e2   : > { %v1767_v26 = vpop.eup %1766 }
 0x1e3   : > { %v1769_v25 = vpop.eup %1768  ;;  %v960_v24 = vmul.f32 %v1767_v26, %v958_v30  ;;  %vm965_vm9 = vweird.f32 %v1767_v26 }
 0x1e4   : > { %v986_v28 = vadd.f32 1.0, %v1769_v25  ;;  %vm966_vm11 = vmor %vm964_vm10, %vm965_vm9 }
 0x1e5   : > { %v961_v53 = vsub.f32 1.0, %v960_v24 }
 0x1e6   : > { %1770 = vrcp.f32 %v986_v28  ;;  %v886_v63 = vpop.f32.mrf.mxu0  ;;  %v906_v20 = vpop.f32.mrf.mxu1  ;;  %vm992_vm14 = vweird.f32 %v986_v28  ;;  %v996_v30 = vand.u32 2147483647, %v986_v28 }
 0x1e7   : > { %v962_v23 = vmul.f32 %v1767_v26, %v961_v53  ;;  %v907_v16 = vadd.f32 %v906_v20, %v886_v63  ;;  %v971_v53 = vor.u32 1.1754944e-38, %v970_v18 }
 0x1e8   : > { %vm997_vm1 = vcmp.eq.f32.partialorder %v996_v30, 8.507059e+37  ;;  %v4302_v30 = vld [vmem:[%s4853_s1 + $0x260] sm:$0xff] }
 0x1e9   : > { %v963_v17 = vadd.f32 %v1767_v26, %v962_v23  ;;  %v1002_v24 = vadd.f32 %v907_v16, %v3344_v5  ;;  %v1727_v23 = vld [vmem:[%s2031_s22 + $0x14] sm:$0xf] }
 0x1eb   : > { %v967_v25 = vsel %vm966_vm11, %v1767_v26, %v963_v17 }
 0x1ec   : > { %v1771_v21 = vpop.eup %1770  ;;  %v972_v63 = vsel %vm969_vm12, %v971_v53, %v967_v25  ;;  %v4254_v25 = vld [vmem:[%s4853_s1 + $0x2c0] sm:$0xff]  ;;  %v4266_v53 = vld [vmem:[%s4853_s1 + $0x2c8] sm:$0xff] }
 0x1ed   : > { %v988_v22 = vmul.f32 %v1771_v21, %v986_v28  ;;  %v926_v19 = vpop.f32.mrf.mxu2  ;;  %v946_v27 = vpop.f32.mrf.mxu3  ;;  %vm993_vm13 = vweird.f32 %v1771_v21 }
 0x1ee   : > { %v947_v15 = vadd.f32 %v946_v27, %v926_v19  ;;  %v998_v19 = vand.u32 2147483648, %v986_v28  ;;  %vm994_vm15 = vmor %vm992_vm14, %vm993_vm13 }
 0x1ef   : > { %v989_v34 = vsub.f32 1.0, %v988_v22 }
 0x1f0   : > { %v1003_v29 = vadd.f32 %v947_v15, %v3338_v55  ;;  %v999_v26 = vor.u32 1.1754944e-38, %v998_v19  ;;  %v4290_v19 = vld [vmem:[%s4853_s1 + $0x298] sm:$0xff] }
 0x1f1   : > { %v990_v54 = vmul.f32 %v1771_v21, %v989_v34 }
 0x1f2   : > { %v1006_v14 = vrot.slane %v1003_v29, 6 }
 0x1f3   : > { %v991_v13 = vadd.f32 %v1771_v21, %v990_v54  ;;  %v4248_v54 = vld [vmem:[%s4853_s1 + $0x5f8] sm:$0xff] }
 0x1f4   : > { %v1007_v20 = vsel %vm629_vm0, %v1002_v24, %v1006_v14  ;;  %v4260_v24 = vld [vmem:[%s4853_s1 + $0x5c0] sm:$0xff] }
 0x1f5   : > { %v1009_v22 = vmul.f32 %v1007_v20, %v972_v63  ;;  %v995_v15 = vsel %vm994_vm15, %v1771_v21, %v991_v13  ;;  %v4236_v13 = vld [vmem:[%s4853_s1 + $0x5f0] sm:$0xff]  ;;  %v4242_v21 = vld [vmem:[%s4853_s1 + $0x2f8] sm:$0xff] }
 0x1f6   : > { %v1000_v17 = vsel %vm997_vm1, %v999_v26, %v995_v15  ;;  %v4278_v63 = vld [vmem:[%s4853_s1 + $0x290] sm:$0xff]  ;;  %v4314_v15 = vld [vmem:[%s4853_s1 + $0x268] sm:$0xff] }
 0x1f7   : > { %v1010_v27 = vadd.f32 %v1727_v23, %v1009_v22  ;;  %v1012_v16 = vsub.f32 1.0, %v1000_v17  ;;  %v1014_v35 = vmul.f32 %v1000_v17, %v3353_v31  ;;  %v4230_v31 = vld [vmem:[%s4853_s1 + $0x2f0] sm:$0xff]  ;;  %v4272_v23 = vld [vmem:[%s4853_s1 + $0x5c8] sm:$0xff]  ;;  %v4296_v22 = vld [vmem:[%s4853_s1 + $0x598] sm:$0xff] }
 0x1f8   : > { %v4284_v20 = vld [vmem:[%s4853_s1 + $0x590] sm:$0xff]  ;;  %v4320_v26 = vld [vmem:[%s4853_s1 + $0x568] sm:$0xff] }
 0x1f9   : > { %1772 = vtanh.f32 %v1010_v27  ;;  %v4308_v27 = vld [vmem:[%s4853_s1 + $0x560] sm:$0xff]  ;;  %v4330_v17 = vld [vmem:[%s4853_s1 + $0x230] sm:$0xff] }
 0x1ff   : > { %v1773_v18 = vpop.eup %1772 }
 0x200   : > { %v1013_v34 = vmul.f32 %v1773_v18, %v1012_v16  ;;  %v4336_v16 = vld [vmem:[%s4853_s1 + $0x530] sm:$0xff]  ;;  %v4342_v18 = vld [vmem:[%s4853_s1 + $0x238] sm:$0xff] }
 0x201   : > { %5474 = vst [vmem:[#allocation83_spill] sm:$0xff] %v4336_v16 }
 0x202   : > { %v4214_v29 = vadd.f32 %v1014_v35, %v1013_v34  ;;  %5475 = vst [vmem:[#allocation102_spill] sm:$0xff] %v4342_v18  ;;  %v4348_v34 = vld [vmem:[%s4853_s1 + $0x538] sm:$0xff]  ;;  %v4354_v35 = vld [vmem:[%s4853_s1 + $0x200] sm:$0xff] }
 0x203   : > { %5476 = vst [vmem:[#allocation103_spill] sm:$0xff] %v4348_v34 }
 0x204   : > { %1022 = vst [vmem:[#allocation1] ss:$4 sm:$0xff] %v4214_v29 }
 0x205   : > { %1730 = vst [vmem:[%s2026_s19 + $0x4] sm:$0xf] %v4214_v29 }
 0x206   : > { %5477 = vst [vmem:[#allocation88_spill] sm:$0xff] %v4354_v35 }
 0x20b   : > { %v4219_v14 = vld.sshfl [vmem:[#allocation1] sm:$0xff pattern:$0x73625140]  ;;  %v4221_v28 = vld.sshfl [vmem:[#allocation1 + $0x8] sm:$0xff pattern:$0x73625140] }
 0x20c   : > { %1043 = vmatmul.f32.vlgmr.msra.gmra.mxu0 %v4219_v14  ;;  %1063 = vmatmul.f32.vlgmr.msra.gmra.mxu1 %v4221_v28 }
 0x20d   : > { %1083 = vmatmul.f32.vlgmr.msra.gmra.mxu2 %v4219_v14  ;;  %1103 = vmatmul.f32.vlgmr.msra.gmra.mxu3 %v4221_v28 }
 0x20e   : > { %1187 = vmatpush.msra.mxu0 %v4230_v31  ;;  %1207 = vmatpush.msra.mxu1 %v4236_v13 }
 0x20f   : > { %1227 = vmatpush.msra.mxu2 %v4242_v21  ;;  %1247 = vmatpush.msra.mxu3 %v4248_v54 }
 0x210   : > { %1188 = vmatpush.msra.mxu0 %v4254_v25  ;;  %1208 = vmatpush.msra.mxu1 %v4260_v24 }
 0x211   : > { %1228 = vmatpush.msra.mxu2 %v4266_v53  ;;  %1248 = vmatpush.msra.mxu3 %v4272_v23 }
 0x212   : > { %1189 = vmatpush.msra.mxu0 %v4278_v63  ;;  %1209 = vmatpush.msra.mxu1 %v4284_v20 }
 0x213   : > { %1229 = vmatpush.msra.mxu2 %v4290_v19  ;;  %1249 = vmatpush.msra.mxu3 %v4296_v22 }
 0x214   : > { %1190 = vmatpush.msra.mxu0 %v4302_v30  ;;  %1210 = vmatpush.msra.mxu1 %v4308_v27 }
 0x215   : > { %1230 = vmatpush.msra.mxu2 %v4314_v15  ;;  %1250 = vmatpush.msra.mxu3 %v4320_v26 }
 0x216   : > { %1123 = vmatmul.f32.vlgmr.msrb.gmra.mxu0 %v4219_v14  ;;  %1143 = vmatmul.f32.vlgmr.msrb.gmra.mxu1 %v4221_v28 }
 0x217   : > { %1163 = vmatmul.f32.vlgmr.msrb.gmra.mxu2 %v4219_v14  ;;  %1183 = vmatmul.f32.vlgmr.msrb.gmra.mxu3 %v4221_v28 }
 0x218   : > { %1191 = vmatpush.msra.mxu0 %v4330_v17  ;;  %1211 = vmatpush.msra.mxu1 %v4336_v16  ;;  %v4360_v16 = vld [vmem:[%s4853_s1 + $0x500] sm:$0xff] }
 0x219   : > { %1231 = vmatpush.msra.mxu2 %v4342_v18  ;;  %1251 = vmatpush.msra.mxu3 %v4348_v34  ;;  %5478 = vst [vmem:[#allocation89_spill] sm:$0xff] %v4360_v16  ;;  %v4366_v18 = vld [vmem:[%s4853_s1 + $0x208] sm:$0xff] }
 0x21a   : > { %1192 = vmatpush.msra.mxu0 %v4354_v35  ;;  %1212 = vmatpush.msra.mxu1 %v4360_v16  ;;  %5479 = vst [vmem:[#allocation106_spill] sm:$0xff] %v4366_v18  ;;  %v4372_v34 = vld [vmem:[%s4853_s1 + $0x508] sm:$0xff]  ;;  %v4378_v35 = vld [vmem:[%s4853_s1 + $0x1d0] sm:$0xff] }
 0x21b   : > { %1232 = vmatpush.msra.mxu2 %v4366_v18  ;;  %5480 = vst [vmem:[#allocation107_spill] sm:$0xff] %v4372_v34  ;;  %1252 = vmatpush.msra.mxu3 %v4372_v34  ;;  %v4384_v16 = vld [vmem:[%s4853_s1 + $0x4d0] sm:$0xff]  ;;  %v4390_v18 = vld [vmem:[%s4853_s1 + $0x1d8] sm:$0xff] }
 0x21c   : > { %5481 = vst [vmem:[#allocation92_spill] sm:$0xff] %v4378_v35  ;;  %1193 = vmatpush.msra.mxu0 %v4378_v35  ;;  %1213 = vmatpush.msra.mxu1 %v4384_v16  ;;  %v4396_v34 = vld [vmem:[%s4853_s1 + $0x4d8] sm:$0xff]  ;;  %v4402_v35 = vld [vmem:[%s4853_s1 + $0x1a0] sm:$0xff] }
 0x21d   : > { %5482 = vst [vmem:[#allocation93_spill] sm:$0xff] %v4384_v16  ;;  %1233 = vmatpush.msra.mxu2 %v4390_v18  ;;  %1253 = vmatpush.msra.mxu3 %v4396_v34  ;;  %v4408_v16 = vld [vmem:[%s4853_s1 + $0x4a0] sm:$0xff] }
 0x21e   : > { %5483 = vst [vmem:[#allocation110_spill] sm:$0xff] %v4390_v18  ;;  %1194 = vmatpush.msra.mxu0 %v4402_v35  ;;  %1214 = vmatpush.msra.mxu1 %v4408_v16  ;;  %v4414_v18 = vld [vmem:[%s4853_s1 + $0x1a8] sm:$0xff] }
 0x21f   : > { %5484 = vst [vmem:[#allocation111_spill] sm:$0xff] %v4396_v34  ;;  %1234 = vmatpush.msra.mxu2 %v4414_v18  ;;  %v4420_v34 = vld [vmem:[%s4853_s1 + $0x4a8] sm:$0xff] }
 0x220   : > { %5485 = vst [vmem:[#allocation96_spill] sm:$0xff] %v4402_v35  ;;  %1254 = vmatpush.msra.mxu3 %v4420_v34  ;;  %v4426_v35 = vld [vmem:[%s4853_s1 + $0x170] sm:$0xff] }
 0x221   : > { %5486 = vst [vmem:[#allocation97_spill] sm:$0xff] %v4408_v16  ;;  %1195 = vmatpush.msra.mxu0 %v4426_v35  ;;  %v4432_v16 = vld [vmem:[%s4853_s1 + $0x470] sm:$0xff] }
 0x222   : > { %5487 = vst [vmem:[#allocation114_spill] sm:$0xff] %v4414_v18  ;;  %1215 = vmatpush.msra.mxu1 %v4432_v16  ;;  %v4438_v18 = vld [vmem:[%s4853_s1 + $0x178] sm:$0xff] }
 0x223   : > { %5488 = vst [vmem:[#allocation115_spill] sm:$0xff] %v4420_v34  ;;  %1235 = vmatpush.msra.mxu2 %v4438_v18  ;;  %v4444_v34 = vld [vmem:[%s4853_s1 + $0x478] sm:$0xff] }
 0x224   : > { %5489 = vst [vmem:[#allocation100_spill] sm:$0xff] %v4426_v35  ;;  %1255 = vmatpush.msra.mxu3 %v4444_v34  ;;  %v4450_v35 = vld [vmem:[%s4853_s1 + $0x140] sm:$0xff] }
 0x225   : > { %5490 = vst [vmem:[#allocation101_spill] sm:$0xff] %v4432_v16  ;;  %1196 = vmatpush.msra.mxu0 %v4450_v35  ;;  %v4456_v16 = vld [vmem:[%s4853_s1 + $0x440] sm:$0xff] }
 0x226   : > { %5491 = vst [vmem:[#allocation118_spill] sm:$0xff] %v4438_v18  ;;  %1216 = vmatpush.msra.mxu1 %v4456_v16  ;;  %v4462_v18 = vld [vmem:[%s4853_s1 + $0x148] sm:$0xff] }
 0x227   : > { %5492 = vst [vmem:[#allocation119_spill] sm:$0xff] %v4444_v34  ;;  %1236 = vmatpush.msra.mxu2 %v4462_v18  ;;  %v4468_v34 = vld [vmem:[%s4853_s1 + $0x448] sm:$0xff] }
 0x228   : > { %5493 = vst [vmem:[#allocation104_spill] sm:$0xff] %v4450_v35  ;;  %1256 = vmatpush.msra.mxu3 %v4468_v34  ;;  %v4474_v35 = vld [vmem:[%s4853_s1 + $0x110] sm:$0xff] }
 0x229   : > { %5494 = vst [vmem:[#allocation105_spill] sm:$0xff] %v4456_v16  ;;  %1197 = vmatpush.msra.mxu0 %v4474_v35  ;;  %v4480_v16 = vld [vmem:[%s4853_s1 + $0x410] sm:$0xff] }
 0x22a   : > { %5495 = vst [vmem:[#allocation122_spill] sm:$0xff] %v4462_v18  ;;  %1217 = vmatpush.msra.mxu1 %v4480_v16  ;;  %v4486_v18 = vld [vmem:[%s4853_s1 + $0x118] sm:$0xff] }
 0x22b   : > { %5496 = vst [vmem:[#allocation123_spill] sm:$0xff] %v4468_v34  ;;  %1237 = vmatpush.msra.mxu2 %v4486_v18  ;;  %v4492_v34 = vld [vmem:[%s4853_s1 + $0x418] sm:$0xff] }
 0x22c   : > { %5497 = vst [vmem:[#allocation108_spill] sm:$0xff] %v4474_v35  ;;  %1257 = vmatpush.msra.mxu3 %v4492_v34  ;;  %v4498_v35 = vld [vmem:[%s4853_s1 + $0xe0] sm:$0xff] }
 0x22d   : > { %5498 = vst [vmem:[#allocation109_spill] sm:$0xff] %v4480_v16  ;;  %1198 = vmatpush.msra.mxu0 %v4498_v35  ;;  %v4504_v16 = vld [vmem:[%s4853_s1 + $0x3e0] sm:$0xff] }
 0x22e   : > { %5499 = vst [vmem:[#allocation126_spill] sm:$0xff] %v4486_v18  ;;  %1218 = vmatpush.msra.mxu1 %v4504_v16  ;;  %v4510_v18 = vld [vmem:[%s4853_s1 + $0xe8] sm:$0xff] }
 0x22f   : > { %5500 = vst [vmem:[#allocation127_spill] sm:$0xff] %v4492_v34  ;;  %1238 = vmatpush.msra.mxu2 %v4510_v18  ;;  %v4516_v34 = vld [vmem:[%s4853_s1 + $0x3e8] sm:$0xff] }
 0x230   : > { %5501 = vst [vmem:[#allocation112_spill] sm:$0xff] %v4498_v35  ;;  %1258 = vmatpush.msra.mxu3 %v4516_v34  ;;  %v4522_v35 = vld [vmem:[%s4853_s1 + $0xb0] sm:$0xff] }
 0x231   : > { %5502 = vst [vmem:[#allocation113_spill] sm:$0xff] %v4504_v16  ;;  %1199 = vmatpush.msra.mxu0 %v4522_v35  ;;  %v4528_v16 = vld [vmem:[%s4853_s1 + $0x3b0] sm:$0xff] }
 0x232   : > { %5503 = vst [vmem:[#allocation116_spill] sm:$0xff] %v4510_v18  ;;  %1219 = vmatpush.msra.mxu1 %v4528_v16  ;;  %v4534_v18 = vld [vmem:[%s4853_s1 + $0xb8] sm:$0xff] }
 0x233   : > { %5504 = vst [vmem:[#allocation117_spill] sm:$0xff] %v4516_v34  ;;  %1239 = vmatpush.msra.mxu2 %v4534_v18  ;;  %v4540_v34 = vld [vmem:[%s4853_s1 + $0x3b8] sm:$0xff] }
 0x234   : > { %5505 = vst [vmem:[#allocation132_spill] sm:$0xff] %v4522_v35  ;;  %1259 = vmatpush.msra.mxu3 %v4540_v34  ;;  %v4546_v35 = vld [vmem:[%s4853_s1 + $0x80] sm:$0xff] }
 0x235   : > { %5506 = vst [vmem:[#allocation133_spill] sm:$0xff] %v4528_v16  ;;  %1200 = vmatpush.msra.mxu0 %v4546_v35  ;;  %v4552_v16 = vld [vmem:[%s4853_s1 + $0x380] sm:$0xff] }
 0x236   : > { %5507 = vst [vmem:[#allocation120_spill] sm:$0xff] %v4534_v18  ;;  %1220 = vmatpush.msra.mxu1 %v4552_v16  ;;  %v4558_v18 = vld [vmem:[%s4853_s1 + $0x88] sm:$0xff] }
 0x237   : > { %5508 = vst [vmem:[#allocation121_spill] sm:$0xff] %v4540_v34  ;;  %1240 = vmatpush.msra.mxu2 %v4558_v18  ;;  %v4564_v34 = vld [vmem:[%s4853_s1 + $0x388] sm:$0xff] }
 0x238   : > { %5509 = vst [vmem:[#allocation124_spill] sm:$0xff] %v4546_v35  ;;  %1260 = vmatpush.msra.mxu3 %v4564_v34  ;;  %v4570_v35 = vld [vmem:[%s4853_s1 + $0x50] sm:$0xff] }
 0x239   : > { %5510 = vst [vmem:[#allocation125_spill] sm:$0xff] %v4552_v16  ;;  %1201 = vmatpush.msra.mxu0 %v4570_v35  ;;  %v4576_v16 = vld [vmem:[%s4853_s1 + $0x350] sm:$0xff] }
 0x23a   : > { %5511 = vst [vmem:[#allocation128_spill] sm:$0xff] %v4558_v18  ;;  %1221 = vmatpush.msra.mxu1 %v4576_v16  ;;  %v4582_v18 = vld [vmem:[%s4853_s1 + $0x58] sm:$0xff] }
 0x23b   : > { %5512 = vst [vmem:[#allocation129_spill] sm:$0xff] %v4564_v34  ;;  %1241 = vmatpush.msra.mxu2 %v4582_v18  ;;  %v4588_v34 = vld [vmem:[%s4853_s1 + $0x358] sm:$0xff] }
 0x23c   : > { %5513 = vst [vmem:[#allocation130_spill] sm:$0xff] %v4570_v35  ;;  %1261 = vmatpush.msra.mxu3 %v4588_v34  ;;  %v4594_v35 = vld [vmem:[%s4853_s1 + $0x20] sm:$0xff] }
 0x23d   : > { %5514 = vst [vmem:[#allocation131_spill] sm:$0xff] %v4576_v16  ;;  %1202 = vmatpush.msra.mxu0 %v4594_v35  ;;  %v4600_v16 = vld [vmem:[%s4853_s1 + $0x320] sm:$0xff] }
 0x23e   : > { %5515 = vst [vmem:[#allocation134_spill] sm:$0xff] %v4582_v18  ;;  %1222 = vmatpush.msra.mxu1 %v4600_v16  ;;  %v4606_v18 = vld [vmem:[%s4853_s1 + $0x28] sm:$0xff]  ;;  %1203 = vmatmul.f32.vlgmr.msra.gmra.mxu0 %v4219_v14 }
 0x23f   : > { %5516 = vst [vmem:[#allocation135_spill] sm:$0xff] %v4588_v34  ;;  %1242 = vmatpush.msra.mxu2 %v4606_v18  ;;  %v4612_v34 = vld [vmem:[%s4853_s1 + $0x328] sm:$0xff]  ;;  %1223 = vmatmul.f32.vlgmr.msra.gmra.mxu1 %v4221_v28 }
 0x240   : > { %1262 = vmatpush.msra.mxu3 %v4612_v34  ;;  %1243 = vmatmul.f32.vlgmr.msra.gmra.mxu2 %v4219_v14  ;;  %v5555_v14 = vld [vmem:[#allocation46_spill] sm:$0xff] }
 0x241   : > { %1263 = vmatmul.f32.vlgmr.msra.gmra.mxu3 %v4221_v28  ;;  %1345 = vmatpush.msrb.mxu0 %v3441_v58  ;;  %v5517_v58 = vld [vmem:[#allocation3_spill] sm:$0xff] }
 0x242   : > { %1365 = vmatpush.msrb.mxu1 %v3447_v57  ;;  %1385 = vmatpush.msrb.mxu2 %v3453_v61  ;;  %v5518_v57 = vld [vmem:[#allocation4_spill] sm:$0xff]  ;;  %v5519_v61 = vld [vmem:[#allocation7_spill] sm:$0xff] }
 0x243   : > { %1405 = vmatpush.msrb.mxu3 %v3459_v62  ;;  %1346 = vmatpush.msrb.mxu0 %v3465_v0  ;;  %v5520_v62 = vld [vmem:[#allocation8_spill] sm:$0xff]  ;;  %v5521_v0 = vld [vmem:[#allocation5_spill] sm:$0xff]  ;;  %v5556_v28 = vld [vmem:[#allocation47_spill] sm:$0xff] }
 0x244   : > { %1366 = vmatpush.msrb.mxu1 %v3471_v32  ;;  %1386 = vmatpush.msrb.mxu2 %v3477_v33  ;;  %v5522_v32 = vld [vmem:[#allocation6_spill] sm:$0xff]  ;;  %v5523_v33 = vld [vmem:[#allocation9_spill] sm:$0xff] }
 0x245   : > { %1406 = vmatpush.msrb.mxu3 %v3483_v36  ;;  %1347 = vmatpush.msrb.mxu0 %v3489_v37  ;;  %v5524_v36 = vld [vmem:[#allocation10_spill] sm:$0xff]  ;;  %v5525_v37 = vld [vmem:[#allocation11_spill] sm:$0xff] }
 0x246   : > { %1367 = vmatpush.msrb.mxu1 %v3495_v38  ;;  %1387 = vmatpush.msrb.mxu2 %v3501_v39  ;;  %v5526_v38 = vld [vmem:[#allocation12_spill] sm:$0xff]  ;;  %v5527_v39 = vld [vmem:[#allocation14_spill] sm:$0xff] }
 0x247   : > { %1407 = vmatpush.msrb.mxu3 %v3507_v40  ;;  %1348 = vmatpush.msrb.mxu0 %v3513_v41  ;;  %v5528_v40 = vld [vmem:[#allocation15_spill] sm:$0xff]  ;;  %v5529_v41 = vld [vmem:[#allocation16_spill] sm:$0xff] }
 0x248   : > { %1368 = vmatpush.msrb.mxu1 %v3519_v42  ;;  %1388 = vmatpush.msrb.mxu2 %v3525_v43  ;;  %v5530_v42 = vld [vmem:[#allocation17_spill] sm:$0xff]  ;;  %v5531_v43 = vld [vmem:[#allocation20_spill] sm:$0xff] }
 0x249   : > { %1408 = vmatpush.msrb.mxu3 %v3531_v44  ;;  %1349 = vmatpush.msrb.mxu0 %v3537_v45  ;;  %v5532_v44 = vld [vmem:[#allocation21_spill] sm:$0xff]  ;;  %v5533_v45 = vld [vmem:[#allocation18_spill] sm:$0xff] }
 0x24a   : > { %1369 = vmatpush.msrb.mxu1 %v3543_v46  ;;  %1389 = vmatpush.msrb.mxu2 %v3549_v47  ;;  %v5534_v46 = vld [vmem:[#allocation19_spill] sm:$0xff]  ;;  %v5535_v47 = vld [vmem:[#allocation24_spill] sm:$0xff] }
 0x24b   : > { %1409 = vmatpush.msrb.mxu3 %v3555_v48  ;;  %1350 = vmatpush.msrb.mxu0 %v3561_v49  ;;  %v5536_v48 = vld [vmem:[#allocation25_spill] sm:$0xff]  ;;  %v5537_v49 = vld [vmem:[#allocation22_spill] sm:$0xff] }
 0x24c   : > { %1370 = vmatpush.msrb.mxu1 %v3567_v50  ;;  %1390 = vmatpush.msrb.mxu2 %v3573_v51  ;;  %v5538_v50 = vld [vmem:[#allocation23_spill] sm:$0xff]  ;;  %v5539_v51 = vld [vmem:[#allocation28_spill] sm:$0xff] }
 0x24d   : > { %1410 = vmatpush.msrb.mxu3 %v3579_v52  ;;  %1351 = vmatpush.msrb.mxu0 %v3585_v56  ;;  %v5540_v52 = vld [vmem:[#allocation29_spill] sm:$0xff]  ;;  %v5541_v56 = vld [vmem:[#allocation26_spill] sm:$0xff] }
 0x24e   : > { %1371 = vmatpush.msrb.mxu1 %v3591_v59  ;;  %1391 = vmatpush.msrb.mxu2 %v3597_v60  ;;  %v5542_v59 = vld [vmem:[#allocation27_spill] sm:$0xff]  ;;  %v5543_v60 = vld [vmem:[#allocation32_spill] sm:$0xff] }
 0x24f   : > { %1411 = vmatpush.msrb.mxu3 %v3603_v1  ;;  %1352 = vmatpush.msrb.mxu0 %v3609_v2  ;;  %v5544_v1 = vld [vmem:[#allocation33_spill] sm:$0xff]  ;;  %v5545_v2 = vld [vmem:[#allocation30_spill] sm:$0xff] }
 0x250   : > { %1372 = vmatpush.msrb.mxu1 %v3615_v3  ;;  %1392 = vmatpush.msrb.mxu2 %v3621_v4  ;;  %v5546_v3 = vld [vmem:[#allocation31_spill] sm:$0xff]  ;;  %v5547_v4 = vld [vmem:[#allocation36_spill] sm:$0xff] }
 0x251   : > { %1412 = vmatpush.msrb.mxu3 %v3627_v6  ;;  %1353 = vmatpush.msrb.mxu0 %v3633_v7  ;;  %v5548_v6 = vld [vmem:[#allocation37_spill] sm:$0xff]  ;;  %v5549_v7 = vld [vmem:[#allocation34_spill] sm:$0xff] }
 0x252   : > { %1373 = vmatpush.msrb.mxu1 %v3639_v8  ;;  %1393 = vmatpush.msrb.mxu2 %v3645_v9  ;;  %v5550_v8 = vld [vmem:[#allocation35_spill] sm:$0xff]  ;;  %v5551_v9 = vld [vmem:[#allocation42_spill] sm:$0xff] }
 0x253   : > { %1413 = vmatpush.msrb.mxu3 %v3651_v10  ;;  %1354 = vmatpush.msrb.mxu0 %v3657_v11  ;;  %v5552_v10 = vld [vmem:[#allocation43_spill] sm:$0xff]  ;;  %v5553_v11 = vld [vmem:[#allocation38_spill] sm:$0xff] }
 0x254   : > { %1374 = vmatpush.msrb.mxu1 %v3663_v12  ;;  %1394 = vmatpush.msrb.mxu2 %v5517_v58  ;;  %v5554_v12 = vld [vmem:[#allocation39_spill] sm:$0xff]  ;;  %v5557_v58 = vld [vmem:[#allocation40_spill] sm:$0xff] }
 0x255   : > { %1414 = vmatpush.msrb.mxu3 %v5518_v57  ;;  %1355 = vmatpush.msrb.mxu0 %v5519_v61  ;;  %v5558_v57 = vld [vmem:[#allocation41_spill] sm:$0xff]  ;;  %v5559_v61 = vld [vmem:[#allocation50_spill] sm:$0xff] }
 0x256   : > { %1375 = vmatpush.msrb.mxu1 %v5520_v62  ;;  %1395 = vmatpush.msrb.mxu2 %v5521_v0  ;;  %v5560_v62 = vld [vmem:[#allocation51_spill] sm:$0xff]  ;;  %v5561_v0 = vld [vmem:[#allocation44_spill] sm:$0xff] }
 0x257   : > { %1415 = vmatpush.msrb.mxu3 %v5522_v32  ;;  %1356 = vmatpush.msrb.mxu0 %v5523_v33  ;;  %v5562_v32 = vld [vmem:[#allocation45_spill] sm:$0xff]  ;;  %v5563_v33 = vld [vmem:[#allocation54_spill] sm:$0xff] }
 0x258   : > { %1376 = vmatpush.msrb.mxu1 %v5524_v36  ;;  %1396 = vmatpush.msrb.mxu2 %v5525_v37  ;;  %v5564_v36 = vld [vmem:[#allocation55_spill] sm:$0xff]  ;;  %v5565_v37 = vld [vmem:[#allocation48_spill] sm:$0xff] }
 0x259   : > { %1416 = vmatpush.msrb.mxu3 %v5526_v38  ;;  %1357 = vmatpush.msrb.mxu0 %v5527_v39  ;;  %v5566_v38 = vld [vmem:[#allocation49_spill] sm:$0xff]  ;;  %v5567_v39 = vld [vmem:[#allocation58_spill] sm:$0xff] }
 0x25a   : > { %1377 = vmatpush.msrb.mxu1 %v5528_v40  ;;  %1397 = vmatpush.msrb.mxu2 %v5529_v41  ;;  %v5568_v40 = vld [vmem:[#allocation59_spill] sm:$0xff]  ;;  %v5569_v41 = vld [vmem:[#allocation52_spill] sm:$0xff] }
 0x25b   : > { %1417 = vmatpush.msrb.mxu3 %v5530_v42  ;;  %1358 = vmatpush.msrb.mxu0 %v5531_v43  ;;  %v5570_v42 = vld [vmem:[#allocation53_spill] sm:$0xff]  ;;  %v5571_v43 = vld [vmem:[#allocation62_spill] sm:$0xff] }
 0x25c   : > { %1378 = vmatpush.msrb.mxu1 %v5532_v44  ;;  %1398 = vmatpush.msrb.mxu2 %v5533_v45  ;;  %v5572_v44 = vld [vmem:[#allocation63_spill] sm:$0xff]  ;;  %v5573_v45 = vld [vmem:[#allocation56_spill] sm:$0xff] }
 0x25d   : > { %1418 = vmatpush.msrb.mxu3 %v5534_v46  ;;  %1359 = vmatpush.msrb.mxu0 %v5535_v47  ;;  %v5574_v46 = vld [vmem:[#allocation57_spill] sm:$0xff]  ;;  %v5575_v47 = vld [vmem:[#allocation66_spill] sm:$0xff] }
 0x25e   : > { %1379 = vmatpush.msrb.mxu1 %v5536_v48  ;;  %1399 = vmatpush.msrb.mxu2 %v5537_v49  ;;  %v5576_v48 = vld [vmem:[#allocation67_spill] sm:$0xff]  ;;  %v5577_v49 = vld [vmem:[#allocation60_spill] sm:$0xff] }
 0x25f   : > { %1419 = vmatpush.msrb.mxu3 %v5538_v50  ;;  %1360 = vmatpush.msrb.mxu0 %v5539_v51  ;;  %v5578_v50 = vld [vmem:[#allocation61_spill] sm:$0xff]  ;;  %v5579_v51 = vld [vmem:[#allocation72_spill] sm:$0xff] }
 0x260   : > { %1380 = vmatpush.msrb.mxu1 %v5540_v52  ;;  %1400 = vmatpush.msrb.mxu2 %v5541_v56  ;;  %v5580_v52 = vld [vmem:[#allocation73_spill] sm:$0xff]  ;;  %v5581_v56 = vld [vmem:[#allocation64_spill] sm:$0xff] }
 0x261   : > { %1420 = vmatpush.msrb.mxu3 %v5542_v59  ;;  %1425 = vmatpush.msra.mxu0 %v5543_v60  ;;  %v5582_v59 = vld [vmem:[#allocation65_spill] sm:$0xff]  ;;  %v5583_v60 = vld [vmem:[#allocation76_spill] sm:$0xff] }
 0x262   : > { %1445 = vmatpush.msra.mxu1 %v5544_v1  ;;  %1465 = vmatpush.msra.mxu2 %v5545_v2  ;;  %v5584_v1 = vld [vmem:[#allocation77_spill] sm:$0xff]  ;;  %v5585_v2 = vld [vmem:[#allocation68_spill] sm:$0xff] }
 0x263   : > { %1485 = vmatpush.msra.mxu3 %v5546_v3  ;;  %1426 = vmatpush.msra.mxu0 %v5547_v4  ;;  %v5586_v3 = vld [vmem:[#allocation69_spill] sm:$0xff]  ;;  %v5587_v4 = vld [vmem:[#allocation80_spill] sm:$0xff] }
 0x264   : > { %1446 = vmatpush.msra.mxu1 %v5548_v6  ;;  %1466 = vmatpush.msra.mxu2 %v5549_v7  ;;  %v5588_v6 = vld [vmem:[#allocation81_spill] sm:$0xff]  ;;  %v5589_v7 = vld [vmem:[#allocation84_spill] sm:$0xff] }
 0x265   : > { %1486 = vmatpush.msra.mxu3 %v5550_v8  ;;  %1427 = vmatpush.msra.mxu0 %v5551_v9  ;;  %v5590_v8 = vld [vmem:[#allocation85_spill] sm:$0xff] }
 0x266   : > { %1447 = vmatpush.msra.mxu1 %v5552_v10  ;;  %1467 = vmatpush.msra.mxu2 %v5553_v11  ;;  %v5591_v9 = vld [vmem:[#allocation13_spill] sm:$0xff]  ;;  %v5592_v10 = vld [vmem:[#allocation86_spill] sm:$0xff]  ;;  %v5593_v11 = vld [vmem:[#allocation87_spill] sm:$0xff] }
 0x267   : > { %1487 = vmatpush.msra.mxu3 %v5554_v12  ;;  %1428 = vmatpush.msra.mxu0 %v5555_v14  ;;  %v5594_v12 = vld [vmem:[#allocation70_spill] sm:$0xff]  ;;  %v5595_v14 = vld [vmem:[#allocation71_spill] sm:$0xff] }
 0x268   : > { %1448 = vmatpush.msra.mxu1 %v5556_v28  ;;  %1468 = vmatpush.msra.mxu2 %v5557_v58  ;;  %v5596_v28 = vld [vmem:[#allocation90_spill] sm:$0xff]  ;;  %v5597_v58 = vld [vmem:[#allocation91_spill] sm:$0xff] }
 0x269   : > { %1488 = vmatpush.msra.mxu3 %v5558_v57  ;;  %1429 = vmatpush.msra.mxu0 %v5559_v61  ;;  %v5598_v57 = vld [vmem:[#allocation74_spill] sm:$0xff]  ;;  %v5599_v61 = vld [vmem:[#allocation75_spill] sm:$0xff] }
 0x26a   : > { %1449 = vmatpush.msra.mxu1 %v5560_v62  ;;  %1469 = vmatpush.msra.mxu2 %v5561_v0  ;;  %v5600_v62 = vld [vmem:[#allocation94_spill] sm:$0xff]  ;;  %v5601_v0 = vld [vmem:[#allocation95_spill] sm:$0xff] }
 0x26b   : > { %1489 = vmatpush.msra.mxu3 %v5562_v32  ;;  %1430 = vmatpush.msra.mxu0 %v5563_v33  ;;  %v5602_v32 = vld [vmem:[#allocation78_spill] sm:$0xff]  ;;  %v5603_v33 = vld [vmem:[#allocation79_spill] sm:$0xff] }
 0x26c   : > { %1450 = vmatpush.msra.mxu1 %v5564_v36  ;;  %1470 = vmatpush.msra.mxu2 %v5565_v37  ;;  %v5604_v36 = vld [vmem:[#allocation98_spill] sm:$0xff]  ;;  %v5605_v37 = vld [vmem:[#allocation99_spill] sm:$0xff] }
 0x26d   : > { %1490 = vmatpush.msra.mxu3 %v5566_v38  ;;  %1431 = vmatpush.msra.mxu0 %v5567_v39  ;;  %v5606_v38 = vld [vmem:[#allocation82_spill] sm:$0xff] }
 0x26e   : > { %1451 = vmatpush.msra.mxu1 %v5568_v40  ;;  %1471 = vmatpush.msra.mxu2 %v5569_v41 }
 0x26f   : > { %1491 = vmatpush.msra.mxu3 %v5570_v42  ;;  %1432 = vmatpush.msra.mxu0 %v5571_v43 }
 0x270   : > { %1452 = vmatpush.msra.mxu1 %v5572_v44  ;;  %1472 = vmatpush.msra.mxu2 %v5573_v45  ;;  %v1731_v45 = vld [vmem:[%s2031_s22 + $0x18] sm:$0xff] }
 0x271   : > { %1492 = vmatpush.msra.mxu3 %v5574_v46  ;;  %1433 = vmatpush.msra.mxu0 %v5575_v47 }
 0x272   : > { %1453 = vmatpush.msra.mxu1 %v5576_v48  ;;  %1473 = vmatpush.msra.mxu2 %v5577_v49 }
 0x273   : > { %1493 = vmatpush.msra.mxu3 %v5578_v50  ;;  %1434 = vmatpush.msra.mxu0 %v5579_v51 }
 0x274   : > { %1454 = vmatpush.msra.mxu1 %v5580_v52  ;;  %1474 = vmatpush.msra.mxu2 %v5581_v56 }
 0x275   : > { %1494 = vmatpush.msra.mxu3 %v5582_v59  ;;  %1435 = vmatpush.msra.mxu0 %v5583_v60  ;;  %v1293_v60 = vrot.slane %v1731_v45, 4 }
 0x276   : > { %1455 = vmatpush.msra.mxu1 %v5584_v1  ;;  %1475 = vmatpush.msra.mxu2 %v5585_v2 }
 0x277   : > { %1495 = vmatpush.msra.mxu3 %v5586_v3  ;;  %1436 = vmatpush.msra.mxu0 %v5587_v4 }
 0x278   : > { %1456 = vmatpush.msra.mxu1 %v5588_v6  ;;  %1476 = vmatpush.msra.mxu2 %v5589_v7 }
 0x279   : > { %1496 = vmatpush.msra.mxu3 %v5590_v8  ;;  %1437 = vmatpush.msra.mxu0 %v5591_v9 }
 0x27a   : > { %1457 = vmatpush.msra.mxu1 %v5592_v10  ;;  %1477 = vmatpush.msra.mxu2 %v5593_v11 }
 0x27b   : > { %1497 = vmatpush.msra.mxu3 %v5594_v12  ;;  %1438 = vmatpush.msra.mxu0 %v5595_v14 }
 0x27c   : > { %1458 = vmatpush.msra.mxu1 %v5596_v28  ;;  %1478 = vmatpush.msra.mxu2 %v5597_v58 }
 0x27d   : > { %1498 = vmatpush.msra.mxu3 %v5598_v57  ;;  %1439 = vmatpush.msra.mxu0 %v5599_v61 }
 0x27e   : > { %1459 = vmatpush.msra.mxu1 %v5600_v62  ;;  %1479 = vmatpush.msra.mxu2 %v5601_v0 }
 0x27f   : > { %1499 = vmatpush.msra.mxu3 %v5602_v32  ;;  %1440 = vmatpush.msra.mxu0 %v5603_v33 }
 0x280   : > { %1460 = vmatpush.msra.mxu1 %v5604_v36  ;;  %1480 = vmatpush.msra.mxu2 %v5605_v37 }
 0x281   : > { %1500 = vmatpush.msra.mxu3 %v5606_v38 }
 0x289   : > { %v1044_v39 = vpop.f32.mrf.mxu0  ;;  %v1064_v40 = vpop.f32.mrf.mxu1 }
 0x28a   : > { %v1065_v44 = vadd.f32 %v1064_v40, %v1044_v39 }
 0x290   : > { %v1084_v41 = vpop.f32.mrf.mxu2  ;;  %v1104_v42 = vpop.f32.mrf.mxu3 }
 0x291   : > { %v1105_v43 = vadd.f32 %v1104_v42, %v1084_v41 }
 0x293   : > { %v1269_v46 = vrot.slane %v1105_v43, 6  ;;  %v1124_v50 = vpop.f32.mrf.mxu0  ;;  %v1144_v51 = vpop.f32.mrf.mxu1 }
 0x294   : > { %v1145_v1 = vadd.f32 %v1144_v51, %v1124_v50 }
 0x295   : > { %v1270_v47 = vsel %vm629_vm0, %v1065_v44, %v1269_v46 }
 0x296   : > { %v1272_v48 = vadd.f32 %v1731_v45, %v1270_v47 }
 0x298   : > { %v1733_v49 = vmul.f32 -1.442695, %v1272_v48  ;;  %v1732_v48 = vld [vmem:[%s2031_s22 + $0x20] sm:$0xf] }
 0x29a   : > { %1774 = vpow2.f32 %v1733_v49  ;;  %v1164_v52 = vpop.f32.mrf.mxu2  ;;  %v1184_v56 = vpop.f32.mrf.mxu3 }
 0x29b   : > { %v1185_v59 = vadd.f32 %v1184_v56, %v1164_v52 }
 0x29d   : > { %v1297_v2 = vrot.slane %v1185_v59, 6 }
 0x29f   : > { %v1298_v3 = vsel %vm629_vm0, %v1145_v1, %v1297_v2 }
 0x2a0   : > { %v1775_v4 = vpop.eup %1774  ;;  %v1300_v6 = vadd.f32 %v1298_v3, %v1293_v60 }
 0x2a1   : > { %v1276_v7 = vadd.f32 1.0, %v1775_v4 }
 0x2a2   : > { %v1734_v8 = vmul.f32 -1.442695, %v1300_v6 }
 0x2a3   : > { %1776 = vrcp.f32 %v1276_v7  ;;  %v1288_v38 = vand.u32 2147483648, %v1276_v7  ;;  %vm1282_vm3 = vweird.f32 %v1276_v7  ;;  %v1286_v40 = vand.u32 2147483647, %v1276_v7 }
 0x2a4   : > { %1778 = vpow2.f32 %v1734_v8 }
 0x2a5   : > { %v1289_v45 = vor.u32 1.1754944e-38, %v1288_v38  ;;  %vm1287_vm5 = vcmp.eq.f32.partialorder %v1286_v40, 8.507059e+37  ;;  %v5638_v38 = vld [vmem:[#allocation132_spill] sm:$0xff] }
 0x2a6   : > { %v5640_v40 = vld [vmem:[#allocation120_spill] sm:$0xff] }
 0x2a9   : > { %v1777_v9 = vpop.eup %1776 }
 0x2aa   : > { %v1779_v10 = vpop.eup %1778  ;;  %v1278_v11 = vmul.f32 %v1777_v9, %v1276_v7  ;;  %vm1283_vm2 = vweird.f32 %v1777_v9 }
 0x2ab   : > { %v1304_v12 = vadd.f32 1.0, %v1779_v10  ;;  %vm1284_vm4 = vmor %vm1282_vm3, %vm1283_vm2 }
 0x2ac   : > { %v1279_v14 = vsub.f32 1.0, %v1278_v11  ;;  %v5625_v11 = vld [vmem:[#allocation119_spill] sm:$0xff] }
 0x2ad   : > { %1780 = vrcp.f32 %v1304_v12  ;;  %v1316_v51 = vand.u32 2147483648, %v1304_v12  ;;  %vm1310_vm7 = vweird.f32 %v1304_v12  ;;  %v1314_v56 = vand.u32 2147483647, %v1304_v12 }
 0x2ae   : > { %v1280_v28 = vmul.f32 %v1777_v9, %v1279_v14  ;;  %v5627_v14 = vld [vmem:[#allocation105_spill] sm:$0xff] }
 0x2af   : > { %v1317_v1 = vor.u32 1.1754944e-38, %v1316_v51  ;;  %vm1315_vm9 = vcmp.eq.f32.partialorder %v1314_v56, 8.507059e+37 }
 0x2b0   : > { %v1281_v33 = vadd.f32 %v1777_v9, %v1280_v28  ;;  %v5628_v28 = vld [vmem:[#allocation122_spill] sm:$0xff] }
 0x2b2   : > { %v1285_v43 = vsel %vm1284_vm4, %v1777_v9, %v1281_v33  ;;  %v5635_v33 = vld [vmem:[#allocation113_spill] sm:$0xff] }
 0x2b3   : > { %v1781_v61 = vpop.eup %1780  ;;  %v1290_v49 = vsel %vm1287_vm5, %v1289_v45, %v1285_v43  ;;  %v5643_v43 = vld [vmem:[#allocation125_spill] sm:$0xff] }
 0x2b4   : > { %v1306_v62 = vmul.f32 %v1781_v61, %v1304_v12  ;;  %vm1311_vm6 = vweird.f32 %v1781_v61  ;;  %v5626_v12 = vld [vmem:[#allocation104_spill] sm:$0xff]  ;;  %v5645_v45 = vld [vmem:[#allocation129_spill] sm:$0xff] }
 0x2b5   : > { %vm1312_vm8 = vmor %vm1310_vm7, %vm1311_vm6 }
 0x2b6   : > { %v1307_v39 = vsub.f32 1.0, %v1306_v62  ;;  %v5632_v62 = vld [vmem:[#allocation126_spill] sm:$0xff] }
 0x2b8   : > { %v1308_v42 = vmul.f32 %v1781_v61, %v1307_v39  ;;  %v5639_v39 = vld [vmem:[#allocation133_spill] sm:$0xff] }
 0x2ba   : > { %v1309_v47 = vadd.f32 %v1781_v61, %v1308_v42  ;;  %v5642_v42 = vld [vmem:[#allocation124_spill] sm:$0xff] }
 0x2bb   : > { %v1204_v58 = vpop.f32.mrf.mxu0 }
 0x2bc   : > { %v1224_v57 = vpop.f32.mrf.mxu1  ;;  %v1313_v60 = vsel %vm1312_vm8, %v1781_v61, %v1309_v47  ;;  %v5631_v61 = vld [vmem:[#allocation109_spill] sm:$0xff]  ;;  %v5647_v47 = vld [vmem:[#allocation131_spill] sm:$0xff] }
 0x2bd   : > { %v1225_v36 = vadd.f32 %v1224_v57, %v1204_v58  ;;  %v1318_v2 = vsel %vm1315_vm9, %v1317_v1, %v1313_v60  ;;  %v5629_v58 = vld [vmem:[#allocation123_spill] sm:$0xff]  ;;  %v5630_v57 = vld [vmem:[#allocation108_spill] sm:$0xff]  ;;  %v1736_v60 = vld [vmem:[%s2031_s22 + $0x24] sm:$0xff] }
 0x2be   : > { %v1330_v3 = vsub.f32 1.0, %v1318_v2  ;;  %v1332_v7 = vmul.f32 %v1318_v2, %v4214_v29  ;;  %v5607_v29 = vld [vmem:[#allocation83_spill] sm:$0xff] }
 0x2bf   : > { %v1320_v44 = vadd.f32 %v1225_v36, %v3344_v5  ;;  %v5636_v36 = vld [vmem:[#allocation116_spill] sm:$0xff] }
 0x2c3   : > { %v1244_v0 = vpop.f32.mrf.mxu2 }
 0x2c4   : > { %v1264_v32 = vpop.f32.mrf.mxu3 }
 0x2c5   : > { %v1265_v37 = vadd.f32 %v1264_v32, %v1244_v0  ;;  %v5633_v0 = vld [vmem:[#allocation127_spill] sm:$0xff]  ;;  %v5634_v32 = vld [vmem:[#allocation112_spill] sm:$0xff] }
 0x2c7   : > { %v1321_v41 = vadd.f32 %v1265_v37, %v3338_v55  ;;  %v5637_v37 = vld [vmem:[#allocation117_spill] sm:$0xff] }
 0x2c9   : > { %v1324_v46 = vrot.slane %v1321_v41, 6  ;;  %v5641_v41 = vld [vmem:[#allocation121_spill] sm:$0xff] }
 0x2cb   : > { %v1325_v50 = vsel %vm629_vm0, %v1320_v44, %v1324_v46  ;;  %v5644_v44 = vld [vmem:[#allocation128_spill] sm:$0xff]  ;;  %v5646_v46 = vld [vmem:[#allocation130_spill] sm:$0xff] }
 0x2cc   : > { %v1327_v52 = vmul.f32 %v1325_v50, %v1290_v49  ;;  %v5649_v49 = vld [vmem:[#allocation135_spill] sm:$0xff] }
 0x2ce   : > { %v1328_v59 = vadd.f32 %v1732_v48, %v1327_v52  ;;  %v5648_v48 = vld [vmem:[#allocation134_spill] sm:$0xff] }
 0x2d0   : > { %1782 = vtanh.f32 %v1328_v59 }
 0x2d6   : > { %v1783_v4 = vpop.eup %1782 }
 0x2d7   : > { %v1331_v6 = vmul.f32 %v1783_v4, %v1330_v3 }
 0x2d9   : > { %v4755_v8 = vadd.f32 %v1332_v7, %v1331_v6 }
 0x2db   : > { %1735 = vst [vmem:[%s2026_s19 + $0x8] sm:$0xf] %v4755_v8 }
 0x2dc   : > { %1340 = vst [vmem:[#allocation1] ss:$4 sm:$0xff] %v4755_v8 }
 0x2e3   : > { %v4760_v9 = vld.sshfl [vmem:[#allocation1] sm:$0xff pattern:$0x73625140]  ;;  %v4762_v10 = vld.sshfl [vmem:[#allocation1 + $0x8] sm:$0xff pattern:$0x73625140] }
 0x2e4   : > { %1361 = vmatmul.f32.vlgmr.msrb.gmra.mxu0 %v4760_v9  ;;  %1381 = vmatmul.f32.vlgmr.msrb.gmra.mxu1 %v4762_v10 }
 0x2e5   : > { %1401 = vmatmul.f32.vlgmr.msrb.gmra.mxu2 %v4760_v9  ;;  %1421 = vmatmul.f32.vlgmr.msrb.gmra.mxu3 %v4762_v10 }
 0x2e6   : > { %1505 = vmatpush.msrb.mxu0 %v4230_v31  ;;  %1525 = vmatpush.msrb.mxu1 %v4236_v13  ;;  %v5608_v31 = vld [vmem:[#allocation102_spill] sm:$0xff]  ;;  %v5609_v13 = vld [vmem:[#allocation103_spill] sm:$0xff] }
 0x2e7   : > { %1545 = vmatpush.msrb.mxu2 %v4242_v21  ;;  %1565 = vmatpush.msrb.mxu3 %v4248_v54  ;;  %v5610_v21 = vld [vmem:[#allocation88_spill] sm:$0xff]  ;;  %v5611_v54 = vld [vmem:[#allocation89_spill] sm:$0xff] }
 0x2e8   : > { %1506 = vmatpush.msrb.mxu0 %v4254_v25  ;;  %1526 = vmatpush.msrb.mxu1 %v4260_v24  ;;  %v5612_v25 = vld [vmem:[#allocation106_spill] sm:$0xff]  ;;  %v5613_v24 = vld [vmem:[#allocation107_spill] sm:$0xff] }
 0x2e9   : > { %1546 = vmatpush.msrb.mxu2 %v4266_v53  ;;  %1566 = vmatpush.msrb.mxu3 %v4272_v23  ;;  %v5614_v53 = vld [vmem:[#allocation92_spill] sm:$0xff]  ;;  %v5615_v23 = vld [vmem:[#allocation93_spill] sm:$0xff] }
 0x2ea   : > { %1507 = vmatpush.msrb.mxu0 %v4278_v63  ;;  %1527 = vmatpush.msrb.mxu1 %v4284_v20  ;;  %v5616_v63 = vld [vmem:[#allocation110_spill] sm:$0xff]  ;;  %v5617_v20 = vld [vmem:[#allocation111_spill] sm:$0xff] }
 0x2eb   : > { %1547 = vmatpush.msrb.mxu2 %v4290_v19  ;;  %1567 = vmatpush.msrb.mxu3 %v4296_v22  ;;  %v5618_v19 = vld [vmem:[#allocation96_spill] sm:$0xff]  ;;  %v5619_v22 = vld [vmem:[#allocation97_spill] sm:$0xff] }
 0x2ec   : > { %1508 = vmatpush.msrb.mxu0 %v4302_v30  ;;  %1528 = vmatpush.msrb.mxu1 %v4308_v27  ;;  %v5620_v30 = vld [vmem:[#allocation114_spill] sm:$0xff]  ;;  %v5621_v27 = vld [vmem:[#allocation115_spill] sm:$0xff] }
 0x2ed   : > { %1548 = vmatpush.msrb.mxu2 %v4314_v15  ;;  %1568 = vmatpush.msrb.mxu3 %v4320_v26  ;;  %v5622_v15 = vld [vmem:[#allocation100_spill] sm:$0xff]  ;;  %v5623_v26 = vld [vmem:[#allocation101_spill] sm:$0xff] }
 0x2ee   : > { %1441 = vmatmul.f32.vlgmr.msra.gmra.mxu0 %v4760_v9  ;;  %1461 = vmatmul.f32.vlgmr.msra.gmra.mxu1 %v4762_v10 }
 0x2ef   : > { %1481 = vmatmul.f32.vlgmr.msra.gmra.mxu2 %v4760_v9  ;;  %1501 = vmatmul.f32.vlgmr.msra.gmra.mxu3 %v4762_v10 }
 0x2f0   : > { %1509 = vmatpush.msrb.mxu0 %v4330_v17  ;;  %1529 = vmatpush.msrb.mxu1 %v5607_v29  ;;  %v5624_v17 = vld [vmem:[#allocation118_spill] sm:$0xff] }
 0x2f1   : > { %1549 = vmatpush.msrb.mxu2 %v5608_v31  ;;  %1569 = vmatpush.msrb.mxu3 %v5609_v13 }
 0x2f2   : > { %1510 = vmatpush.msrb.mxu0 %v5610_v21  ;;  %1530 = vmatpush.msrb.mxu1 %v5611_v54 }
 0x2f3   : > { %1550 = vmatpush.msrb.mxu2 %v5612_v25  ;;  %1570 = vmatpush.msrb.mxu3 %v5613_v24 }
 0x2f4   : > { %1511 = vmatpush.msrb.mxu0 %v5614_v53  ;;  %1531 = vmatpush.msrb.mxu1 %v5615_v23 }
 0x2f5   : > { %1551 = vmatpush.msrb.mxu2 %v5616_v63  ;;  %1571 = vmatpush.msrb.mxu3 %v5617_v20 }
 0x2f6   : > { %1512 = vmatpush.msrb.mxu0 %v5618_v19  ;;  %1532 = vmatpush.msrb.mxu1 %v5619_v22 }
 0x2f7   : > { %1552 = vmatpush.msrb.mxu2 %v5620_v30  ;;  %1572 = vmatpush.msrb.mxu3 %v5621_v27 }
 0x2f8   : > { %1513 = vmatpush.msrb.mxu0 %v5622_v15  ;;  %1533 = vmatpush.msrb.mxu1 %v5623_v26 }
 0x2f9   : > { %1553 = vmatpush.msrb.mxu2 %v5624_v17  ;;  %1573 = vmatpush.msrb.mxu3 %v5625_v11 }
 0x2fa   : > { %1514 = vmatpush.msrb.mxu0 %v5626_v12  ;;  %1534 = vmatpush.msrb.mxu1 %v5627_v14 }
 0x2fb   : > { %1554 = vmatpush.msrb.mxu2 %v5628_v28  ;;  %1574 = vmatpush.msrb.mxu3 %v5629_v58 }
 0x2fc   : > { %1515 = vmatpush.msrb.mxu0 %v5630_v57  ;;  %1535 = vmatpush.msrb.mxu1 %v5631_v61 }
 0x2fd   : > { %1555 = vmatpush.msrb.mxu2 %v5632_v62  ;;  %1575 = vmatpush.msrb.mxu3 %v5633_v0 }
 0x2fe   : > { %1516 = vmatpush.msrb.mxu0 %v5634_v32  ;;  %1536 = vmatpush.msrb.mxu1 %v5635_v33 }
 0x2ff   : > { %1556 = vmatpush.msrb.mxu2 %v5636_v36  ;;  %1576 = vmatpush.msrb.mxu3 %v5637_v37 }
 0x300   : > { %1517 = vmatpush.msrb.mxu0 %v5638_v38  ;;  %1537 = vmatpush.msrb.mxu1 %v5639_v39  ;;  %v1737_v38 = vld [vmem:[%s2031_s22 + $0x2c] sm:$0xf] }
 0x301   : > { %1557 = vmatpush.msrb.mxu2 %v5640_v40  ;;  %1577 = vmatpush.msrb.mxu3 %v5641_v41 }
 0x302   : > { %1518 = vmatpush.msrb.mxu0 %v5642_v42  ;;  %1538 = vmatpush.msrb.mxu1 %v5643_v43 }
 0x303   : > { %1558 = vmatpush.msrb.mxu2 %v5644_v44  ;;  %1578 = vmatpush.msrb.mxu3 %v5645_v45 }
 0x304   : > { %1519 = vmatpush.msrb.mxu0 %v5646_v46  ;;  %1539 = vmatpush.msrb.mxu1 %v5647_v47 }
 0x305   : > { %1559 = vmatpush.msrb.mxu2 %v5648_v48  ;;  %1579 = vmatpush.msrb.mxu3 %v5649_v49 }
 0x306   : > { %1520 = vmatpush.msrb.mxu0 %v4594_v35  ;;  %1540 = vmatpush.msrb.mxu1 %v4600_v16 }
 0x307   : > { %1560 = vmatpush.msrb.mxu2 %v4606_v18  ;;  %1580 = vmatpush.msrb.mxu3 %v4612_v34 }
 0x308   : > { %1521 = vmatmul.f32.vlgmr.msrb.gmra.mxu0 %v4760_v9  ;;  %1541 = vmatmul.f32.vlgmr.msrb.gmra.mxu1 %v4762_v10 }
 0x309   : > { %1561 = vmatmul.f32.vlgmr.msrb.gmra.mxu2 %v4760_v9  ;;  %1581 = vmatmul.f32.vlgmr.msrb.gmra.mxu3 %v4762_v10  ;;  %v1611_v9 = vrot.slane %v1736_v60, 4 }
 0x361   : > { %v1362_v50 = vpop.f32.mrf.mxu0  ;;  %v1382_v51 = vpop.f32.mrf.mxu1 }
 0x362   : > { %v1383_v35 = vadd.f32 %v1382_v51, %v1362_v50 }
 0x368   : > { %v1402_v52 = vpop.f32.mrf.mxu2  ;;  %v1422_v56 = vpop.f32.mrf.mxu3 }
 0x369   : > { %v1423_v59 = vadd.f32 %v1422_v56, %v1402_v52 }
 0x36b   : > { %v1587_v16 = vrot.slane %v1423_v59, 6  ;;  %v1442_v2 = vpop.f32.mrf.mxu0  ;;  %v1462_v3 = vpop.f32.mrf.mxu1 }
 0x36c   : > { %v1463_v10 = vadd.f32 %v1462_v3, %v1442_v2 }
 0x36d   : > { %v1588_v18 = vsel %vm629_vm0, %v1383_v35, %v1587_v16 }
 0x36e   : > { %v1590_v1 = vadd.f32 %v1736_v60, %v1588_v18 }
 0x370   : > { %v1738_v34 = vmul.f32 -1.442695, %v1590_v1 }
 0x372   : > { %1784 = vpow2.f32 %v1738_v34  ;;  %v1482_v4 = vpop.f32.mrf.mxu2  ;;  %v1502_v6 = vpop.f32.mrf.mxu3 }
 0x373   : > { %v1503_v7 = vadd.f32 %v1502_v6, %v1482_v4 }
 0x375   : > { %v1615_v29 = vrot.slane %v1503_v7, 6 }
 0x377   : > { %v1616_v31 = vsel %vm629_vm0, %v1463_v10, %v1615_v29 }
 0x378   : > { %v1785_v13 = vpop.eup %1784  ;;  %v1618_v21 = vadd.f32 %v1616_v31, %v1611_v9 }
 0x379   : > { %v1594_v54 = vadd.f32 1.0, %v1785_v13 }
 0x37a   : > { %v1739_v25 = vmul.f32 -1.442695, %v1618_v21 }
 0x37b   : > { %1786 = vrcp.f32 %v1594_v54  ;;  %v1606_v28 = vand.u32 2147483648, %v1594_v54  ;;  %vm1600_vm11 = vweird.f32 %v1594_v54  ;;  %v1604_v57 = vand.u32 2147483647, %v1594_v54 }
 0x37c   : > { %1788 = vpow2.f32 %v1739_v25 }
 0x37d   : > { %v1607_v33 = vor.u32 1.1754944e-38, %v1606_v28  ;;  %vm1605_vm13 = vcmp.eq.f32.partialorder %v1604_v57, 8.507059e+37 }
 0x381   : > { %v1787_v24 = vpop.eup %1786 }
 0x382   : > { %v1789_v53 = vpop.eup %1788  ;;  %v1596_v23 = vmul.f32 %v1787_v24, %v1594_v54  ;;  %vm1601_vm10 = vweird.f32 %v1787_v24 }
 0x383   : > { %v1622_v63 = vadd.f32 1.0, %v1789_v53  ;;  %vm1602_vm12 = vmor %vm1600_vm11, %vm1601_vm10 }
 0x384   : > { %v1597_v20 = vsub.f32 1.0, %v1596_v23 }
 0x385   : > { %1790 = vrcp.f32 %v1622_v63  ;;  %v1522_v22 = vpop.f32.mrf.mxu0  ;;  %v1542_v30 = vpop.f32.mrf.mxu1  ;;  %v1634_v41 = vand.u32 2147483648, %v1622_v63  ;;  %vm1628_vm15 = vweird.f32 %v1622_v63  ;;  %v1632_v43 = vand.u32 2147483647, %v1622_v63 }
 0x386   : > { %v1598_v19 = vmul.f32 %v1787_v24, %v1597_v20  ;;  %v1543_v12 = vadd.f32 %v1542_v30, %v1522_v22 }
 0x387   : > { %v1635_v45 = vor.u32 1.1754944e-38, %v1634_v41  ;;  %vm1633_vm2 = vcmp.eq.f32.partialorder %v1632_v43, 8.507059e+37 }
 0x388   : > { %v1599_v11 = vadd.f32 %v1787_v24, %v1598_v19  ;;  %v1638_v32 = vadd.f32 %v1543_v12, %v3344_v5 }
 0x38a   : > { %v1603_v0 = vsel %vm1602_vm12, %v1787_v24, %v1599_v11 }
 0x38b   : > { %v1791_v27 = vpop.eup %1790  ;;  %v1608_v39 = vsel %vm1605_vm13, %v1607_v33, %v1603_v0 }
 0x38c   : > { %v1624_v15 = vmul.f32 %v1791_v27, %v1622_v63  ;;  %v1562_v26 = vpop.f32.mrf.mxu2  ;;  %v1582_v17 = vpop.f32.mrf.mxu3  ;;  %vm1629_vm14 = vweird.f32 %v1791_v27 }
 0x38d   : > { %v1583_v14 = vadd.f32 %v1582_v17, %v1562_v26  ;;  %vm1630_vm1 = vmor %vm1628_vm15, %vm1629_vm14 }
 0x38e   : > { %v1625_v58 = vsub.f32 1.0, %v1624_v15 }
 0x38f   : > { %v1639_v61 = vadd.f32 %v1583_v14, %v3338_v55 }
 0x390   : > { %v1626_v62 = vmul.f32 %v1791_v27, %v1625_v58 }
 0x391   : > { %v1642_v36 = vrot.slane %v1639_v61, 6 }
 0x392   : > { %v1627_v37 = vadd.f32 %v1791_v27, %v1626_v62 }
 0x393   : > { %v1643_v40 = vsel %vm629_vm0, %v1638_v32, %v1642_v36 }
 0x394   : > { %v1645_v42 = vmul.f32 %v1643_v40, %v1608_v39  ;;  %v1631_v44 = vsel %vm1630_vm1, %v1791_v27, %v1627_v37 }
 0x395   : > { %v1636_v5 = vsel %vm1633_vm2, %v1635_v45, %v1631_v44 }
 0x396   : > { %v1646_v55 = vadd.f32 %v1737_v38, %v1645_v42  ;;  %v1648_v46 = vsub.f32 1.0, %v1636_v5  ;;  %v1650_v49 = vmul.f32 %v1636_v5, %v4755_v8 }
 0x398   : > { %1792 = vtanh.f32 %v1646_v55 }
 0x39e   : > { %v1793_v47 = vpop.eup %1792 }
 0x39f   : > { %v1649_v48 = vmul.f32 %v1793_v47, %v1648_v46 }
 0x3a1   : > { %v1651_v50 = vadd.f32 %v1650_v49, %v1649_v48 }
 0x3a3   : > { %1740 = vst [vmem:[%s2026_s19 + $0xc] sm:$0xf] %v1651_v50 }
 0x3a4   : > { %1654 = vst [vmem:[#allocation2] sm:$0xf] %v1651_v50 }
 0x3a5 PF: > { %s13_s12 = sadd.s32 1, %s1992_s12  }
 0x3a6   : > { %p10_p5 = scmp.ge.s32.totalorder %s13_s12, 4  }
 0x3a8   :  { %12 = sbr.rel (!%p10_p5) target bundleno = 1 (0x1), region = 72 }

</bundles_post_ra>
